<compile_context>
chip_gen: v6e
topology: v6e:2x2x1
jax: 0.10.0
libtpu: 0.0.40
codegen_flags: <defaults>
</compile_context>

<pallas_src>
from dataclasses import dataclass

import numpy as np
import jax
import jax.numpy as jnp
from jax import lax
from jax.experimental import pallas as pl
from jax.experimental.pallas import tpu as pltpu

GN_GROUPS = 2
GN_EPS = 1e-5
LEAKY_SLOPE = 0.2


def stride_generator(N, reverse=False):
    strides = [1, 2, 1, 2] * 10
    if reverse:
        return list(reversed(strides[:N]))
    return strides[:N]


@dataclass(frozen=True)
class _LayerCfg:
    K: int       # kernel size (odd)
    stride: int
    pad: int
    Hin: int
    Win: int
    Cin: int
    Cout: int

    @property
    def Hp(self):  # padded input height
        return self.Hin + 2 * self.pad

    @property
    def Wp(self):
        return self.Win + 2 * self.pad

    @property
    def He(self):  # stride-1 ("full res") conv output height
        return self.Hin + 2 * self.pad - self.K + 1

    @property
    def We(self):
        return self.Win + 2 * self.pad - self.K + 1

    @property
    def Ho(self):  # strided conv output height
        return (self.He - 1) // self.stride + 1

    @property
    def Wo(self):
        return (self.We - 1) // self.stride + 1


# ----------------------------------------------------------------------------
# Fused encoder kernel: all ConvSC layers for one batch element per grid step.
# ----------------------------------------------------------------------------
def _make_encoder_kernel(cfgs):
    n_layers = len(cfgs)
    strided = [c.stride != 1 for c in cfgs]
    n_strided = sum(strided)

    def kernel(*refs):
        idx = 0
        x_ref = refs[idx]; idx += 1                       # (1, H, W*Cin) f32
        band_refs = refs[idx:idx + n_layers]; idx += n_layers   # (K, Wp*Cin, Wo*Cout) bf16
        aux_refs = refs[idx:idx + n_layers]; idx += n_layers    # (4, Wo*Cout) f32
        sel_refs = refs[idx:idx + n_strided]; idx += n_strided  # (Ho, He) bf16
        out_refs = refs[idx:idx + n_layers]; idx += n_layers    # (1, Ho, Wo*Cout)
        pad_refs = refs[idx:idx + n_layers]                     # (Hp, Wp*Cin) bf16

        # --- zero only the halo strips of every pad buffer (interiors are
        #     fully overwritten below). Done every grid step: with "parallel"
        #     batch semantics each core runs its own program ids. -------------
        for i, c in enumerate(cfgs):
            pref = pad_refs[i]
            p = c.pad
            if p > 0:
                WpC = c.Wp * c.Cin
                pref[0:p, :] = jnp.zeros((p, WpC), pref.dtype)
                pref[p + c.Hin:c.Hp, :] = jnp.zeros(
                    (c.Hp - p - c.Hin, WpC), pref.dtype)
                pref[:, 0:p * c.Cin] = jnp.zeros((c.Hp, p * c.Cin), pref.dtype)
                pref[:, (p + c.Win) * c.Cin:WpC] = jnp.zeros(
                    (c.Hp, (c.Wp - p - c.Win) * c.Cin), pref.dtype)

        # --- stage the (H, W*Cin) input slab into the first pad interior -----
        c0 = cfgs[0]
        pad_refs[0][c0.pad:c0.pad + c0.Hin,
                    c0.pad * c0.Cin:(c0.pad + c0.Win) * c0.Cin] = (
            x_ref[0].astype(pad_refs[0].dtype))

        si = 0
        for i, c in enumerate(cfgs):
            pref = pad_refs[i]
            WoC = c.Wo * c.Cout
            selH = sel_refs[si][...] if strided[i] else None

            # --- conv: K lane-dense matmuls against per-kh band matrices
            #     (W taps + W stride folded on the host).  H stride is applied
            #     by an exact bf16 0/1 selector matmul on the operand rows. ----
            y = None
            for kh in range(c.K):
                lhs = pref[kh:kh + c.He, :]                     # (He, Wp*Cin) bf16
                if strided[i]:
                    lhs = jnp.dot(selH, lhs,
                                  preferred_element_type=jnp.float32
                                  ).astype(jnp.bfloat16)        # (Ho, Wp*Cin), exact
                contrib = jnp.dot(lhs, band_refs[i][kh],
                                  preferred_element_type=jnp.float32)
                y = contrib if y is None else y + contrib       # (Ho, Wo*Cout) f32
            if strided[i]:
                si += 1

            aux = aux_refs[i][...]                              # (4, Wo*Cout) f32
            bias_t, gamma_t, beta_t = aux[0:1, :], aux[1:2, :], aux[2:3, :]
            g0 = aux[3:4, :]
            g1 = 1.0 - g0
            y = y + bias_t

            # --- GroupNorm(GN_GROUPS=2) over (spatial, channels-in-group) ----
            inv_cnt = 1.0 / float(c.Ho * c.Wo * (c.Cout // GN_GROUPS))
            m0 = jnp.sum(y * g0, keepdims=True) * inv_cnt       # (1, 1)
            m1 = jnp.sum(y * g1, keepdims=True) * inv_cnt
            mean_row = g0 * m0 + g1 * m1                        # (1, Wo*Cout)
            d = y - mean_row
            v0 = jnp.sum(d * d * g0, keepdims=True) * inv_cnt
            v1 = jnp.sum(d * d * g1, keepdims=True) * inv_cnt
            rstd_row = g0 * lax.rsqrt(v0 + GN_EPS) + g1 * lax.rsqrt(v1 + GN_EPS)
            yn = d * rstd_row * gamma_t + beta_t

            # --- LeakyReLU(0.2) ----------------------------------------------
            act = jnp.where(yn > 0, yn, LEAKY_SLOPE * yn)       # (Ho, Wo*Cout) f32

            # --- lane-dense output store -------------------------------------
            out_refs[i][...] = act.reshape(1, c.Ho, WoC).astype(out_refs[i].dtype)

            # --- stage the next layer's padded input (stays in VMEM, bf16) ----
            if i + 1 < n_layers:
                cn = cfgs[i + 1]
                pn = pad_refs[i + 1]
                pn[cn.pad:cn.pad + cn.Hin,
                   cn.pad * cn.Cin:(cn.pad + cn.Win) * cn.Cin] = act.astype(pn.dtype)

    return kernel


# ----------------------------------------------------------------------------
# Host-side per-layer constants: band matrices, stride selector, aux rows.
# ----------------------------------------------------------------------------
def _build_layer_constants(p, cfg):
    K, s, pad = cfg.K, cfg.stride, cfg.pad
    Cin, Cout, Wp, Wo = cfg.Cin, cfg.Cout, cfg.Wp, cfg.Wo

    # Ind[kw, w_in, ow] = 1 iff padded input column w_in feeds output column ow
    # through tap kw (w_in = ow*stride + kw).  Pure static geometry.
    ind = np.zeros((K, Wp, Wo), np.float32)
    for kw in range(K):
        for ow in range(Wo):
            ind[kw, ow * s + kw, ow] = 1.0

    # band[kh, w_in*Cin+cin, ow*Cout+cout] = w[kh, kw, cin, cout]
    band = jnp.einsum("abcd,bxo->axcod",
                      p["w"].astype(jnp.float32), jnp.asarray(ind))
    band = band.reshape(K, Wp * Cin, Wo * Cout).astype(jnp.bfloat16)

    # aux rows: [bias tiled, gamma tiled, beta tiled, group-0 indicator]
    Cg = Cout // GN_GROUPS
    gmask0 = np.tile(np.concatenate(
        [np.ones(Cg, np.float32), np.zeros(Cout - Cg, np.float32)]), Wo)
    aux = jnp.stack([jnp.tile(p["b"].astype(jnp.float32), Wo),
                     jnp.tile(p["gamma"].astype(jnp.float32), Wo),
                     jnp.tile(p["beta"].astype(jnp.float32), Wo),
                     jnp.asarray(gmask0)])

    selH = None
    if s != 1:
        sh = np.zeros((cfg.Ho, cfg.He), np.float32)
        sh[np.arange(cfg.Ho), np.arange(cfg.Ho) * s] = 1.0
        selH = jnp.asarray(sh, jnp.bfloat16)
    return band, aux, selH


# ----------------------------------------------------------------------------
# Encoder: single fused pallas_call, returns list of every layer's output.
# ----------------------------------------------------------------------------
def init_encoder_params(key, C_in, C_hid, N_S, kernel_size):
    strides = stride_generator(N_S)
    params = []
    cin = C_in
    for i in range(N_S):
        k = kernel_size[i]
        key, k1, k2, k3, k4 = jax.random.split(key, 5)
        fan_in = cin * k * k
        w = jax.random.normal(k1, (k, k, cin, C_hid), jnp.float32) / jnp.sqrt(
            jnp.float32(fan_in))
        b = 0.05 * jax.random.normal(k2, (C_hid,), jnp.float32)
        gamma = 1.0 + 0.1 * jax.random.normal(k3, (C_hid,), jnp.float32)
        beta = 0.1 * jax.random.normal(k4, (C_hid,), jnp.float32)
        params.append(dict(w=w, b=b, gamma=gamma, beta=beta,
                           stride=strides[i], kernel_size=k))
        cin = C_hid
    return params


def encoder_forward(x_nchw, params):
    """Mirrors Encoder.forward: returns list of each layer's output (NCHW)."""
    N, C_in, H, W = x_nchw.shape
    n_layers = len(params)

    # Static per-layer geometry.
    cfgs = []
    h, w_sp, cin = H, W, C_in
    for p in params:
        k, s = p["kernel_size"], p["stride"]
        assert k % 2 == 1, "pad=(k-1)//2 geometry assumes odd kernel sizes"
        cout = p["w"].shape[-1]
        cfg = _LayerCfg(K=k, stride=s, pad=(k - 1) // 2,
                        Hin=h, Win=w_sp, Cin=cin, Cout=cout)
        cfgs.append(cfg)
        h, w_sp, cin = cfg.Ho, cfg.Wo, cout
    assert cfgs[0].Cout % GN_GROUPS == 0

    # NCHW -> lane-dense (N, H, W*Cin) slab for the kernel.
    x_flat = jnp.transpose(x_nchw, (0, 2, 3, 1)).reshape(N, H, W * C_in)

    bands, auxs, selHs = [], [], []
    for p, c in zip(params, cfgs):
        band, aux, selH = _build_layer_constants(p, c)
        bands.append(band)
        auxs.append(aux)
        if selH is not None:
            selHs.append(selH)

    kernel = _make_encoder_kernel(tuple(cfgs))

    in_specs = ([pl.BlockSpec((1, H, W * C_in), lambda n: (n, 0, 0))]
                + [pl.BlockSpec(b.shape, lambda n: (0, 0, 0)) for b in bands]
                + [pl.BlockSpec(a.shape, lambda n: (0, 0)) for a in auxs]
                + [pl.BlockSpec(s.shape, lambda n: (0, 0)) for s in selHs])
    out_specs = [pl.BlockSpec((1, c.Ho, c.Wo * c.Cout), lambda n: (n, 0, 0))
                 for c in cfgs]
    out_shape = [jax.ShapeDtypeStruct((N, c.Ho, c.Wo * c.Cout), x_nchw.dtype)
                 for c in cfgs]
    # TODO(synk): at realistic SimVP sizes (64-128^2 spatial, C_hid=64), swap
    # the per-layer pad buffers for 2 ping-pong buffers sized to the max layer
    # and set vmem_limit_bytes explicitly to stay inside v7x's 64 MiB VMEM.
    scratch_shapes = [pltpu.VMEM((c.Hp, c.Wp * c.Cin), jnp.bfloat16)
                      for c in cfgs]

    # Advisory cost estimate (kernel is tiny / overhead-bound at these shapes).
    flops = 0
    for c in cfgs:
        flops += 2 * c.K * c.Ho * (c.Wp * c.Cin) * (c.Wo * c.Cout)
        if c.stride != 1:
            flops += 2 * c.K * c.Ho * c.He * (c.Wp * c.Cin)
    flops *= N
    bytes_accessed = (int(x_flat.size) * 4
                      + sum(N * c.Ho * c.Wo * c.Cout * 4 for c in cfgs)
                      + sum(int(b.size) * 2 for b in bands)
                      + sum(int(a.size) * 4 for a in auxs)
                      + sum(int(s.size) * 2 for s in selHs))
    cost = pl.CostEstimate(flops=int(flops),
                           transcendentals=int(N * n_layers * GN_GROUPS),
                           bytes_accessed=int(bytes_accessed))

    outs_flat = pl.pallas_call(
        kernel,
        out_shape=out_shape,
        grid=(N,),
        in_specs=in_specs,
        out_specs=out_specs,
        scratch_shapes=scratch_shapes,
        compiler_params=pltpu.CompilerParams(
            dimension_semantics=("parallel",)),
        cost_estimate=cost,
    )(x_flat, *bands, *auxs, *selHs)

    # (N, Ho, Wo*C) -> NCHW for parity with the PyTorch module (small reshape
    # + transpose outside the kernel; kernel stores stay lane-dense).
    outs = []
    for o, c in zip(outs_flat, cfgs):
        outs.append(
            jnp.transpose(o.reshape(N, c.Ho, c.Wo, c.Cout), (0, 3, 1, 2)))
    return outs


# ----------------------------------------------------------------------------
# Pure-JAX reference (precision-matched: bf16 conv operands, f32 accumulation)
# ----------------------------------------------------------------------------
def _ref_layer(x_nhwc, w, b, gamma, beta, stride):
    K = w.shape[0]
    pad = (K - 1) // 2
    y = lax.conv_general_dilated(
        x_nhwc.astype(jnp.bfloat16), w.astype(jnp.bfloat16),
        (stride, stride), [(pad, pad), (pad, pad)],
        dimension_numbers=("NHWC", "HWIO", "NHWC"),
        preferred_element_type=jnp.float32)
    y = y + b.reshape(1, 1, 1, -1)
    N, H, W, C = y.shape
    Cg = C // GN_GROUPS
    yg = y.reshape(N, H, W, GN_GROUPS, Cg)
    mean = yg.mean(axis=(1, 2, 4), keepdims=True)
    var = ((yg - mean) ** 2).mean(axis=(1, 2, 4), keepdims=True)
    yn = (yg - mean) * lax.rsqrt(var + GN_EPS)
    yn = yn.reshape(N, H, W, C) * gamma.reshape(1, 1, 1, -1) \
        + beta.reshape(1, 1, 1, -1)
    return jnp.where(yn > 0, yn, LEAKY_SLOPE * yn)


def encoder_forward_ref(x_nchw, params):
    h = jnp.transpose(x_nchw, (0, 2, 3, 1))
    outs = []
    for p in params:
        h = _ref_layer(h, p["w"], p["b"], p["gamma"], p["beta"], p["stride"])
        outs.append(jnp.transpose(h, (0, 3, 1, 2)))
    return outs


if __name__ == "__main__":
    # Small shapes consistent with the module: batch=2, C_in=4, 16x16 spatial,
    # C_hid=16, N_S=4, kernel_size=[3,3,3,3]  -> strides [1,2,1,2].
    C_in, C_hid, N_S = 4, 16, 4
    kernel_size = [3, 3, 3, 3]

    key = jax.random.PRNGKey(0)
    kx, kp = jax.random.split(key)
    x = jax.random.normal(kx, (2, C_in, 16, 16), jnp.float32)  # NCHW like PyTorch

    params = init_encoder_params(kp, C_in, C_hid, N_S, kernel_size)

    outs = encoder_forward(x, params)
    outs = [jax.block_until_ready(o) for o in outs]

    refs = encoder_forward_ref(x, params)
    expected_shapes = [(2, C_hid, 16, 16), (2, C_hid, 8, 8),
                       (2, C_hid, 8, 8), (2, C_hid, 4, 4)]
    for o, r, es in zip(outs, refs, expected_shapes):
        assert o.shape == es, (o.shape, es)
        err = float(jnp.max(jnp.abs(o - r)))
        assert jnp.allclose(o, r, atol=2e-3, rtol=2e-3), err

    print("KERNEL_OK")
</pallas_src>

<mosaic_0001>
module attributes {stable_mosaic.version = 11 : i64} {
  func.func @kernel(%arg0: i32, %arg1: memref<1x16x64xf32, #tpu.memory_space<vmem>>, %arg2: memref<3x72x256xbf16, #tpu.memory_space<vmem>>, %arg3: memref<3x288x128xbf16, #tpu.memory_space<vmem>>, %arg4: memref<3x160x128xbf16, #tpu.memory_space<vmem>>, %arg5: memref<3x160x64xbf16, #tpu.memory_space<vmem>>, %arg6: memref<4x256xf32, #tpu.memory_space<vmem>>, %arg7: memref<4x128xf32, #tpu.memory_space<vmem>>, %arg8: memref<4x128xf32, #tpu.memory_space<vmem>>, %arg9: memref<4x64xf32, #tpu.memory_space<vmem>>, %arg10: memref<8x16xbf16, #tpu.memory_space<vmem>>, %arg11: memref<4x8xbf16, #tpu.memory_space<vmem>>, %arg12: memref<1x16x256xf32, #tpu.memory_space<vmem>>, %arg13: memref<1x8x128xf32, #tpu.memory_space<vmem>>, %arg14: memref<1x8x128xf32, #tpu.memory_space<vmem>>, %arg15: memref<1x4x64xf32, #tpu.memory_space<vmem>>, %arg16: memref<18x72xbf16, #tpu.memory_space<vmem>>, %arg17: memref<18x288xbf16, #tpu.memory_space<vmem>>, %arg18: memref<10x160xbf16, #tpu.memory_space<vmem>>, %arg19: memref<10x160xbf16, #tpu.memory_space<vmem>>) attributes {dimension_semantics = [#tpu.dimension_semantics<parallel>], iteration_bounds = array<i64: 2>, scalar_prefetch = 0 : i64, scratch_operands = 4 : i64, tpu.core_type = #tpu.core_type<tc>, window_params = [{transform_indices = @transform_0, window_bounds = array<i64: 1, 16, 64>}, {pipeline_mode = #tpu.pipeline_mode<synchronous>, transform_indices = @transform_1, window_bounds = array<i64: 3, 72, 256>}, {pipeline_mode = #tpu.pipeline_mode<synchronous>, transform_indices = @transform_2, window_bounds = array<i64: 3, 288, 128>}, {pipeline_mode = #tpu.pipeline_mode<synchronous>, transform_indices = @transform_3, window_bounds = array<i64: 3, 160, 128>}, {pipeline_mode = #tpu.pipeline_mode<synchronous>, transform_indices = @transform_4, window_bounds = array<i64: 3, 160, 64>}, {pipeline_mode = #tpu.pipeline_mode<synchronous>, transform_indices = @transform_5, window_bounds = array<i64: 4, 256>}, {pipeline_mode = #tpu.pipeline_mode<synchronous>, transform_indices = @transform_6, window_bounds = array<i64: 4, 128>}, {pipeline_mode = #tpu.pipeline_mode<synchronous>, transform_indices = @transform_7, window_bounds = array<i64: 4, 128>}, {pipeline_mode = #tpu.pipeline_mode<synchronous>, transform_indices = @transform_8, window_bounds = array<i64: 4, 64>}, {pipeline_mode = #tpu.pipeline_mode<synchronous>, transform_indices = @transform_9, window_bounds = array<i64: 8, 16>}, {pipeline_mode = #tpu.pipeline_mode<synchronous>, transform_indices = @transform_10, window_bounds = array<i64: 4, 8>}, {transform_indices = @transform_11, window_bounds = array<i64: 1, 16, 256>}, {transform_indices = @transform_12, window_bounds = array<i64: 1, 8, 128>}, {transform_indices = @transform_13, window_bounds = array<i64: 1, 8, 128>}, {transform_indices = @transform_14, window_bounds = array<i64: 1, 4, 64>}]} {
    %cst = arith.constant 0.000000e+00 : bf16
    %0 = vector.broadcast %cst : bf16 to vector<1x72xbf16>
    %c0 = arith.constant 0 : index
    %c0_0 = arith.constant 0 : index
    %1 = vector.load %arg16[%c0, %c0_0] : memref<18x72xbf16, #tpu.memory_space<vmem>>, vector<1x72xbf16>
    tpu.vector_store %arg16[%c0, %c0_0], %0 {strides = array<i32>} : memref<18x72xbf16, #tpu.memory_space<vmem>>, vector<1x72xbf16>,
    %cst_1 = arith.constant 0.000000e+00 : bf16
    %2 = vector.broadcast %cst_1 : bf16 to vector<1x72xbf16>
    %c17 = arith.constant 17 : index
    %c0_2 = arith.constant 0 : index
    %3 = vector.load %arg16[%c17, %c0_2] : memref<18x72xbf16, #tpu.memory_space<vmem>>, vector<1x72xbf16>
    tpu.vector_store %arg16[%c17, %c0_2], %2 {strides = array<i32>} : memref<18x72xbf16, #tpu.memory_space<vmem>>, vector<1x72xbf16>,
    %cst_3 = arith.constant 0.000000e+00 : bf16
    %4 = vector.broadcast %cst_3 : bf16 to vector<18x4xbf16>
    %c0_4 = arith.constant 0 : index
    %c0_5 = arith.constant 0 : index
    %5 = vector.load %arg16[%c0_4, %c0_5] : memref<18x72xbf16, #tpu.memory_space<vmem>>, vector<18x4xbf16>
    tpu.vector_store %arg16[%c0_4, %c0_5], %4 {strides = array<i32>} : memref<18x72xbf16, #tpu.memory_space<vmem>>, vector<18x4xbf16>,
    %cst_6 = arith.constant 0.000000e+00 : bf16
    %6 = vector.broadcast %cst_6 : bf16 to vector<18x4xbf16>
    %c0_7 = arith.constant 0 : index
    %c68 = arith.constant 68 : index
    %7 = vector.load %arg16[%c0_7, %c68] : memref<18x72xbf16, #tpu.memory_space<vmem>>, vector<18x4xbf16>
    tpu.vector_store %arg16[%c0_7, %c68], %6 {strides = array<i32>} : memref<18x72xbf16, #tpu.memory_space<vmem>>, vector<18x4xbf16>,
    %cst_8 = arith.constant 0.000000e+00 : bf16
    %8 = vector.broadcast %cst_8 : bf16 to vector<1x288xbf16>
    %c0_9 = arith.constant 0 : index
    %c0_10 = arith.constant 0 : index
    %9 = vector.load %arg17[%c0_9, %c0_10] : memref<18x288xbf16, #tpu.memory_space<vmem>>, vector<1x288xbf16>
    tpu.vector_store %arg17[%c0_9, %c0_10], %8 {strides = array<i32>} : memref<18x288xbf16, #tpu.memory_space<vmem>>, vector<1x288xbf16>,
    %cst_11 = arith.constant 0.000000e+00 : bf16
    %10 = vector.broadcast %cst_11 : bf16 to vector<1x288xbf16>
    %c17_12 = arith.constant 17 : index
    %c0_13 = arith.constant 0 : index
    %11 = vector.load %arg17[%c17_12, %c0_13] : memref<18x288xbf16, #tpu.memory_space<vmem>>, vector<1x288xbf16>
    tpu.vector_store %arg17[%c17_12, %c0_13], %10 {strides = array<i32>} : memref<18x288xbf16, #tpu.memory_space<vmem>>, vector<1x288xbf16>,
    %cst_14 = arith.constant 0.000000e+00 : bf16
    %12 = vector.broadcast %cst_14 : bf16 to vector<18x16xbf16>
    %c0_15 = arith.constant 0 : index
    %c0_16 = arith.constant 0 : index
    %13 = vector.load %arg17[%c0_15, %c0_16] : memref<18x288xbf16, #tpu.memory_space<vmem>>, vector<18x16xbf16>
    tpu.vector_store %arg17[%c0_15, %c0_16], %12 {strides = array<i32>} : memref<18x288xbf16, #tpu.memory_space<vmem>>, vector<18x16xbf16>,
    %cst_17 = arith.constant 0.000000e+00 : bf16
    %14 = vector.broadcast %cst_17 : bf16 to vector<18x16xbf16>
    %c0_18 = arith.constant 0 : index
    %c272 = arith.constant 272 : index
    %15 = vector.load %arg17[%c0_18, %c272] : memref<18x288xbf16, #tpu.memory_space<vmem>>, vector<18x16xbf16>
    tpu.vector_store %arg17[%c0_18, %c272], %14 {strides = array<i32>} : memref<18x288xbf16, #tpu.memory_space<vmem>>, vector<18x16xbf16>,
    %cst_19 = arith.constant 0.000000e+00 : bf16
    %16 = vector.broadcast %cst_19 : bf16 to vector<1x160xbf16>
    %c0_20 = arith.constant 0 : index
    %c0_21 = arith.constant 0 : index
    %17 = vector.load %arg18[%c0_20, %c0_21] : memref<10x160xbf16, #tpu.memory_space<vmem>>, vector<1x160xbf16>
    tpu.vector_store %arg18[%c0_20, %c0_21], %16 {strides = array<i32>} : memref<10x160xbf16, #tpu.memory_space<vmem>>, vector<1x160xbf16>,
    %cst_22 = arith.constant 0.000000e+00 : bf16
    %18 = vector.broadcast %cst_22 : bf16 to vector<1x160xbf16>
    %c9 = arith.constant 9 : index
    %c0_23 = arith.constant 0 : index
    %19 = vector.load %arg18[%c9, %c0_23] : memref<10x160xbf16, #tpu.memory_space<vmem>>, vector<1x160xbf16>
    tpu.vector_store %arg18[%c9, %c0_23], %18 {strides = array<i32>} : memref<10x160xbf16, #tpu.memory_space<vmem>>, vector<1x160xbf16>,
    %cst_24 = arith.constant 0.000000e+00 : bf16
    %20 = vector.broadcast %cst_24 : bf16 to vector<10x16xbf16>
    %c0_25 = arith.constant 0 : index
    %c0_26 = arith.constant 0 : index
    %21 = vector.load %arg18[%c0_25, %c0_26] : memref<10x160xbf16, #tpu.memory_space<vmem>>, vector<10x16xbf16>
    tpu.vector_store %arg18[%c0_25, %c0_26], %20 {strides = array<i32>} : memref<10x160xbf16, #tpu.memory_space<vmem>>, vector<10x16xbf16>,
    %cst_27 = arith.constant 0.000000e+00 : bf16
    %22 = vector.broadcast %cst_27 : bf16 to vector<10x16xbf16>
    %c0_28 = arith.constant 0 : index
    %c144 = arith.constant 144 : index
    %23 = vector.load %arg18[%c0_28, %c144] : memref<10x160xbf16, #tpu.memory_space<vmem>>, vector<10x16xbf16>
    tpu.vector_store %arg18[%c0_28, %c144], %22 {strides = array<i32>} : memref<10x160xbf16, #tpu.memory_space<vmem>>, vector<10x16xbf16>,
    %cst_29 = arith.constant 0.000000e+00 : bf16
    %24 = vector.broadcast %cst_29 : bf16 to vector<1x160xbf16>
    %c0_30 = arith.constant 0 : index
    %c0_31 = arith.constant 0 : index
    %25 = vector.load %arg19[%c0_30, %c0_31] : memref<10x160xbf16, #tpu.memory_space<vmem>>, vector<1x160xbf16>
    tpu.vector_store %arg19[%c0_30, %c0_31], %24 {strides = array<i32>} : memref<10x160xbf16, #tpu.memory_space<vmem>>, vector<1x160xbf16>,
    %cst_32 = arith.constant 0.000000e+00 : bf16
    %26 = vector.broadcast %cst_32 : bf16 to vector<1x160xbf16>
    %c9_33 = arith.constant 9 : index
    %c0_34 = arith.constant 0 : index
    %27 = vector.load %arg19[%c9_33, %c0_34] : memref<10x160xbf16, #tpu.memory_space<vmem>>, vector<1x160xbf16>
    tpu.vector_store %arg19[%c9_33, %c0_34], %26 {strides = array<i32>} : memref<10x160xbf16, #tpu.memory_space<vmem>>, vector<1x160xbf16>,
    %cst_35 = arith.constant 0.000000e+00 : bf16
    %28 = vector.broadcast %cst_35 : bf16 to vector<10x16xbf16>
    %c0_36 = arith.constant 0 : index
    %c0_37 = arith.constant 0 : index
    %29 = vector.load %arg19[%c0_36, %c0_37] : memref<10x160xbf16, #tpu.memory_space<vmem>>, vector<10x16xbf16>
    tpu.vector_store %arg19[%c0_36, %c0_37], %28 {strides = array<i32>} : memref<10x160xbf16, #tpu.memory_space<vmem>>, vector<10x16xbf16>,
    %cst_38 = arith.constant 0.000000e+00 : bf16
    %30 = vector.broadcast %cst_38 : bf16 to vector<10x16xbf16>
    %c0_39 = arith.constant 0 : index
    %c144_40 = arith.constant 144 : index
    %31 = vector.load %arg19[%c0_39, %c144_40] : memref<10x160xbf16, #tpu.memory_space<vmem>>, vector<10x16xbf16>
    tpu.vector_store %arg19[%c0_39, %c144_40], %30 {strides = array<i32>} : memref<10x160xbf16, #tpu.memory_space<vmem>>, vector<10x16xbf16>,
    %c0_41 = arith.constant 0 : index
    %c0_42 = arith.constant 0 : index
    %c0_43 = arith.constant 0 : index
    %32 = vector.load %arg1[%c0_41, %c0_42, %c0_43] : memref<1x16x64xf32, #tpu.memory_space<vmem>>, vector<1x16x64xf32>
    %33 = vector.shape_cast %32 : vector<1x16x64xf32> to vector<16x64xf32>
    %34 = arith.truncf %33 : vector<16x64xf32> to vector<16x64xbf16>
    %c1 = arith.constant 1 : index
    %c4 = arith.constant 4 : index
    %35 = vector.load %arg16[%c1, %c4] : memref<18x72xbf16, #tpu.memory_space<vmem>>, vector<16x64xbf16>
    tpu.vector_store %arg16[%c1, %c4], %34 {strides = array<i32>} : memref<18x72xbf16, #tpu.memory_space<vmem>>, vector<16x64xbf16>,
    %c0_44 = arith.constant 0 : index
    %c0_45 = arith.constant 0 : index
    %36 = vector.load %arg16[%c0_44, %c0_45] : memref<18x72xbf16, #tpu.memory_space<vmem>>, vector<16x72xbf16>
    %c0_46 = arith.constant 0 : index
    %c0_47 = arith.constant 0 : index
    %c0_48 = arith.constant 0 : index
    %37 = vector.load %arg2[%c0_46, %c0_47, %c0_48] : memref<3x72x256xbf16, #tpu.memory_space<vmem>>, vector<1x72x256xbf16>
    %38 = vector.shape_cast %37 : vector<1x72x256xbf16> to vector<72x256xbf16>
    %cst_49 = arith.constant dense<0.000000e+00> : vector<16x256xf32>
    %39 = tpu.matmul %36, %38, %cst_49 {dimension_numbers = #tpu.dot_dimension_numbers<[1], [0], [0], [1], [0, 0, 1, 1], [], []>} : vector<16x72xbf16>, vector<72x256xbf16>, vector<16x256xf32> -> vector<16x256xf32>
    %c1_50 = arith.constant 1 : index
    %c0_51 = arith.constant 0 : index
    %40 = vector.load %arg16[%c1_50, %c0_51] : memref<18x72xbf16, #tpu.memory_space<vmem>>, vector<16x72xbf16>
    %c1_52 = arith.constant 1 : index
    %c0_53 = arith.constant 0 : index
    %c0_54 = arith.constant 0 : index
    %41 = vector.load %arg2[%c1_52, %c0_53, %c0_54] : memref<3x72x256xbf16, #tpu.memory_space<vmem>>, vector<1x72x256xbf16>
    %42 = vector.shape_cast %41 : vector<1x72x256xbf16> to vector<72x256xbf16>
    %cst_55 = arith.constant dense<0.000000e+00> : vector<16x256xf32>
    %43 = tpu.matmul %40, %42, %cst_55 {dimension_numbers = #tpu.dot_dimension_numbers<[1], [0], [0], [1], [0, 0, 1, 1], [], []>} : vector<16x72xbf16>, vector<72x256xbf16>, vector<16x256xf32> -> vector<16x256xf32>
    %44 = arith.addf %39, %43 : vector<16x256xf32>
    %c2 = arith.constant 2 : index
    %c0_56 = arith.constant 0 : index
    %45 = vector.load %arg16[%c2, %c0_56] : memref<18x72xbf16, #tpu.memory_space<vmem>>, vector<16x72xbf16>
    %c2_57 = arith.constant 2 : index
    %c0_58 = arith.constant 0 : index
    %c0_59 = arith.constant 0 : index
    %46 = vector.load %arg2[%c2_57, %c0_58, %c0_59] : memref<3x72x256xbf16, #tpu.memory_space<vmem>>, vector<1x72x256xbf16>
    %47 = vector.shape_cast %46 : vector<1x72x256xbf16> to vector<72x256xbf16>
    %cst_60 = arith.constant dense<0.000000e+00> : vector<16x256xf32>
    %48 = tpu.matmul %45, %47, %cst_60 {dimension_numbers = #tpu.dot_dimension_numbers<[1], [0], [0], [1], [0, 0, 1, 1], [], []>} : vector<16x72xbf16>, vector<72x256xbf16>, vector<16x256xf32> -> vector<16x256xf32>
    %49 = arith.addf %44, %48 : vector<16x256xf32>
    %c0_61 = arith.constant 0 : index
    %c0_62 = arith.constant 0 : index
    %50 = vector.load %arg6[%c0_61, %c0_62] : memref<4x256xf32, #tpu.memory_space<vmem>>, vector<4x256xf32>
    %51 = vector.extract_strided_slice %50 {offsets = [0, 0], sizes = [1, 256], strides = [1, 1]} : vector<4x256xf32> to vector<1x256xf32>
    %52 = vector.extract_strided_slice %50 {offsets = [1, 0], sizes = [1, 256], strides = [1, 1]} : vector<4x256xf32> to vector<1x256xf32>
    %53 = vector.extract_strided_slice %50 {offsets = [2, 0], sizes = [1, 256], strides = [1, 1]} : vector<4x256xf32> to vector<1x256xf32>
    %54 = vector.extract_strided_slice %50 {offsets = [3, 0], sizes = [1, 256], strides = [1, 1]} : vector<4x256xf32> to vector<1x256xf32>
    %cst_63 = arith.constant 1.000000e+00 : f32
    %55 = vector.broadcast %cst_63 : f32 to vector<1x256xf32>
    %56 = arith.subf %55, %54 : vector<1x256xf32>
    %57 = vector.broadcast %51 : vector<1x256xf32> to vector<16x256xf32>
    %58 = arith.addf %49, %57 : vector<16x256xf32>
    %59 = vector.broadcast %54 : vector<1x256xf32> to vector<16x256xf32>
    %60 = arith.mulf %58, %59 : vector<16x256xf32>
    %61 = vector.shape_cast %60 : vector<16x256xf32> to vector<1x16x256xf32>
    %cst_64 = arith.constant dense<0.000000e+00> : vector<1xf32>
    %62 = vector.multi_reduction <add>, %61, %cst_64 [1, 2] : vector<1x16x256xf32> to vector<1xf32>
    %63 = vector.shape_cast %62 : vector<1xf32> to vector<1x1x1xf32>
    %64 = vector.extract %63[0, 0, 0] : f32 from vector<1x1x1xf32>
    %65 = vector.broadcast %64 : f32 to vector<1x1xf32>
    %cst_65 = arith.constant 4.8828125E-4 : f32
    %66 = vector.broadcast %cst_65 : f32 to vector<1x1xf32>
    %67 = arith.mulf %65, %66 : vector<1x1xf32>
    %68 = vector.broadcast %56 : vector<1x256xf32> to vector<16x256xf32>
    %69 = arith.mulf %58, %68 : vector<16x256xf32>
    %70 = vector.shape_cast %69 : vector<16x256xf32> to vector<1x16x256xf32>
    %cst_66 = arith.constant dense<0.000000e+00> : vector<1xf32>
    %71 = vector.multi_reduction <add>, %70, %cst_66 [1, 2] : vector<1x16x256xf32> to vector<1xf32>
    %72 = vector.shape_cast %71 : vector<1xf32> to vector<1x1x1xf32>
    %73 = vector.extract %72[0, 0, 0] : f32 from vector<1x1x1xf32>
    %74 = vector.broadcast %73 : f32 to vector<1x1xf32>
    %cst_67 = arith.constant 4.8828125E-4 : f32
    %75 = vector.broadcast %cst_67 : f32 to vector<1x1xf32>
    %76 = arith.mulf %74, %75 : vector<1x1xf32>
    %77 = vector.broadcast %67 : vector<1x1xf32> to vector<1x256xf32>
    %78 = arith.mulf %54, %77 : vector<1x256xf32>
    %79 = vector.broadcast %76 : vector<1x1xf32> to vector<1x256xf32>
    %80 = arith.mulf %56, %79 : vector<1x256xf32>
    %81 = arith.addf %78, %80 : vector<1x256xf32>
    %82 = vector.broadcast %81 : vector<1x256xf32> to vector<16x256xf32>
    %83 = arith.subf %58, %82 : vector<16x256xf32>
    %84 = arith.mulf %83, %83 : vector<16x256xf32>
    %85 = vector.broadcast %54 : vector<1x256xf32> to vector<16x256xf32>
    %86 = arith.mulf %84, %85 : vector<16x256xf32>
    %87 = vector.shape_cast %86 : vector<16x256xf32> to vector<1x16x256xf32>
    %cst_68 = arith.constant dense<0.000000e+00> : vector<1xf32>
    %88 = vector.multi_reduction <add>, %87, %cst_68 [1, 2] : vector<1x16x256xf32> to vector<1xf32>
    %89 = vector.shape_cast %88 : vector<1xf32> to vector<1x1x1xf32>
    %90 = vector.extract %89[0, 0, 0] : f32 from vector<1x1x1xf32>
    %91 = vector.broadcast %90 : f32 to vector<1x1xf32>
    %cst_69 = arith.constant 4.8828125E-4 : f32
    %92 = vector.broadcast %cst_69 : f32 to vector<1x1xf32>
    %93 = arith.mulf %91, %92 : vector<1x1xf32>
    %94 = arith.mulf %83, %83 : vector<16x256xf32>
    %95 = vector.broadcast %56 : vector<1x256xf32> to vector<16x256xf32>
    %96 = arith.mulf %94, %95 : vector<16x256xf32>
    %97 = vector.shape_cast %96 : vector<16x256xf32> to vector<1x16x256xf32>
    %cst_70 = arith.constant dense<0.000000e+00> : vector<1xf32>
    %98 = vector.multi_reduction <add>, %97, %cst_70 [1, 2] : vector<1x16x256xf32> to vector<1xf32>
    %99 = vector.shape_cast %98 : vector<1xf32> to vector<1x1x1xf32>
    %100 = vector.extract %99[0, 0, 0] : f32 from vector<1x1x1xf32>
    %101 = vector.broadcast %100 : f32 to vector<1x1xf32>
    %cst_71 = arith.constant 4.8828125E-4 : f32
    %102 = vector.broadcast %cst_71 : f32 to vector<1x1xf32>
    %103 = arith.mulf %101, %102 : vector<1x1xf32>
    %cst_72 = arith.constant 9.99999974E-6 : f32
    %104 = vector.broadcast %cst_72 : f32 to vector<1x1xf32>
    %105 = arith.addf %93, %104 : vector<1x1xf32>
    %106 = math.rsqrt %105 : vector<1x1xf32>
    %107 = vector.broadcast %106 : vector<1x1xf32> to vector<1x256xf32>
    %108 = arith.mulf %54, %107 : vector<1x256xf32>
    %cst_73 = arith.constant 9.99999974E-6 : f32
    %109 = vector.broadcast %cst_73 : f32 to vector<1x1xf32>
    %110 = arith.addf %103, %109 : vector<1x1xf32>
    %111 = math.rsqrt %110 : vector<1x1xf32>
    %112 = vector.broadcast %111 : vector<1x1xf32> to vector<1x256xf32>
    %113 = arith.mulf %56, %112 : vector<1x256xf32>
    %114 = arith.addf %108, %113 : vector<1x256xf32>
    %115 = vector.broadcast %114 : vector<1x256xf32> to vector<16x256xf32>
    %116 = arith.mulf %83, %115 : vector<16x256xf32>
    %117 = vector.broadcast %52 : vector<1x256xf32> to vector<16x256xf32>
    %118 = arith.mulf %116, %117 : vector<16x256xf32>
    %119 = vector.broadcast %53 : vector<1x256xf32> to vector<16x256xf32>
    %120 = arith.addf %118, %119 : vector<16x256xf32>
    %cst_74 = arith.constant 0.000000e+00 : f32
    %121 = vector.broadcast %cst_74 : f32 to vector<16x256xf32>
    %122 = arith.cmpf ogt, %120, %121 : vector<16x256xf32>
    %cst_75 = arith.constant 2.000000e-01 : f32
    %123 = vector.broadcast %cst_75 : f32 to vector<16x256xf32>
    %124 = arith.mulf %123, %120 : vector<16x256xf32>
    %125 = arith.select %122, %120, %124 : vector<16x256xi1>, vector<16x256xf32>
    %126 = vector.shape_cast %125 : vector<16x256xf32> to vector<1x16x256xf32>
    %c0_76 = arith.constant 0 : index
    %c0_77 = arith.constant 0 : index
    %c0_78 = arith.constant 0 : index
    %127 = vector.load %arg12[%c0_76, %c0_77, %c0_78] : memref<1x16x256xf32, #tpu.memory_space<vmem>>, vector<1x16x256xf32>
    tpu.vector_store %arg12[%c0_76, %c0_77, %c0_78], %126 {strides = array<i32>} : memref<1x16x256xf32, #tpu.memory_space<vmem>>, vector<1x16x256xf32>,
    %128 = arith.truncf %125 : vector<16x256xf32> to vector<16x256xbf16>
    %c1_79 = arith.constant 1 : index
    %c16 = arith.constant 16 : index
    %129 = vector.load %arg17[%c1_79, %c16] : memref<18x288xbf16, #tpu.memory_space<vmem>>, vector<16x256xbf16>
    tpu.vector_store %arg17[%c1_79, %c16], %128 {strides = array<i32>} : memref<18x288xbf16, #tpu.memory_space<vmem>>, vector<16x256xbf16>,
    %c0_80 = arith.constant 0 : index
    %c0_81 = arith.constant 0 : index
    %130 = vector.load %arg10[%c0_80, %c0_81] : memref<8x16xbf16, #tpu.memory_space<vmem>>, vector<8x16xbf16>
    %c0_82 = arith.constant 0 : index
    %c0_83 = arith.constant 0 : index
    %131 = vector.load %arg17[%c0_82, %c0_83] : memref<18x288xbf16, #tpu.memory_space<vmem>>, vector<16x288xbf16>
    %cst_84 = arith.constant dense<0.000000e+00> : vector<8x288xf32>
    %132 = tpu.matmul %130, %131, %cst_84 {dimension_numbers = #tpu.dot_dimension_numbers<[1], [0], [0], [1], [0, 0, 1, 1], [], []>} : vector<8x16xbf16>, vector<16x288xbf16>, vector<8x288xf32> -> vector<8x288xf32>
    %133 = arith.truncf %132 : vector<8x288xf32> to vector<8x288xbf16>
    %c0_85 = arith.constant 0 : index
    %c0_86 = arith.constant 0 : index
    %c0_87 = arith.constant 0 : index
    %134 = vector.load %arg3[%c0_85, %c0_86, %c0_87] : memref<3x288x128xbf16, #tpu.memory_space<vmem>>, vector<1x288x128xbf16>
    %135 = vector.shape_cast %134 : vector<1x288x128xbf16> to vector<288x128xbf16>
    %cst_88 = arith.constant dense<0.000000e+00> : vector<8x128xf32>
    %136 = tpu.matmul %133, %135, %cst_88 {dimension_numbers = #tpu.dot_dimension_numbers<[1], [0], [0], [1], [0, 0, 1, 1], [], []>} : vector<8x288xbf16>, vector<288x128xbf16>, vector<8x128xf32> -> vector<8x128xf32>
    %c1_89 = arith.constant 1 : index
    %c0_90 = arith.constant 0 : index
    %137 = vector.load %arg17[%c1_89, %c0_90] : memref<18x288xbf16, #tpu.memory_space<vmem>>, vector<16x288xbf16>
    %cst_91 = arith.constant dense<0.000000e+00> : vector<8x288xf32>
    %138 = tpu.matmul %130, %137, %cst_91 {dimension_numbers = #tpu.dot_dimension_numbers<[1], [0], [0], [1], [0, 0, 1, 1], [], []>} : vector<8x16xbf16>, vector<16x288xbf16>, vector<8x288xf32> -> vector<8x288xf32>
    %139 = arith.truncf %138 : vector<8x288xf32> to vector<8x288xbf16>
    %c1_92 = arith.constant 1 : index
    %c0_93 = arith.constant 0 : index
    %c0_94 = arith.constant 0 : index
    %140 = vector.load %arg3[%c1_92, %c0_93, %c0_94] : memref<3x288x128xbf16, #tpu.memory_space<vmem>>, vector<1x288x128xbf16>
    %141 = vector.shape_cast %140 : vector<1x288x128xbf16> to vector<288x128xbf16>
    %cst_95 = arith.constant dense<0.000000e+00> : vector<8x128xf32>
    %142 = tpu.matmul %139, %141, %cst_95 {dimension_numbers = #tpu.dot_dimension_numbers<[1], [0], [0], [1], [0, 0, 1, 1], [], []>} : vector<8x288xbf16>, vector<288x128xbf16>, vector<8x128xf32> -> vector<8x128xf32>
    %143 = arith.addf %136, %142 : vector<8x128xf32>
    %c2_96 = arith.constant 2 : index
    %c0_97 = arith.constant 0 : index
    %144 = vector.load %arg17[%c2_96, %c0_97] : memref<18x288xbf16, #tpu.memory_space<vmem>>, vector<16x288xbf16>
    %cst_98 = arith.constant dense<0.000000e+00> : vector<8x288xf32>
    %145 = tpu.matmul %130, %144, %cst_98 {dimension_numbers = #tpu.dot_dimension_numbers<[1], [0], [0], [1], [0, 0, 1, 1], [], []>} : vector<8x16xbf16>, vector<16x288xbf16>, vector<8x288xf32> -> vector<8x288xf32>
    %146 = arith.truncf %145 : vector<8x288xf32> to vector<8x288xbf16>
    %c2_99 = arith.constant 2 : index
    %c0_100 = arith.constant 0 : index
    %c0_101 = arith.constant 0 : index
    %147 = vector.load %arg3[%c2_99, %c0_100, %c0_101] : memref<3x288x128xbf16, #tpu.memory_space<vmem>>, vector<1x288x128xbf16>
    %148 = vector.shape_cast %147 : vector<1x288x128xbf16> to vector<288x128xbf16>
    %cst_102 = arith.constant dense<0.000000e+00> : vector<8x128xf32>
    %149 = tpu.matmul %146, %148, %cst_102 {dimension_numbers = #tpu.dot_dimension_numbers<[1], [0], [0], [1], [0, 0, 1, 1], [], []>} : vector<8x288xbf16>, vector<288x128xbf16>, vector<8x128xf32> -> vector<8x128xf32>
    %150 = arith.addf %143, %149 : vector<8x128xf32>
    %c0_103 = arith.constant 0 : index
    %c0_104 = arith.constant 0 : index
    %151 = vector.load %arg7[%c0_103, %c0_104] : memref<4x128xf32, #tpu.memory_space<vmem>>, vector<4x128xf32>
    %152 = vector.extract_strided_slice %151 {offsets = [0, 0], sizes = [1, 128], strides = [1, 1]} : vector<4x128xf32> to vector<1x128xf32>
    %153 = vector.extract_strided_slice %151 {offsets = [1, 0], sizes = [1, 128], strides = [1, 1]} : vector<4x128xf32> to vector<1x128xf32>
    %154 = vector.extract_strided_slice %151 {offsets = [2, 0], sizes = [1, 128], strides = [1, 1]} : vector<4x128xf32> to vector<1x128xf32>
    %155 = vector.extract_strided_slice %151 {offsets = [3, 0], sizes = [1, 128], strides = [1, 1]} : vector<4x128xf32> to vector<1x128xf32>
    %cst_105 = arith.constant 1.000000e+00 : f32
    %156 = vector.broadcast %cst_105 : f32 to vector<1x128xf32>
    %157 = arith.subf %156, %155 : vector<1x128xf32>
    %158 = vector.broadcast %152 : vector<1x128xf32> to vector<8x128xf32>
    %159 = arith.addf %150, %158 : vector<8x128xf32>
    %160 = vector.broadcast %155 : vector<1x128xf32> to vector<8x128xf32>
    %161 = arith.mulf %159, %160 : vector<8x128xf32>
    %162 = vector.shape_cast %161 : vector<8x128xf32> to vector<1x8x128xf32>
    %cst_106 = arith.constant dense<0.000000e+00> : vector<1xf32>
    %163 = vector.multi_reduction <add>, %162, %cst_106 [1, 2] : vector<1x8x128xf32> to vector<1xf32>
    %164 = vector.shape_cast %163 : vector<1xf32> to vector<1x1x1xf32>
    %165 = vector.extract %164[0, 0, 0] : f32 from vector<1x1x1xf32>
    %166 = vector.broadcast %165 : f32 to vector<1x1xf32>
    %cst_107 = arith.constant 0.001953125 : f32
    %167 = vector.broadcast %cst_107 : f32 to vector<1x1xf32>
    %168 = arith.mulf %166, %167 : vector<1x1xf32>
    %169 = vector.broadcast %157 : vector<1x128xf32> to vector<8x128xf32>
    %170 = arith.mulf %159, %169 : vector<8x128xf32>
    %171 = vector.shape_cast %170 : vector<8x128xf32> to vector<1x8x128xf32>
    %cst_108 = arith.constant dense<0.000000e+00> : vector<1xf32>
    %172 = vector.multi_reduction <add>, %171, %cst_108 [1, 2] : vector<1x8x128xf32> to vector<1xf32>
    %173 = vector.shape_cast %172 : vector<1xf32> to vector<1x1x1xf32>
    %174 = vector.extract %173[0, 0, 0] : f32 from vector<1x1x1xf32>
    %175 = vector.broadcast %174 : f32 to vector<1x1xf32>
    %cst_109 = arith.constant 0.001953125 : f32
    %176 = vector.broadcast %cst_109 : f32 to vector<1x1xf32>
    %177 = arith.mulf %175, %176 : vector<1x1xf32>
    %178 = vector.broadcast %168 : vector<1x1xf32> to vector<1x128xf32>
    %179 = arith.mulf %155, %178 : vector<1x128xf32>
    %180 = vector.broadcast %177 : vector<1x1xf32> to vector<1x128xf32>
    %181 = arith.mulf %157, %180 : vector<1x128xf32>
    %182 = arith.addf %179, %181 : vector<1x128xf32>
    %183 = vector.broadcast %182 : vector<1x128xf32> to vector<8x128xf32>
    %184 = arith.subf %159, %183 : vector<8x128xf32>
    %185 = arith.mulf %184, %184 : vector<8x128xf32>
    %186 = vector.broadcast %155 : vector<1x128xf32> to vector<8x128xf32>
    %187 = arith.mulf %185, %186 : vector<8x128xf32>
    %188 = vector.shape_cast %187 : vector<8x128xf32> to vector<1x8x128xf32>
    %cst_110 = arith.constant dense<0.000000e+00> : vector<1xf32>
    %189 = vector.multi_reduction <add>, %188, %cst_110 [1, 2] : vector<1x8x128xf32> to vector<1xf32>
    %190 = vector.shape_cast %189 : vector<1xf32> to vector<1x1x1xf32>
    %191 = vector.extract %190[0, 0, 0] : f32 from vector<1x1x1xf32>
    %192 = vector.broadcast %191 : f32 to vector<1x1xf32>
    %cst_111 = arith.constant 0.001953125 : f32
    %193 = vector.broadcast %cst_111 : f32 to vector<1x1xf32>
    %194 = arith.mulf %192, %193 : vector<1x1xf32>
    %195 = arith.mulf %184, %184 : vector<8x128xf32>
    %196 = vector.broadcast %157 : vector<1x128xf32> to vector<8x128xf32>
    %197 = arith.mulf %195, %196 : vector<8x128xf32>
    %198 = vector.shape_cast %197 : vector<8x128xf32> to vector<1x8x128xf32>
    %cst_112 = arith.constant dense<0.000000e+00> : vector<1xf32>
    %199 = vector.multi_reduction <add>, %198, %cst_112 [1, 2] : vector<1x8x128xf32> to vector<1xf32>
    %200 = vector.shape_cast %199 : vector<1xf32> to vector<1x1x1xf32>
    %201 = vector.extract %200[0, 0, 0] : f32 from vector<1x1x1xf32>
    %202 = vector.broadcast %201 : f32 to vector<1x1xf32>
    %cst_113 = arith.constant 0.001953125 : f32
    %203 = vector.broadcast %cst_113 : f32 to vector<1x1xf32>
    %204 = arith.mulf %202, %203 : vector<1x1xf32>
    %cst_114 = arith.constant 9.99999974E-6 : f32
    %205 = vector.broadcast %cst_114 : f32 to vector<1x1xf32>
    %206 = arith.addf %194, %205 : vector<1x1xf32>
    %207 = math.rsqrt %206 : vector<1x1xf32>
    %208 = vector.broadcast %207 : vector<1x1xf32> to vector<1x128xf32>
    %209 = arith.mulf %155, %208 : vector<1x128xf32>
    %cst_115 = arith.constant 9.99999974E-6 : f32
    %210 = vector.broadcast %cst_115 : f32 to vector<1x1xf32>
    %211 = arith.addf %204, %210 : vector<1x1xf32>
    %212 = math.rsqrt %211 : vector<1x1xf32>
    %213 = vector.broadcast %212 : vector<1x1xf32> to vector<1x128xf32>
    %214 = arith.mulf %157, %213 : vector<1x128xf32>
    %215 = arith.addf %209, %214 : vector<1x128xf32>
    %216 = vector.broadcast %215 : vector<1x128xf32> to vector<8x128xf32>
    %217 = arith.mulf %184, %216 : vector<8x128xf32>
    %218 = vector.broadcast %153 : vector<1x128xf32> to vector<8x128xf32>
    %219 = arith.mulf %217, %218 : vector<8x128xf32>
    %220 = vector.broadcast %154 : vector<1x128xf32> to vector<8x128xf32>
    %221 = arith.addf %219, %220 : vector<8x128xf32>
    %cst_116 = arith.constant 0.000000e+00 : f32
    %222 = vector.broadcast %cst_116 : f32 to vector<8x128xf32>
    %223 = arith.cmpf ogt, %221, %222 : vector<8x128xf32>
    %cst_117 = arith.constant 2.000000e-01 : f32
    %224 = vector.broadcast %cst_117 : f32 to vector<8x128xf32>
    %225 = arith.mulf %224, %221 : vector<8x128xf32>
    %226 = arith.select %223, %221, %225 : vector<8x128xi1>, vector<8x128xf32>
    %227 = vector.shape_cast %226 : vector<8x128xf32> to vector<1x8x128xf32>
    %c0_118 = arith.constant 0 : index
    %c0_119 = arith.constant 0 : index
    %c0_120 = arith.constant 0 : index
    %228 = vector.load %arg13[%c0_118, %c0_119, %c0_120] : memref<1x8x128xf32, #tpu.memory_space<vmem>>, vector<1x8x128xf32>
    tpu.vector_store %arg13[%c0_118, %c0_119, %c0_120], %227 {strides = array<i32>} : memref<1x8x128xf32, #tpu.memory_space<vmem>>, vector<1x8x128xf32>,
    %229 = arith.truncf %226 : vector<8x128xf32> to vector<8x128xbf16>
    %c1_121 = arith.constant 1 : index
    %c16_122 = arith.constant 16 : index
    %230 = vector.load %arg18[%c1_121, %c16_122] : memref<10x160xbf16, #tpu.memory_space<vmem>>, vector<8x128xbf16>
    tpu.vector_store %arg18[%c1_121, %c16_122], %229 {strides = array<i32>} : memref<10x160xbf16, #tpu.memory_space<vmem>>, vector<8x128xbf16>,
    %c0_123 = arith.constant 0 : index
    %c0_124 = arith.constant 0 : index
    %231 = vector.load %arg18[%c0_123, %c0_124] : memref<10x160xbf16, #tpu.memory_space<vmem>>, vector<8x160xbf16>
    %c0_125 = arith.constant 0 : index
    %c0_126 = arith.constant 0 : index
    %c0_127 = arith.constant 0 : index
    %232 = vector.load %arg4[%c0_125, %c0_126, %c0_127] : memref<3x160x128xbf16, #tpu.memory_space<vmem>>, vector<1x160x128xbf16>
    %233 = vector.shape_cast %232 : vector<1x160x128xbf16> to vector<160x128xbf16>
    %cst_128 = arith.constant dense<0.000000e+00> : vector<8x128xf32>
    %234 = tpu.matmul %231, %233, %cst_128 {dimension_numbers = #tpu.dot_dimension_numbers<[1], [0], [0], [1], [0, 0, 1, 1], [], []>} : vector<8x160xbf16>, vector<160x128xbf16>, vector<8x128xf32> -> vector<8x128xf32>
    %c1_129 = arith.constant 1 : index
    %c0_130 = arith.constant 0 : index
    %235 = vector.load %arg18[%c1_129, %c0_130] : memref<10x160xbf16, #tpu.memory_space<vmem>>, vector<8x160xbf16>
    %c1_131 = arith.constant 1 : index
    %c0_132 = arith.constant 0 : index
    %c0_133 = arith.constant 0 : index
    %236 = vector.load %arg4[%c1_131, %c0_132, %c0_133] : memref<3x160x128xbf16, #tpu.memory_space<vmem>>, vector<1x160x128xbf16>
    %237 = vector.shape_cast %236 : vector<1x160x128xbf16> to vector<160x128xbf16>
    %cst_134 = arith.constant dense<0.000000e+00> : vector<8x128xf32>
    %238 = tpu.matmul %235, %237, %cst_134 {dimension_numbers = #tpu.dot_dimension_numbers<[1], [0], [0], [1], [0, 0, 1, 1], [], []>} : vector<8x160xbf16>, vector<160x128xbf16>, vector<8x128xf32> -> vector<8x128xf32>
    %239 = arith.addf %234, %238 : vector<8x128xf32>
    %c2_135 = arith.constant 2 : index
    %c0_136 = arith.constant 0 : index
    %240 = vector.load %arg18[%c2_135, %c0_136] : memref<10x160xbf16, #tpu.memory_space<vmem>>, vector<8x160xbf16>
    %c2_137 = arith.constant 2 : index
    %c0_138 = arith.constant 0 : index
    %c0_139 = arith.constant 0 : index
    %241 = vector.load %arg4[%c2_137, %c0_138, %c0_139] : memref<3x160x128xbf16, #tpu.memory_space<vmem>>, vector<1x160x128xbf16>
    %242 = vector.shape_cast %241 : vector<1x160x128xbf16> to vector<160x128xbf16>
    %cst_140 = arith.constant dense<0.000000e+00> : vector<8x128xf32>
    %243 = tpu.matmul %240, %242, %cst_140 {dimension_numbers = #tpu.dot_dimension_numbers<[1], [0], [0], [1], [0, 0, 1, 1], [], []>} : vector<8x160xbf16>, vector<160x128xbf16>, vector<8x128xf32> -> vector<8x128xf32>
    %244 = arith.addf %239, %243 : vector<8x128xf32>
    %c0_141 = arith.constant 0 : index
    %c0_142 = arith.constant 0 : index
    %245 = vector.load %arg8[%c0_141, %c0_142] : memref<4x128xf32, #tpu.memory_space<vmem>>, vector<4x128xf32>
    %246 = vector.extract_strided_slice %245 {offsets = [0, 0], sizes = [1, 128], strides = [1, 1]} : vector<4x128xf32> to vector<1x128xf32>
    %247 = vector.extract_strided_slice %245 {offsets = [1, 0], sizes = [1, 128], strides = [1, 1]} : vector<4x128xf32> to vector<1x128xf32>
    %248 = vector.extract_strided_slice %245 {offsets = [2, 0], sizes = [1, 128], strides = [1, 1]} : vector<4x128xf32> to vector<1x128xf32>
    %249 = vector.extract_strided_slice %245 {offsets = [3, 0], sizes = [1, 128], strides = [1, 1]} : vector<4x128xf32> to vector<1x128xf32>
    %cst_143 = arith.constant 1.000000e+00 : f32
    %250 = vector.broadcast %cst_143 : f32 to vector<1x128xf32>
    %251 = arith.subf %250, %249 : vector<1x128xf32>
    %252 = vector.broadcast %246 : vector<1x128xf32> to vector<8x128xf32>
    %253 = arith.addf %244, %252 : vector<8x128xf32>
    %254 = vector.broadcast %249 : vector<1x128xf32> to vector<8x128xf32>
    %255 = arith.mulf %253, %254 : vector<8x128xf32>
    %256 = vector.shape_cast %255 : vector<8x128xf32> to vector<1x8x128xf32>
    %cst_144 = arith.constant dense<0.000000e+00> : vector<1xf32>
    %257 = vector.multi_reduction <add>, %256, %cst_144 [1, 2] : vector<1x8x128xf32> to vector<1xf32>
    %258 = vector.shape_cast %257 : vector<1xf32> to vector<1x1x1xf32>
    %259 = vector.extract %258[0, 0, 0] : f32 from vector<1x1x1xf32>
    %260 = vector.broadcast %259 : f32 to vector<1x1xf32>
    %cst_145 = arith.constant 0.001953125 : f32
    %261 = vector.broadcast %cst_145 : f32 to vector<1x1xf32>
    %262 = arith.mulf %260, %261 : vector<1x1xf32>
    %263 = vector.broadcast %251 : vector<1x128xf32> to vector<8x128xf32>
    %264 = arith.mulf %253, %263 : vector<8x128xf32>
    %265 = vector.shape_cast %264 : vector<8x128xf32> to vector<1x8x128xf32>
    %cst_146 = arith.constant dense<0.000000e+00> : vector<1xf32>
    %266 = vector.multi_reduction <add>, %265, %cst_146 [1, 2] : vector<1x8x128xf32> to vector<1xf32>
    %267 = vector.shape_cast %266 : vector<1xf32> to vector<1x1x1xf32>
    %268 = vector.extract %267[0, 0, 0] : f32 from vector<1x1x1xf32>
    %269 = vector.broadcast %268 : f32 to vector<1x1xf32>
    %cst_147 = arith.constant 0.001953125 : f32
    %270 = vector.broadcast %cst_147 : f32 to vector<1x1xf32>
    %271 = arith.mulf %269, %270 : vector<1x1xf32>
    %272 = vector.broadcast %262 : vector<1x1xf32> to vector<1x128xf32>
    %273 = arith.mulf %249, %272 : vector<1x128xf32>
    %274 = vector.broadcast %271 : vector<1x1xf32> to vector<1x128xf32>
    %275 = arith.mulf %251, %274 : vector<1x128xf32>
    %276 = arith.addf %273, %275 : vector<1x128xf32>
    %277 = vector.broadcast %276 : vector<1x128xf32> to vector<8x128xf32>
    %278 = arith.subf %253, %277 : vector<8x128xf32>
    %279 = arith.mulf %278, %278 : vector<8x128xf32>
    %280 = vector.broadcast %249 : vector<1x128xf32> to vector<8x128xf32>
    %281 = arith.mulf %279, %280 : vector<8x128xf32>
    %282 = vector.shape_cast %281 : vector<8x128xf32> to vector<1x8x128xf32>
    %cst_148 = arith.constant dense<0.000000e+00> : vector<1xf32>
    %283 = vector.multi_reduction <add>, %282, %cst_148 [1, 2] : vector<1x8x128xf32> to vector<1xf32>
    %284 = vector.shape_cast %283 : vector<1xf32> to vector<1x1x1xf32>
    %285 = vector.extract %284[0, 0, 0] : f32 from vector<1x1x1xf32>
    %286 = vector.broadcast %285 : f32 to vector<1x1xf32>
    %cst_149 = arith.constant 0.001953125 : f32
    %287 = vector.broadcast %cst_149 : f32 to vector<1x1xf32>
    %288 = arith.mulf %286, %287 : vector<1x1xf32>
    %289 = arith.mulf %278, %278 : vector<8x128xf32>
    %290 = vector.broadcast %251 : vector<1x128xf32> to vector<8x128xf32>
    %291 = arith.mulf %289, %290 : vector<8x128xf32>
    %292 = vector.shape_cast %291 : vector<8x128xf32> to vector<1x8x128xf32>
    %cst_150 = arith.constant dense<0.000000e+00> : vector<1xf32>
    %293 = vector.multi_reduction <add>, %292, %cst_150 [1, 2] : vector<1x8x128xf32> to vector<1xf32>
    %294 = vector.shape_cast %293 : vector<1xf32> to vector<1x1x1xf32>
    %295 = vector.extract %294[0, 0, 0] : f32 from vector<1x1x1xf32>
    %296 = vector.broadcast %295 : f32 to vector<1x1xf32>
    %cst_151 = arith.constant 0.001953125 : f32
    %297 = vector.broadcast %cst_151 : f32 to vector<1x1xf32>
    %298 = arith.mulf %296, %297 : vector<1x1xf32>
    %cst_152 = arith.constant 9.99999974E-6 : f32
    %299 = vector.broadcast %cst_152 : f32 to vector<1x1xf32>
    %300 = arith.addf %288, %299 : vector<1x1xf32>
    %301 = math.rsqrt %300 : vector<1x1xf32>
    %302 = vector.broadcast %301 : vector<1x1xf32> to vector<1x128xf32>
    %303 = arith.mulf %249, %302 : vector<1x128xf32>
    %cst_153 = arith.constant 9.99999974E-6 : f32
    %304 = vector.broadcast %cst_153 : f32 to vector<1x1xf32>
    %305 = arith.addf %298, %304 : vector<1x1xf32>
    %306 = math.rsqrt %305 : vector<1x1xf32>
    %307 = vector.broadcast %306 : vector<1x1xf32> to vector<1x128xf32>
    %308 = arith.mulf %251, %307 : vector<1x128xf32>
    %309 = arith.addf %303, %308 : vector<1x128xf32>
    %310 = vector.broadcast %309 : vector<1x128xf32> to vector<8x128xf32>
    %311 = arith.mulf %278, %310 : vector<8x128xf32>
    %312 = vector.broadcast %247 : vector<1x128xf32> to vector<8x128xf32>
    %313 = arith.mulf %311, %312 : vector<8x128xf32>
    %314 = vector.broadcast %248 : vector<1x128xf32> to vector<8x128xf32>
    %315 = arith.addf %313, %314 : vector<8x128xf32>
    %cst_154 = arith.constant 0.000000e+00 : f32
    %316 = vector.broadcast %cst_154 : f32 to vector<8x128xf32>
    %317 = arith.cmpf ogt, %315, %316 : vector<8x128xf32>
    %cst_155 = arith.constant 2.000000e-01 : f32
    %318 = vector.broadcast %cst_155 : f32 to vector<8x128xf32>
    %319 = arith.mulf %318, %315 : vector<8x128xf32>
    %320 = arith.select %317, %315, %319 : vector<8x128xi1>, vector<8x128xf32>
    %321 = vector.shape_cast %320 : vector<8x128xf32> to vector<1x8x128xf32>
    %c0_156 = arith.constant 0 : index
    %c0_157 = arith.constant 0 : index
    %c0_158 = arith.constant 0 : index
    %322 = vector.load %arg14[%c0_156, %c0_157, %c0_158] : memref<1x8x128xf32, #tpu.memory_space<vmem>>, vector<1x8x128xf32>
    tpu.vector_store %arg14[%c0_156, %c0_157, %c0_158], %321 {strides = array<i32>} : memref<1x8x128xf32, #tpu.memory_space<vmem>>, vector<1x8x128xf32>,
    %323 = arith.truncf %320 : vector<8x128xf32> to vector<8x128xbf16>
    %c1_159 = arith.constant 1 : index
    %c16_160 = arith.constant 16 : index
    %324 = vector.load %arg19[%c1_159, %c16_160] : memref<10x160xbf16, #tpu.memory_space<vmem>>, vector<8x128xbf16>
    tpu.vector_store %arg19[%c1_159, %c16_160], %323 {strides = array<i32>} : memref<10x160xbf16, #tpu.memory_space<vmem>>, vector<8x128xbf16>,
    %c0_161 = arith.constant 0 : index
    %c0_162 = arith.constant 0 : index
    %325 = vector.load %arg11[%c0_161, %c0_162] : memref<4x8xbf16, #tpu.memory_space<vmem>>, vector<4x8xbf16>
    %c0_163 = arith.constant 0 : index
    %c0_164 = arith.constant 0 : index
    %326 = vector.load %arg19[%c0_163, %c0_164] : memref<10x160xbf16, #tpu.memory_space<vmem>>, vector<8x160xbf16>
    %cst_165 = arith.constant dense<0.000000e+00> : vector<4x160xf32>
    %327 = tpu.matmul %325, %326, %cst_165 {dimension_numbers = #tpu.dot_dimension_numbers<[1], [0], [0], [1], [0, 0, 1, 1], [], []>} : vector<4x8xbf16>, vector<8x160xbf16>, vector<4x160xf32> -> vector<4x160xf32>
    %328 = arith.truncf %327 : vector<4x160xf32> to vector<4x160xbf16>
    %c0_166 = arith.constant 0 : index
    %c0_167 = arith.constant 0 : index
    %c0_168 = arith.constant 0 : index
    %329 = vector.load %arg5[%c0_166, %c0_167, %c0_168] : memref<3x160x64xbf16, #tpu.memory_space<vmem>>, vector<1x160x64xbf16>
    %330 = vector.shape_cast %329 : vector<1x160x64xbf16> to vector<160x64xbf16>
    %cst_169 = arith.constant dense<0.000000e+00> : vector<4x64xf32>
    %331 = tpu.matmul %328, %330, %cst_169 {dimension_numbers = #tpu.dot_dimension_numbers<[1], [0], [0], [1], [0, 0, 1, 1], [], []>} : vector<4x160xbf16>, vector<160x64xbf16>, vector<4x64xf32> -> vector<4x64xf32>
    %c1_170 = arith.constant 1 : index
    %c0_171 = arith.constant 0 : index
    %332 = vector.load %arg19[%c1_170, %c0_171] : memref<10x160xbf16, #tpu.memory_space<vmem>>, vector<8x160xbf16>
    %cst_172 = arith.constant dense<0.000000e+00> : vector<4x160xf32>
    %333 = tpu.matmul %325, %332, %cst_172 {dimension_numbers = #tpu.dot_dimension_numbers<[1], [0], [0], [1], [0, 0, 1, 1], [], []>} : vector<4x8xbf16>, vector<8x160xbf16>, vector<4x160xf32> -> vector<4x160xf32>
    %334 = arith.truncf %333 : vector<4x160xf32> to vector<4x160xbf16>
    %c1_173 = arith.constant 1 : index
    %c0_174 = arith.constant 0 : index
    %c0_175 = arith.constant 0 : index
    %335 = vector.load %arg5[%c1_173, %c0_174, %c0_175] : memref<3x160x64xbf16, #tpu.memory_space<vmem>>, vector<1x160x64xbf16>
    %336 = vector.shape_cast %335 : vector<1x160x64xbf16> to vector<160x64xbf16>
    %cst_176 = arith.constant dense<0.000000e+00> : vector<4x64xf32>
    %337 = tpu.matmul %334, %336, %cst_176 {dimension_numbers = #tpu.dot_dimension_numbers<[1], [0], [0], [1], [0, 0, 1, 1], [], []>} : vector<4x160xbf16>, vector<160x64xbf16>, vector<4x64xf32> -> vector<4x64xf32>
    %338 = arith.addf %331, %337 : vector<4x64xf32>
    %c2_177 = arith.constant 2 : index
    %c0_178 = arith.constant 0 : index
    %339 = vector.load %arg19[%c2_177, %c0_178] : memref<10x160xbf16, #tpu.memory_space<vmem>>, vector<8x160xbf16>
    %cst_179 = arith.constant dense<0.000000e+00> : vector<4x160xf32>
    %340 = tpu.matmul %325, %339, %cst_179 {dimension_numbers = #tpu.dot_dimension_numbers<[1], [0], [0], [1], [0, 0, 1, 1], [], []>} : vector<4x8xbf16>, vector<8x160xbf16>, vector<4x160xf32> -> vector<4x160xf32>
    %341 = arith.truncf %340 : vector<4x160xf32> to vector<4x160xbf16>
    %c2_180 = arith.constant 2 : index
    %c0_181 = arith.constant 0 : index
    %c0_182 = arith.constant 0 : index
    %342 = vector.load %arg5[%c2_180, %c0_181, %c0_182] : memref<3x160x64xbf16, #tpu.memory_space<vmem>>, vector<1x160x64xbf16>
    %343 = vector.shape_cast %342 : vector<1x160x64xbf16> to vector<160x64xbf16>
    %cst_183 = arith.constant dense<0.000000e+00> : vector<4x64xf32>
    %344 = tpu.matmul %341, %343, %cst_183 {dimension_numbers = #tpu.dot_dimension_numbers<[1], [0], [0], [1], [0, 0, 1, 1], [], []>} : vector<4x160xbf16>, vector<160x64xbf16>, vector<4x64xf32> -> vector<4x64xf32>
    %345 = arith.addf %338, %344 : vector<4x64xf32>
    %c0_184 = arith.constant 0 : index
    %c0_185 = arith.constant 0 : index
    %346 = vector.load %arg9[%c0_184, %c0_185] : memref<4x64xf32, #tpu.memory_space<vmem>>, vector<4x64xf32>
    %347 = vector.extract_strided_slice %346 {offsets = [0, 0], sizes = [1, 64], strides = [1, 1]} : vector<4x64xf32> to vector<1x64xf32>
    %348 = vector.extract_strided_slice %346 {offsets = [1, 0], sizes = [1, 64], strides = [1, 1]} : vector<4x64xf32> to vector<1x64xf32>
    %349 = vector.extract_strided_slice %346 {offsets = [2, 0], sizes = [1, 64], strides = [1, 1]} : vector<4x64xf32> to vector<1x64xf32>
    %350 = vector.extract_strided_slice %346 {offsets = [3, 0], sizes = [1, 64], strides = [1, 1]} : vector<4x64xf32> to vector<1x64xf32>
    %cst_186 = arith.constant 1.000000e+00 : f32
    %351 = vector.broadcast %cst_186 : f32 to vector<1x64xf32>
    %352 = arith.subf %351, %350 : vector<1x64xf32>
    %353 = vector.broadcast %347 : vector<1x64xf32> to vector<4x64xf32>
    %354 = arith.addf %345, %353 : vector<4x64xf32>
    %355 = vector.broadcast %350 : vector<1x64xf32> to vector<4x64xf32>
    %356 = arith.mulf %354, %355 : vector<4x64xf32>
    %357 = vector.shape_cast %356 : vector<4x64xf32> to vector<1x4x64xf32>
    %cst_187 = arith.constant dense<0.000000e+00> : vector<1xf32>
    %358 = vector.multi_reduction <add>, %357, %cst_187 [1, 2] : vector<1x4x64xf32> to vector<1xf32>
    %359 = vector.shape_cast %358 : vector<1xf32> to vector<1x1x1xf32>
    %360 = vector.extract %359[0, 0, 0] : f32 from vector<1x1x1xf32>
    %361 = vector.broadcast %360 : f32 to vector<1x1xf32>
    %cst_188 = arith.constant 7.812500e-03 : f32
    %362 = vector.broadcast %cst_188 : f32 to vector<1x1xf32>
    %363 = arith.mulf %361, %362 : vector<1x1xf32>
    %364 = vector.broadcast %352 : vector<1x64xf32> to vector<4x64xf32>
    %365 = arith.mulf %354, %364 : vector<4x64xf32>
    %366 = vector.shape_cast %365 : vector<4x64xf32> to vector<1x4x64xf32>
    %cst_189 = arith.constant dense<0.000000e+00> : vector<1xf32>
    %367 = vector.multi_reduction <add>, %366, %cst_189 [1, 2] : vector<1x4x64xf32> to vector<1xf32>
    %368 = vector.shape_cast %367 : vector<1xf32> to vector<1x1x1xf32>
    %369 = vector.extract %368[0, 0, 0] : f32 from vector<1x1x1xf32>
    %370 = vector.broadcast %369 : f32 to vector<1x1xf32>
    %cst_190 = arith.constant 7.812500e-03 : f32
    %371 = vector.broadcast %cst_190 : f32 to vector<1x1xf32>
    %372 = arith.mulf %370, %371 : vector<1x1xf32>
    %373 = vector.broadcast %363 : vector<1x1xf32> to vector<1x64xf32>
    %374 = arith.mulf %350, %373 : vector<1x64xf32>
    %375 = vector.broadcast %372 : vector<1x1xf32> to vector<1x64xf32>
    %376 = arith.mulf %352, %375 : vector<1x64xf32>
    %377 = arith.addf %374, %376 : vector<1x64xf32>
    %378 = vector.broadcast %377 : vector<1x64xf32> to vector<4x64xf32>
    %379 = arith.subf %354, %378 : vector<4x64xf32>
    %380 = arith.mulf %379, %379 : vector<4x64xf32>
    %381 = vector.broadcast %350 : vector<1x64xf32> to vector<4x64xf32>
    %382 = arith.mulf %380, %381 : vector<4x64xf32>
    %383 = vector.shape_cast %382 : vector<4x64xf32> to vector<1x4x64xf32>
    %cst_191 = arith.constant dense<0.000000e+00> : vector<1xf32>
    %384 = vector.multi_reduction <add>, %383, %cst_191 [1, 2] : vector<1x4x64xf32> to vector<1xf32>
    %385 = vector.shape_cast %384 : vector<1xf32> to vector<1x1x1xf32>
    %386 = vector.extract %385[0, 0, 0] : f32 from vector<1x1x1xf32>
    %387 = vector.broadcast %386 : f32 to vector<1x1xf32>
    %cst_192 = arith.constant 7.812500e-03 : f32
    %388 = vector.broadcast %cst_192 : f32 to vector<1x1xf32>
    %389 = arith.mulf %387, %388 : vector<1x1xf32>
    %390 = arith.mulf %379, %379 : vector<4x64xf32>
    %391 = vector.broadcast %352 : vector<1x64xf32> to vector<4x64xf32>
    %392 = arith.mulf %390, %391 : vector<4x64xf32>
    %393 = vector.shape_cast %392 : vector<4x64xf32> to vector<1x4x64xf32>
    %cst_193 = arith.constant dense<0.000000e+00> : vector<1xf32>
    %394 = vector.multi_reduction <add>, %393, %cst_193 [1, 2] : vector<1x4x64xf32> to vector<1xf32>
    %395 = vector.shape_cast %394 : vector<1xf32> to vector<1x1x1xf32>
    %396 = vector.extract %395[0, 0, 0] : f32 from vector<1x1x1xf32>
    %397 = vector.broadcast %396 : f32 to vector<1x1xf32>
    %cst_194 = arith.constant 7.812500e-03 : f32
    %398 = vector.broadcast %cst_194 : f32 to vector<1x1xf32>
    %399 = arith.mulf %397, %398 : vector<1x1xf32>
    %cst_195 = arith.constant 9.99999974E-6 : f32
    %400 = vector.broadcast %cst_195 : f32 to vector<1x1xf32>
    %401 = arith.addf %389, %400 : vector<1x1xf32>
    %402 = math.rsqrt %401 : vector<1x1xf32>
    %403 = vector.broadcast %402 : vector<1x1xf32> to vector<1x64xf32>
    %404 = arith.mulf %350, %403 : vector<1x64xf32>
    %cst_196 = arith.constant 9.99999974E-6 : f32
    %405 = vector.broadcast %cst_196 : f32 to vector<1x1xf32>
    %406 = arith.addf %399, %405 : vector<1x1xf32>
    %407 = math.rsqrt %406 : vector<1x1xf32>
    %408 = vector.broadcast %407 : vector<1x1xf32> to vector<1x64xf32>
    %409 = arith.mulf %352, %408 : vector<1x64xf32>
    %410 = arith.addf %404, %409 : vector<1x64xf32>
    %411 = vector.broadcast %410 : vector<1x64xf32> to vector<4x64xf32>
    %412 = arith.mulf %379, %411 : vector<4x64xf32>
    %413 = vector.broadcast %348 : vector<1x64xf32> to vector<4x64xf32>
    %414 = arith.mulf %412, %413 : vector<4x64xf32>
    %415 = vector.broadcast %349 : vector<1x64xf32> to vector<4x64xf32>
    %416 = arith.addf %414, %415 : vector<4x64xf32>
    %cst_197 = arith.constant 0.000000e+00 : f32
    %417 = vector.broadcast %cst_197 : f32 to vector<4x64xf32>
    %418 = arith.cmpf ogt, %416, %417 : vector<4x64xf32>
    %cst_198 = arith.constant 2.000000e-01 : f32
    %419 = vector.broadcast %cst_198 : f32 to vector<4x64xf32>
    %420 = arith.mulf %419, %416 : vector<4x64xf32>
    %421 = arith.select %418, %416, %420 : vector<4x64xi1>, vector<4x64xf32>
    %422 = vector.shape_cast %421 : vector<4x64xf32> to vector<1x4x64xf32>
    %c0_199 = arith.constant 0 : index
    %c0_200 = arith.constant 0 : index
    %c0_201 = arith.constant 0 : index
    %423 = vector.load %arg15[%c0_199, %c0_200, %c0_201] : memref<1x4x64xf32, #tpu.memory_space<vmem>>, vector<1x4x64xf32>
    tpu.vector_store %arg15[%c0_199, %c0_200, %c0_201], %422 {strides = array<i32>} : memref<1x4x64xf32, #tpu.memory_space<vmem>>, vector<1x4x64xf32>,
    return
  }
  func.func @transform_0(%arg0: i32) -> (i32, i32, i32) {
    %c0_i32 = arith.constant 0 : i32
    %c0_i32_0 = arith.constant 0 : i32
    %c0_i32_1 = arith.constant 0 : i32
    return %arg0, %c0_i32, %c0_i32_0 : i32, i32, i32
  }
  func.func @transform_1(%arg0: i32) -> (i32, i32, i32) {
    %c0_i32 = arith.constant 0 : i32
    %c0_i32_0 = arith.constant 0 : i32
    %c0_i32_1 = arith.constant 0 : i32
    %c0_i32_2 = arith.constant 0 : i32
    return %c0_i32, %c0_i32_0, %c0_i32_1 : i32, i32, i32
  }
  func.func @transform_2(%arg0: i32) -> (i32, i32, i32) {
    %c0_i32 = arith.constant 0 : i32
    %c0_i32_0 = arith.constant 0 : i32
    %c0_i32_1 = arith.constant 0 : i32
    %c0_i32_2 = arith.constant 0 : i32
    return %c0_i32, %c0_i32_0, %c0_i32_1 : i32, i32, i32
  }
  func.func @transform_3(%arg0: i32) -> (i32, i32, i32) {
    %c0_i32 = arith.constant 0 : i32
    %c0_i32_0 = arith.constant 0 : i32
    %c0_i32_1 = arith.constant 0 : i32
    %c0_i32_2 = arith.constant 0 : i32
    return %c0_i32, %c0_i32_0, %c0_i32_1 : i32, i32, i32
  }
  func.func @transform_4(%arg0: i32) -> (i32, i32, i32) {
    %c0_i32 = arith.constant 0 : i32
    %c0_i32_0 = arith.constant 0 : i32
    %c0_i32_1 = arith.constant 0 : i32
    %c0_i32_2 = arith.constant 0 : i32
    return %c0_i32, %c0_i32_0, %c0_i32_1 : i32, i32, i32
  }
  func.func @transform_5(%arg0: i32) -> (i32, i32) {
    %c0_i32 = arith.constant 0 : i32
    %c0_i32_0 = arith.constant 0 : i32
    %c0_i32_1 = arith.constant 0 : i32
    return %c0_i32, %c0_i32_0 : i32, i32
  }
  func.func @transform_6(%arg0: i32) -> (i32, i32) {
    %c0_i32 = arith.constant 0 : i32
    %c0_i32_0 = arith.constant 0 : i32
    %c0_i32_1 = arith.constant 0 : i32
    return %c0_i32, %c0_i32_0 : i32, i32
  }
  func.func @transform_7(%arg0: i32) -> (i32, i32) {
    %c0_i32 = arith.constant 0 : i32
    %c0_i32_0 = arith.constant 0 : i32
    %c0_i32_1 = arith.constant 0 : i32
    return %c0_i32, %c0_i32_0 : i32, i32
  }
  func.func @transform_8(%arg0: i32) -> (i32, i32) {
    %c0_i32 = arith.constant 0 : i32
    %c0_i32_0 = arith.constant 0 : i32
    %c0_i32_1 = arith.constant 0 : i32
    return %c0_i32, %c0_i32_0 : i32, i32
  }
  func.func @transform_9(%arg0: i32) -> (i32, i32) {
    %c0_i32 = arith.constant 0 : i32
    %c0_i32_0 = arith.constant 0 : i32
    %c0_i32_1 = arith.constant 0 : i32
    return %c0_i32, %c0_i32_0 : i32, i32
  }
  func.func @transform_10(%arg0: i32) -> (i32, i32) {
    %c0_i32 = arith.constant 0 : i32
    %c0_i32_0 = arith.constant 0 : i32
    %c0_i32_1 = arith.constant 0 : i32
    return %c0_i32, %c0_i32_0 : i32, i32
  }
  func.func @transform_11(%arg0: i32) -> (i32, i32, i32) {
    %c0_i32 = arith.constant 0 : i32
    %c0_i32_0 = arith.constant 0 : i32
    %c0_i32_1 = arith.constant 0 : i32
    return %arg0, %c0_i32, %c0_i32_0 : i32, i32, i32
  }
  func.func @transform_12(%arg0: i32) -> (i32, i32, i32) {
    %c0_i32 = arith.constant 0 : i32
    %c0_i32_0 = arith.constant 0 : i32
    %c0_i32_1 = arith.constant 0 : i32
    return %arg0, %c0_i32, %c0_i32_0 : i32, i32, i32
  }
  func.func @transform_13(%arg0: i32) -> (i32, i32, i32) {
    %c0_i32 = arith.constant 0 : i32
    %c0_i32_0 = arith.constant 0 : i32
    %c0_i32_1 = arith.constant 0 : i32
    return %arg0, %c0_i32, %c0_i32_0 : i32, i32, i32
  }
  func.func @transform_14(%arg0: i32) -> (i32, i32, i32) {
    %c0_i32 = arith.constant 0 : i32
    %c0_i32_0 = arith.constant 0 : i32
    %c0_i32_1 = arith.constant 0 : i32
    return %arg0, %c0_i32, %c0_i32_0 : i32, i32, i32
  }
}

</mosaic_0001>

<bundles_post_ra>
// kernel: tpu_custom_call.1
= control target key start
LH: loop header
LB: loop body
LE: loop exit
PB: predicated region body
PF: predicated region fallthrough
CT: control target
= control target key end

     0   :  { %s6345_s0 = inlined_call_operand.hbm [shape: f32[2,16,64], index: 0, kind: input, shape index: {}]   ;;  %s6346_s1 = inlined_call_operand.hbm [shape: bf16[3,72,256], index: 1, kind: input, shape index: {}]   ;;  %s6347_s2 = inlined_call_operand.vmem [shape: bf16[3,288,128], index: 2, kind: input, shape index: {}]   ;;  %s6348_s3 = inlined_call_operand.hbm [shape: bf16[3,160,128], index: 3, kind: input, shape index: {}]   ;;  %s6349_s4 = inlined_call_operand.vmem [shape: bf16[3,160,64], index: 4, kind: input, shape index: {}]   ;;  %s6350_s5 = inlined_call_operand.hbm [shape: f32[4,256], index: 5, kind: input, shape index: {}]   ;;  %s6351_s6 = inlined_call_operand.vmem [shape: f32[4,128], index: 6, kind: input, shape index: {}]   ;;  %s6352_s7 = inlined_call_operand.vmem [shape: f32[4,128], index: 7, kind: input, shape index: {}]   ;;  %s6353_s8 = inlined_call_operand.hbm [shape: f32[4,64], index: 8, kind: input, shape index: {}]   ;;  %s6354_s9 = inlined_call_operand.vmem [shape: bf16[8,16], index: 9, kind: input, shape index: {}]   ;;  %s6355_s10 = inlined_call_operand.vmem [shape: bf16[4,8], index: 10, kind: input, shape index: {}]   ;;  %s6356_s11 = inlined_call_operand.hbm [shape: f32[2,16,256], index: 11, kind: output, shape index: {0}]   ;;  %s6357_s12 = inlined_call_operand.hbm [shape: f32[2,8,128], index: 12, kind: output, shape index: {1}]   ;;  %s6358_s13 = inlined_call_operand.hbm [shape: f32[2,8,128], index: 13, kind: output, shape index: {2}]   ;;  %s6359_s14 = inlined_call_operand.hbm [shape: f32[2,4,64], index: 14, kind: output, shape index: {3}]  }
   0x1   :  { %6377 = sst [smem:[#allocation30_spill]] %s6345_s0 }
   0x2   :  { %6378 = sst [smem:[#allocation31_spill]] %s6346_s1 }
   0x3   :  { %6379 = sst [smem:[#allocation32_spill]] %s6347_s2 }
   0x4   :  { %6380 = sst [smem:[#allocation33_spill]] %s6348_s3 }
   0x5   :  { %6381 = sst [smem:[#allocation34_spill]] %s6350_s5 }
   0x6   :  { %6382 = sst [smem:[#allocation35_spill]] %s6353_s8 }
   0x7   :  { %6383 = sst [smem:[#allocation36_spill]] %s6359_s14 }
   0x8   :  { %20 = vsyncpa [#allocation7], 0 }
   0x9   :  { %22 = vsyncpa [#allocation7 + $0x1], 0 }
   0xa   :  { %23 = vsyncpa [#allocation10], 0 }
   0xb   :  { %24 = vsyncpa [#allocation13], 0 }
   0xc   :  { %25 = vsyncpa [#allocation8], 0 }
   0xd   :  { %27 = vsyncpa [#allocation8 + $0x1], 0 }
   0xe   :  { %28 = vsyncpa [#allocation17], 0 }
   0xf   :  { %30 = vsyncpa [#allocation17 + $0x1], 0 }
  0x10   :  { %31 = vsyncpa [#allocation20], 0 }
  0x11   :  { %33 = vsyncpa [#allocation20 + $0x1], 0  ;;  %s5232_s29 = smov 0   ;;  %s5234_s30 = smov 0  }
  0x12   :  { %s5236_s15 = smov 0   ;;  %s5238_s16 = smov 0  }
  0x13 LB: > { %6384 = sst [smem:[#allocation27_spill]] %s5124_s29  ;;  %s5253_s17 = sadd.s32 4294967295, %s5136_s16   ;;  %s5136_s16 = sphi %s5238_s16, %s6458_s16   ;;  %s5132_s15 = sphi %s5236_s15, %s6457_s15   ;;  %s5128_s30 = sphi %s5234_s30, %s6456_s30   ;;  %s5124_s29 = sphi %s5232_s29, %s6455_s29  }
  0x14   : > { %s6360_s18 = sadd.s32 4294967294, %s5136_s16   ;;  %p59_p0 = scmp.ne.s32.totalorder %s5128_s30, %s5124_s29 }
  0x15   : > { %p6364_p1 = scmp.eq.s32.totalorder %s5253_s17, 0  ;;  %p299_p3 = scmp.eq.s32.totalorder %s6360_s18, 1 }
  0x16   : > { %p4039_p5 = scmp.ge.s32.totalorder %s5136_s16, 1  ;;  %p384_p7 = scmp.lt.s32.totalorder %s5136_s16, 3 }
  0x17   : > { %p5264_p4 = por %p6364_p1, %p59_p0  ;;  %p5269_p6 = por %p299_p3, %p59_p0 }
  0x18   : > { %p5274_p8 = pnand %p4039_p5, %p384_p7  ;;  %s5138_s22 = smov [#allocation9]  }
  0x19   : > { %s6385_s19 = scalar_select %p5264_p4, 1, 0 }
  0x1a   : > { %s6386_s20 = scalar_select %p5269_p6, 1, 0 }
  0x1b   : > { %s6388_s21 = scalar_select %p5274_p8, 1, 0 }
  0x1c   : > { %6387 = sst [smem:[#allocation28_spill]] %s6386_s20  ;;  %s396_s23 = sshll.u32 %s5138_s22, 4  ;;  %s397_s23 = int_to_ptr.vmem [resolvable:$true] %s396_s23 }
  0x1d   : > { %p4574_p9 = pneg %p5274_p8  ;;  %s5139_s25 = smov [#allocation12]  }
  0x1e   : > { %s429_s26 = sshll.u32 %s5139_s25, 4  ;;  %s5140_s27 = smov [#allocation11]   ;;  %s430_s26 = int_to_ptr.vmem [resolvable:$true] %s429_s26 }
  0x1f   : > { %p5283_p11 = pnand %p4574_p9, %p6364_p1  ;;  %s412_s28 = sshll.u32 %s5140_s27, 4  ;;  %s413_s28 = int_to_ptr.vmem [resolvable:$true] %s412_s28 }
  0x20   : > { %s4857_s18 = scalar_lea.vmem %s397_s23, 3456  ;;  %p4865_p5 = scmp.lt.s32.totalorder %s397_s23, %s397_s23 }
  0x21   : > { %p4848_p12 = pneg %p5283_p11  ;;  %p4858_p13 = scmp.ne.s32.totalorder %s397_s23, %s4857_s18 }
  0x22   : > { %p4866_p7 = scmp.lt.s32.totalorder %s4857_s18, %s4857_s18 }
  0x23   : > { %p4860_p0 = pnand %p4858_p13, %p4848_p12 }
  0x24   : > { %p4867_p9 = por %p4866_p7, %p4865_p5 }
  0x25   : > { %p4861_p3 = pneg %p4860_p0 }
  0x27   : > { %p4868_p10 = pnand %p4867_p9, %p4861_p3 }
  0x29   : > { %4871 = shalt.err (!%p4868_p10)
}
  0x2a   : > { %s6366_s22 = smov 128   ;;  %s6367_s25 = smov 8  }
  0x2b   : > { %s6390_s1 = sld [smem:[#allocation31_spill]]  ;;  %s4883_s29 = scalar_lea.vmem %s430_s26, 128 }
  0x2c   : > { %p4884_p13 = scmp.ne.s32.totalorder %s430_s26, %s4883_s29  ;;  %p4891_p3 = scmp.lt.s32.totalorder %s430_s26, %s430_s26 }
  0x2d   : > { %p4892_p10 = scmp.lt.s32.totalorder %s4883_s29, %s4883_s29 }
  0x2e   : > { %p4886_p0 = pnand %p4884_p13, %p4848_p12 }
  0x2f   : > { %p4893_p7 = por %p4892_p10, %p4891_p3 }
  0x30   : > { %p4887_p5 = pneg %p4886_p0 }
  0x31   : > { %4577 = dma.hbm_to_vmem [thread:$0]  (!%p5283_p11), %s6390_s1, 3456, %s397_s23, [#allocation10], %s6366_s22, %s6366_s22, %s6367_s25  }
  0x32   : > { %p4894_p9 = pnand %p4893_p7, %p4887_p5 }
  0x34   : > { %4897 = shalt.err (!%p4894_p9)
}
  0x35   : > { %s6391_s5 = sld [smem:[#allocation34_spill]]  ;;  %s4909_s20 = scalar_lea.vmem %s413_s28, 3840 }
  0x36   : > { %p4910_p1 = scmp.ne.s32.totalorder %s413_s28, %s4909_s20  ;;  %p4917_p0 = scmp.lt.s32.totalorder %s413_s28, %s413_s28 }
  0x37   : > { %p4918_p6 = scmp.lt.s32.totalorder %s4909_s20, %s4909_s20 }
  0x38   : > { %p4912_p2 = pnand %p4910_p1, %p4848_p12 }
  0x39   : > { %p4919_p4 = por %p4918_p6, %p4917_p0 }
  0x3a   : > { %p4913_p13 = pneg %p4912_p2 }
  0x3b   : > { %4583 = dma.hbm_to_vmem [thread:$0]  (!%p5283_p11), %s6391_s5, 128, %s430_s26, [#allocation13]  }
  0x3c   : > { %p4920_p3 = pnand %p4919_p4, %p4913_p13 }
  0x3e   : > { %4923 = shalt.err (!%p4920_p3)
}
  0x3f   : > { %s5143_s29 = smov 64   ;;  %s5144_s23 = smov 4  }
  0x40   : > { %s6392_s3 = sld [smem:[#allocation33_spill]]  ;;  %s5145_s26 = smov [#allocation14]  }
  0x41   : > { %s446_s18 = sshll.u32 %s5145_s26, 4  ;;  %s447_s18 = int_to_ptr.vmem [resolvable:$true] %s446_s18 }
  0x42   : > { %s4935_s22 = scalar_lea.vmem %s447_s18, 64  ;;  %p4943_p4 = scmp.lt.s32.totalorder %s447_s18, %s447_s18 }
  0x43   : > { %p4936_p1 = scmp.ne.s32.totalorder %s447_s18, %s4935_s22  ;;  %p4944_p5 = scmp.lt.s32.totalorder %s4935_s22, %s4935_s22 }
  0x45   : > { %p4938_p2 = pnand %p4936_p1, %p4848_p12  ;;  %p4945_p10 = por %p4944_p5, %p4943_p4 }
  0x46   : > { %4580 = dma.hbm_to_vmem [thread:$0]  (!%p5283_p11), %s6392_s3, 3840, %s413_s28, [#allocation10], %s5143_s29, %s5143_s29, %s5144_s23  }
  0x47   : > { %p4939_p6 = pneg %p4938_p2 }
  0x49   : > { %p4946_p7 = pnand %p4945_p10, %p4939_p6 }
  0x4b   : > { %4949 = shalt.err (!%p4946_p7)
}
  0x4c   : > { %s6393_s8 = sld [smem:[#allocation35_spill]]  ;;  %s5325_s28 = sadd.s32 1, %s5136_s16  }
  0x4d   : > { %s46_s22 = sadd.s32 1, %s5132_s15  ;;  %s43_s24 = ssub.s32 %s5136_s16, %s5325_s28 }
  0x4e   : > { %p53_p12 = scmp.ne.s32.totalorder %s5132_s15, %s5128_s30  ;;  %p44_p9 = scmp.eq.s32.totalorder %s43_s24, 0 }
  0x4f   : > { %p54_p13 = scmp.eq.s32.totalorder %s5136_s16, 0  ;;  %p6394_p0 = scmp.eq.s32.totalorder %s5253_s17, 1 }
  0x50   : > { %p4608_p1 = scmp.lt.s32.totalorder %s5136_s16, 2  ;;  %s463_s23 = sand.u32 1, %s5132_s15  }
  0x51   : > { %p5335_p3 = por %p6394_p0, %p53_p12  ;;  %p55_p2 = por %p54_p13, %p53_p12 }
  0x52   : > { %4586 = dma.hbm_to_vmem [thread:$0]  (!%p5283_p11), %s6393_s8, 64, %s447_s18, [#allocation13]  }
  0x53   : > { %s6395_s25 = scalar_select %p5335_p3, 1, 0 }
  0x54   : > { %s5341_s29 = scalar_select %p44_p9, %s5132_s15, %s46_s22  }
  0x55   : > { %s4045_s14 = sshll.u32 %s463_s23, 4  ;;  %s4385_s27 = sshll.u32 %s5136_s16, 8 }
  0x56   : > { %6396 = sst [smem:[#allocation29_spill]] %s5341_s29  ;;  %s467_s24 = scalar_lea.vmem [#allocation6], %s4045_s14 }
  0x57   : > { %s6397_s0 = sld [smem:[#allocation30_spill]]  ;;  %s474_s1 = sshll.u32 %s467_s24, 4  ;;  %s5350_s1 = int_to_ptr.vmem [resolvable:$true] %s474_s1 }
  0x58   : > { %p5352_p11 = pnand %p4608_p1, %p55_p2  ;;  %s5356_s22 = scalar_lea.sflag [#allocation7], %s463_s23 }
  0x5a   : > { %p4952_p4 = pneg %p5352_p11 }
  0x5d   : > { %s5348_s20 = scalar_lea.hbm %s6397_s0, %s4385_s27  ;;  %s4955_s14 = scalar_lea.hbm %s6397_s0, 512 }
  0x5e   : > { %s4950_s5 = scalar_lea.hbm %s5348_s20, 256  ;;  %p4956_p7 = scmp.lt.s32.totalorder %s5348_s20, %s6397_s0 }
  0x5f   : > { %p4951_p6 = scmp.ne.s32.totalorder %s5348_s20, %s4950_s5  ;;  %p4957_p12 = scmp.lt.s32.totalorder %s4955_s14, %s4950_s5 }
  0x61   : > { %p4953_p5 = pnand %p4952_p4, %p4951_p6  ;;  %p4958_p9 = por %p4957_p12, %p4956_p7 }
  0x63   : > { %p4954_p10 = pneg %p4953_p5 }
  0x65   : > { %p4959_p13 = pnand %p4958_p9, %p4954_p10 }
  0x67   : > { %4962 = shalt.err (!%p4959_p13)
}
  0x68   : > { %s4963_s23 = scalar_lea.vmem %s5350_s1, 256  ;;  %s5146_s8 = smov [#allocation6]  }
  0x69   : > { %p4964_p0 = scmp.ne.s32.totalorder %s5350_s1, %s4963_s23  ;;  %s4968_s29 = sshll.u32 %s5146_s8, 4  ;;  %s4969_s29 = int_to_ptr.vmem [resolvable:$false] %s4968_s29 }
  0x6a   : > { %s4970_s27 = scalar_lea.vmem %s4969_s29, 512  ;;  %p4971_p6 = scmp.lt.s32.totalorder %s5350_s1, %s4969_s29 }
  0x6b   : > { %p4966_p1 = pnand %p4964_p0, %p4952_p4  ;;  %p4972_p5 = scmp.lt.s32.totalorder %s4970_s27, %s4963_s23 }
  0x6d   : > { %p4967_p2 = pneg %p4966_p1  ;;  %p4973_p3 = por %p4972_p5, %p4971_p6 }
  0x6f   : > { %p4974_p8 = pnand %p4973_p3, %p4967_p2 }
  0x71   : > { %4977 = shalt.err (!%p4974_p8)
}
  0x72   : > { %s6399_s5 = smov 8   ;;  %s6400_s26 = smov 128  }
  0x73   : > { %4590 = dma.hbm_to_vmem [thread:$0]  (!%p5352_p11), %s5348_s20, 256, %s5350_s1, %s5356_s22, %s6400_s26, %s6400_s26, %s6399_s5  }
  0x74   : > { %p6401_p4 = scmp.ne.s32.totalorder %s6388_s21, 0 }
  0x75   : > { %s5383_s8 = sand.u32 (!%p6401_p4), 1, %s5128_s30   ;;  %p6402_p8 = scmp.ne.s32.totalorder (!%p6401_p4), %s6385_s19, 0 }
  0x76   : > { %486 = sbr.rel (%p6401_p4) target bundleno = 4251 (0x109b), region = 64  ;;  %s4049_s29 = sshll.u32 (!%p6401_p4), %s5383_s8, 4 }
  0x77   : > { %s489_s14 = scalar_lea.sflag (!%p6401_p4), [#allocation7], %s5383_s8  ;;  %s492_s18 = scalar_lea.vmem (!%p6401_p4), [#allocation6], %s4049_s29 }
  0x7b   : > { %5099 = dma.done.wait (%p6402_p8), %s489_s14, 256  }
  0x7c   : > { %5101 = vsyncadd (%p6402_p8), %s489_s14, 4294967040  ;;  %p6403_p3 = scmp.eq.s32.totalorder %s5253_s17, 0 }
  0x7e   : > { %5103 = dma.done.wait (%p6403_p3), [#allocation10], 7296   ;;  %p6404_p11 = pmov %p6403_p3 }
  0x7f   : > { %p6405_p10 = pmov %p6403_p3 }
  0x80   : > { %5105 = vsyncadd (%p6404_p11), [#allocation10], 4294960000 }
  0x81   : > { %5107 = dma.done.wait (%p6405_p10), [#allocation13], 192   ;;  %p6406_p7 = pmov %p6403_p3 }
  0x82   : > { %vm569_vm0 = vcmask 581632   ;;  %vm580_vm1 = vcmask 27648   ;;  %vm575_vm2 = vsmask.f32 7938  ;;  %vm585_vm3 = vcmask 585248   ;;  %v650_v3 = vld [vmem:[%s492_s18] sm:$0xff] }
  0x83   : > { %5109 = vsyncadd (%p6406_p7), [#allocation13], 4294967104  ;;  %v5147_v0 = vmov 0   ;;  %vm6373_vm4 = vsmask.f32 256  ;;  %vm6370_vm6 = vcmask 1043456   ;;  %v4386_v6 = vpack.c.bf16 %v650_v3, %v650_v3 }
  0x84   : > { %582 = vst.msk [vmem:[#allocation2 + $0x4] sm:$0xf] %vm580_vm1, %v5147_v0  ;;  %1040 = vmatprep.mubr.bf16.mxu0 %v5147_v0  ;;  %829 = vmatprep.mubr.bf16.mxu1 %v5147_v0  ;;  %vm5406_vm5 = vmand %vm569_vm0, %vm6373_vm4  ;;  %v651_v4 = vld [vmem:[%s492_s18 + $0x8] sm:$0xff]  ;;  %vm658_vm8 = vsmask.f32 4368  ;;  %v946_v5 = vld [vmem:[#allocation9 + $0xd0] sm:$0xff] }
  0x85   : > { %587 = vst.msk [vmem:[#allocation2 + $0x4] sm:$0xf] %vm585_vm3, %v5147_v0  ;;  %vm5411_vm7 = vmand %vm569_vm0, %vm575_vm2  ;;  %vm583_vm9 = vcmask 24576   ;;  %v4387_v7 = vpack.c.bf16 %v651_v4, %v651_v4  ;;  %v4096_v8 = vcombine.high %v946_v5, %v946_v5  ;;  %v4095_v9 = vcombine.low %v946_v5, %v946_v5  ;;  %v572_v10 = vld [vmem:[#allocation2] sm:$0x1]  ;;  %v719_v11 = vld [vmem:[#allocation9 + $0x88] sm:$0xff] }
  0x86   : > { %v573_v12 = vsel %vm5406_vm5, 0, %v572_v10  ;;  %v4071_v13 = vcombine.high %v719_v11, %v719_v11  ;;  %v4070_v14 = vcombine.low %v719_v11, %v719_v11  ;;  %v4663_v15 = vld [vmem:[#allocation9 + $0xc4] ss:$8 sps:$4 sm:$0xff]   ;;  %vm588_vm10 = vcmask 582176   ;;  %v577_v20 = vld [vmem:[#allocation2 + $0x8] sm:$0x1]  ;;  %vm5427_vm11 = vmor %vm6373_vm4, %vm658_vm8 }
  0x87   : > { %v661_v16 = vshrl.u32 %v4386_v6, 16  ;;  %v664_v17 = vshll.u32 %v4386_v6, 16  ;;  %v669_v18 = vshrl.u32 %v4387_v7, 16  ;;  %v672_v19 = vshll.u32 %v4387_v7, 16  ;;  %4097 = vmatprep.subr.msk.bf16.mxu0 %vm6370_vm6, %v4096_v8  ;;  %574 = vst [vmem:[#allocation2] sm:$0x1] %v573_v12 }
  0x88   : > { %v1003_v21 = vsel %vm6370_vm6, %v4095_v9, 0  ;;  %581 = vst.msk [vmem:[#allocation2] sm:$0xf] %vm580_vm1, %v5147_v0  ;;  %4072 = vmatprep.subr.msk.bf16.mxu1 %vm6370_vm6, %v4071_v13  ;;  %v792_v22 = vsel %vm6370_vm6, %v4070_v14, 0  ;;  %v578_v23 = vsel %vm5411_vm7, 0, %v577_v20  ;;  %s5148_s1 = smov 4  }
  0x89   : > { %v663_v24 = vrot.slane %v661_v16, 7  ;;  %v671_v25 = vrot.slane %v669_v18, 7  ;;  %1015 = vmatpush1.bf16.msra.mxu0 %v1003_v21  ;;  %586 = vst.msk [vmem:[#allocation2] sm:$0xf] %vm585_vm3, %v5147_v0  ;;  %804 = vmatpush1.bf16.msra.mxu1 %v792_v22  ;;  %v4665_v27 = vld [vmem:[#allocation9 + $0xc0] ss:$8 sps:$4 sm:$0xff]  }
  0x8a   : > { %579 = vst [vmem:[#allocation2 + $0x8] sm:$0x1] %v578_v23  ;;  %v4666_v28 = vld [vmem:[#allocation9 + $0x7c] ss:$8 sps:$4 sm:$0xff]   ;;  %1016 = vmatprep.subr.bf16.mxu0 %v4663_v15  ;;  %v4668_v29 = vld [vmem:[#allocation9 + $0x78] ss:$8 sps:$4 sm:$0xff]  }
  0x8b   : > { %584 = vst.msk [vmem:[#allocation2 + $0x8] sm:$0x1] %vm583_vm9, %v5147_v0  ;;  %v4669_v30 = vld [vmem:[#allocation9 + $0xb4] ss:$8 sps:$4 sm:$0xff]   ;;  %v666_v31 = vor.u32 %v664_v17, %v663_v24  ;;  %v667_v32 = vrot.slane %v663_v24, 4  ;;  %v676_v33 = vrot.slane %v671_v25, 4  ;;  %v674_v34 = vor.u32 %v672_v19, %v671_v25  ;;  %805 = vmatprep.subr.bf16.mxu1 %v4666_v28 }
  0x8c   : > { %589 = vst.msk [vmem:[#allocation2 + $0x8] sm:$0x1] %vm588_vm10, %v5147_v0  ;;  %v4672_v35 = vld [vmem:[#allocation9 + $0x6c] ss:$8 sps:$4 sm:$0xff]   ;;  %v4671_v36 = vld [vmem:[#allocation9 + $0xb0] ss:$8 sps:$4 sm:$0xff]   ;;  %v1058_v19 = vlaneseq }
  0x8d   : > { %677 = vrot.lane.b32.xlu0 %v666_v31, %s5148_s1  ;;  %681 = vrot.lane.b32.xlu1 %v676_v33, %s5148_s1  ;;  %v675_v37 = vsel %vm5427_vm11, %v667_v32, %v674_v34  ;;  %v4674_v38 = vld [vmem:[#allocation9 + $0x68] ss:$8 sps:$4 sm:$0xff]   ;;  %v4675_v39 = vld [vmem:[#allocation9 + $0xa4] ss:$8 sps:$4 sm:$0xff]   ;;  %v4680_v42 = vld [vmem:[#allocation9 + $0x58] ss:$8 sps:$4 sm:$0xff]  }
  0x8e   : > { %1017 = vmatpush1.bf16.msra.mxu0 %v4665_v27  ;;  %806 = vmatpush1.bf16.msra.mxu1 %v4668_v29  ;;  %v4678_v40 = vld [vmem:[#allocation9 + $0x5c] ss:$8 sps:$4 sm:$0xff]   ;;  %v4677_v41 = vld [vmem:[#allocation9 + $0xa0] ss:$8 sps:$4 sm:$0xff]   ;;  %v4684_v44 = vld [vmem:[#allocation9 + $0x4c] ss:$8 sps:$4 sm:$0xff]  }
  0x8f   : > { %1018 = vmatprep.subr.bf16.mxu0 %v4669_v30  ;;  %807 = vmatprep.subr.bf16.mxu1 %v4672_v35  ;;  %v4681_v43 = vld [vmem:[#allocation9 + $0x94] ss:$8 sps:$4 sm:$0xff]   ;;  %v708_v45 = vld [vmem:[#allocation9 + $0x40] sm:$0xff]  ;;  %v4683_v46 = vld [vmem:[#allocation9 + $0x90] ss:$8 sps:$4 sm:$0xff]   ;;  %vm686_vm12 = vcmask 551968  }
  0x90   : > { %v4686_v47 = vld [vmem:[#allocation9 + $0x48] ss:$8 sps:$4 sm:$0xff]   ;;  %v4083_v48 = vcombine.high %v708_v45, %v708_v45  ;;  %vm693_vm13 = vcmask 548896   ;;  %vm687_vm14 = vmand %vm686_vm12, %vm575_vm2  ;;  %vm6372_vm0 = vcmask 1046528   ;;  %vm786_vm1 = vcmask 588800   ;;  %s4054_s22 = sshll.u32 %s5383_s8, 5 }
  0x91   : > { %679 = vrot.lane.b32.xlu0 %v675_v37, %s5148_s1  ;;  %v688_v49 = vld [vmem:[#allocation2] sm:$0xf]  ;;  %vm694_vm15 = vmand %vm693_vm13, %vm6373_vm4  ;;  %v4082_v3 = vcombine.low %v708_v45, %v708_v45  ;;  %vm6371_vm3 = vsmask.f32 7424  ;;  %v4694_v10 = vld [vmem:[#allocation9 + $0x34] ss:$8 sps:$4 sm:$0xff]  }
  0x92   : > { %1019 = vmatpush1.bf16.msra.mxu0 %v4671_v36  ;;  %808 = vmatpush1.bf16.msra.mxu1 %v4674_v38  ;;  %v4692_v12 = vld [vmem:[#allocation9 + $0x30] ss:$8 sps:$4 sm:$0xff]   ;;  %v4697_v13 = vld [vmem:[#allocation9 + $0x24] ss:$8 sps:$4 sm:$0xff]   ;;  %v4695_v14 = vld [vmem:[#allocation9 + $0x20] ss:$8 sps:$4 sm:$0xff]  }
  0x93   : > { %1020 = vmatprep.subr.bf16.mxu0 %v4675_v39  ;;  %809 = vmatprep.subr.bf16.mxu1 %v4678_v40  ;;  %v695_v50 = vld [vmem:[#allocation2 + $0x8] sm:$0x1]  ;;  %v888_v9 = vsel %vm6370_vm6, %v4082_v3, 0  ;;  %v4700_v15 = vld [vmem:[#allocation9 + $0x14] ss:$8 sps:$4 sm:$0xff]   ;;  %v5450_v21 = vshrl.u32 %v1058_v19, 7 }
  0x94   : > { %v4698_v16 = vld [vmem:[#allocation9 + $0x10] ss:$8 sps:$4 sm:$0xff]   ;;  %v4703_v17 = vld [vmem:[#allocation9 + $0x4] ss:$8 sps:$4 sm:$0xff]   ;;  %v4701_v18 = vld [vmem:[#allocation9] ss:$8 sps:$4 sm:$0xff]  }
  0x95   : > { %v5452_v23 = vld [vmem:[#allocation12] sm:$0xff]  ;;  %v5455_v24 = vsub.s32 0, %v5450_v21  ;;  %v1064_v27 = vsub.s32 4, %v5450_v21  ;;  %v5459_v29 = vsub.s32 3, %v5450_v21  ;;  %v5465_v31 = vsub.s32 7, %v5450_v21  ;;  %s5626_s24 = scalar_lea.vmem [#allocation15], %s4054_s22 }
  0x96   : > { %1021 = vmatpush1.bf16.msra.mxu0 %v4677_v41  ;;  %810 = vmatpush1.bf16.msra.mxu1 %v4680_v42  ;;  %v5462_v30 = vsub.f32 1.0, %v5452_v23  ;;  %vm599_vm5 = vcmask 253952   ;;  %vm590_vm7 = vcmask 1040384   ;;  %vm592_vm8 = vcmask 1044484   ;;  %s6376_s23 = smov 16   ;;  %s6432_s2 = sld [smem:[#allocation32_spill]] }
  0x97   : > { %1022 = vmatprep.subr.bf16.mxu0 %v4681_v43  ;;  %811 = vmatprep.subr.bf16.mxu1 %v4684_v44  ;;  %v1061_v32 = vrot.slane %v5452_v23, %v5455_v24  ;;  %v1065_v34 = vrot.slane %v5452_v23, %v1064_v27  ;;  %v1087_v41 = vrot.slane %v5452_v23, %v5465_v31  ;;  %vm6375_vm9 = vsmask.f32 4352  ;;  %vm600_vm10 = vmand %vm599_vm5, %vm6373_vm4  ;;  %s3771_s22 = sand.u32 1, %s5253_s17   ;;  %p6446_p9 = scmp.ne.s32.totalorder %s6395_s25, 0 }
  0x98   : > { %v1120_v37 = vrot.slane %v5462_v30, %v5459_v29  ;;  %v1124_v38 = vrot.slane %v5462_v30, %v5465_v31  ;;  %v1083_v43 = vrot.slane %v5452_v23, %v5459_v29  ;;  %vm5540_vm13 = vmand %vm592_vm8, %vm6375_vm9 }
  0x99   : > { %v1071_v40 = vrot.slane %v1061_v32, %v5455_v24 }
  0x9a   : > { %1023 = vmatpush1.bf16.msra.mxu0 %v4683_v46  ;;  %812 = vmatpush1.bf16.msra.mxu1 %v4686_v47  ;;  %v1075_v46 = vrot.slane %v1065_v34, %v5455_v24 }
  0x9b   : > { %4084 = vmatprep.subr.msk.bf16.mxu1 %vm6370_vm6, %v4083_v48 }
  0xff   : > { %v678_v51 = vpop.permute.xlu0 %677  ;;  %v682_v52 = vpop.permute.xlu1 %681 }
 0x100   : > { %v689_v53 = vsel %vm687_vm14, %v678_v51, %v688_v49  ;;  %v696_v54 = vsel %vm694_vm15, %v682_v52, %v695_v50  ;;  %v5481_v49 = vrot.slane %v1120_v37, %v5459_v29  ;;  %v5484_v50 = vrot.slane %v1124_v38, %v5459_v29 }
 0x101   : > { %690 = vst [vmem:[#allocation2] sm:$0xf] %v689_v53  ;;  %697 = vst [vmem:[#allocation2 + $0x8] sm:$0x1] %v696_v54  ;;  %v5487_v54 = vrot.slane %v1087_v41, %v5459_v29  ;;  %vm6374_vm14 = vsmask.f32 7954 }
 0x102   : > { %vm615_vm15 = vcmask 125952  }
 0x103   : > { %v680_v55 = vpop.permute.xlu0 %679  ;;  %617 = vst.msk [vmem:[#allocation3 + $0xc] sm:$0xf] %vm615_vm15, %v5147_v0 }
 0x104   : > { %692 = vst.msk [vmem:[#allocation2 + $0x4] sm:$0xf] %vm686_vm12, %v680_v55  ;;  %vm5534_vm12 = vmand %vm590_vm7, %vm6373_vm4 }
 0x105   : > { %vm595_vm6 = vmor %vm5540_vm13, %vm5534_vm12 }
 0x108   : > { %v4688_v56 = vld [vmem:[#allocation2 + $0x8] ss:$0 sps:$4 sm:$0x11]   ;;  %v698_v57 = vld [vmem:[#allocation2] sm:$0xf] }
 0x109   : > { %v936_v59 = vld [vmem:[#allocation2] sm:$0xe]  ;;  %v952_v62 = vrot.slane %v4688_v56, 1  ;;  %v737_v63 = vshll.u32 %v4688_v56, 16  ;;  %v5490_v56 = vrot.slane %v1083_v43, %v5459_v29 }
 0x10b   : > { %v699_v58 = vld [vmem:[#allocation2 + $0x4] sm:$0xf]  ;;  %v739_v7 = vrot.slane %v737_v63, 1 }
 0x10c   : > { %v4060_v60 = vcombine.low %v698_v57, %v699_v58  ;;  %v4086_v61 = vcombine.low %v936_v59, %v699_v58 }
 0x10e   : > { %v951_v1 = vrot.slane %v4086_v61, 1  ;;  %v732_v2 = vshll.u32 %v4060_v60, 16  ;;  %v730_v5 = vshrl.u32 %v4060_v60, 16 }
 0x110   : > { %v953_v4 = vsel %vm6372_vm0, %v951_v1, %v952_v62  ;;  %v734_v6 = vrot.slane %v732_v2, 1  ;;  %vm606_vm0 = vmand %vm592_vm8, %vm6374_vm14 }
 0x111   : > { %4098 = vmatmul.mubr.msk.bf16.vlgmr.msra.gmra.mxu0 %vm786_vm1, %v953_v4 }
 0x112   : > { %v735_v8 = vor.u32 %v734_v6, %v730_v5 }
 0x114   : > { %v740_v11 = vsel %vm6371_vm3, %v735_v8, %v739_v7  ;;  %vm5554_vm3 = vmand %vm590_vm7, %vm575_vm2 }
 0x115   : > { %4073 = vmatmul.mubr.msk.bf16.vlgmr.msra.gmra.mxu1 %vm786_vm1, %v740_v11  ;;  %vm607_vm4 = vmor %vm606_vm0, %vm5554_vm3 }
 0x116   : > { %900 = vmatpush1.bf16.msra.mxu1 %v888_v9  ;;  %925 = vmatprep.mubr.bf16.mxu1 %v5147_v0 }
 0x117   : > { %901 = vmatprep.subr.bf16.mxu1 %v4694_v10 }
 0x11a   : > { %902 = vmatpush1.bf16.msra.mxu1 %v4692_v12 }
 0x11b   : > { %903 = vmatprep.subr.bf16.mxu1 %v4697_v13 }
 0x11e   : > { %904 = vmatpush1.bf16.msra.mxu1 %v4695_v14 }
 0x11f   : > { %905 = vmatprep.subr.bf16.mxu1 %v4700_v15 }
 0x122   : > { %906 = vmatpush1.bf16.msra.mxu1 %v4698_v16 }
 0x123   : > { %907 = vmatprep.subr.bf16.mxu1 %v4703_v17 }
 0x126   : > { %908 = vmatpush1.bf16.msra.mxu1 %v4701_v18 }
 0x129   : > { %4085 = vmatmul.mubr.msk.bf16.vlgmr.msra.gmra.mxu1 %vm786_vm1, %v4060_v60  ;;  %vm620_vm1 = vcmask 257152  }
 0x12a   : > { %1441 = vmatprep.mubr.bf16.mxu1 %v5147_v0  ;;  %622 = vst.msk [vmem:[#allocation3 + $0x14] sm:$0xf] %vm620_vm1, %v5147_v0 }
 0x1d1   : > { %v1042_v28 = vpop.f32.mrf.mxu0 }
 0x1d3   : > { %v1044_v35 = vpop.f32.mrf.mxu0 }
 0x1d5   : > { %v831_v20 = vpop.f32.mrf.mxu1  ;;  %v1046_v47 = vpop.f32.mrf.mxu0 }
 0x1d7   : > { %v833_v22 = vpop.f32.mrf.mxu1  ;;  %v1048_v60 = vpop.f32.mrf.mxu0 }
 0x1d9   : > { %v835_v25 = vpop.f32.mrf.mxu1 }
 0x1db   : > { %v837_v33 = vpop.f32.mrf.mxu1 }
 0x1e9   : > { %v927_v36 = vpop.f32.mrf.mxu1 }
 0x1ea   : > { %v928_v39 = vadd.f32 %v927_v36, %v831_v20 }
 0x1eb   : > { %v929_v42 = vpop.f32.mrf.mxu1 }
 0x1ec   : > { %v1051_v44 = vadd.f32 %v1042_v28, %v928_v39  ;;  %v930_v45 = vadd.f32 %v929_v42, %v833_v22 }
 0x1ed   : > { %v931_v48 = vpop.f32.mrf.mxu1 }
 0x1ee   : > { %v1076_v51 = vadd.f32 %v1071_v40, %v1051_v44  ;;  %v1052_v52 = vadd.f32 %v1044_v35, %v930_v45  ;;  %v932_v53 = vadd.f32 %v931_v48, %v835_v25 }
 0x1ef   : > { %v933_v55 = vpop.f32.mrf.mxu1 }
 0x1f0   : > { %v1077_v57 = vadd.f32 %v1075_v46, %v1052_v52  ;;  %v1053_v58 = vadd.f32 %v1046_v47, %v932_v53  ;;  %v934_v59 = vadd.f32 %v933_v55, %v837_v33  ;;  %v1135_v61 = vmul.f32 %v5481_v49, %v1076_v51 }
 0x1f1   : > { %v1098_v3 = vmul.f32 %v5490_v56, %v1076_v51 }
 0x1f2   : > { %v1078_v62 = vadd.f32 %v1071_v40, %v1053_v58  ;;  %v1054_v63 = vadd.f32 %v1048_v60, %v934_v59  ;;  %v1136_v1 = vmul.f32 %v5484_v50, %v1077_v57  ;;  %v1099_v2 = vmul.f32 %v5487_v54, %v1077_v57 }
 0x1f4   : > { %v1079_v4 = vadd.f32 %v1075_v46, %v1054_v63  ;;  %v1137_v5 = vmul.f32 %v5481_v49, %v1078_v62  ;;  %v1139_v6 = vadd.f32 %v1136_v1, %v1135_v61  ;;  %v1100_v7 = vmul.f32 %v5490_v56, %v1078_v62 }
 0x1f5   : > { %v1102_v8 = vadd.f32 %v1099_v2, %v1098_v3 }
 0x1f6   : > { %v1138_v9 = vmul.f32 %v5484_v50, %v1079_v4  ;;  %v1140_v10 = vadd.f32 %v1139_v6, %v1137_v5  ;;  %v1101_v11 = vmul.f32 %v5487_v54, %v1079_v4 }
 0x1f7   : > { %v1103_v12 = vadd.f32 %v1102_v8, %v1100_v7 }
 0x1f8   : > { %v1141_v13 = vadd.f32 %v1140_v10, %v1138_v9 }
 0x1f9   : > { %v1104_v14 = vadd.f32 %v1103_v12, %v1101_v11 }
 0x1fa   : > { %1142 = vadd.xlane.f32.xlu0 %v1141_v13  ;;  %v608_v13 = vld [vmem:[#allocation3 + $0x18] sm:$0x11] }
 0x1fb   : > { %1105 = vadd.xlane.f32.xlu1 %v1104_v14  ;;  %v628_v14 = vld [vmem:[#allocation4] sm:$0x11] }
 0x283   : > { %v1143_v15 = vpop.xlane.xlu0 %1142 }
 0x284   : > { %v1144_v16 = vrot.slane %v1143_v15, 4  ;;  %v1106_v17 = vpop.xlane.xlu1 %1105 }
 0x285   : > { %v1107_v18 = vrot.slane %v1106_v17, 4 }
 0x286   : > { %v1145_v19 = vadd.f32 %v1144_v16, %v1143_v15  ;;  %v640_v15 = vld [vmem:[#allocation5] sm:$0x11]  ;;  %v609_v16 = vsel %vm607_vm4, 0, %v608_v13  ;;  %vm5606_vm4 = vmand %vm599_vm5, %vm575_vm2  ;;  %vm618_vm5 = vcmask 122880  }
 0x287   : > { %v1108_v20 = vadd.f32 %v1107_v18, %v1106_v17  ;;  %610 = vst [vmem:[#allocation3 + $0x18] sm:$0x11] %v609_v16  ;;  %v633_v17 = vld [vmem:[#allocation4 + $0x8] sm:$0x11]  ;;  %v643_v18 = vld [vmem:[#allocation5 + $0x8] sm:$0x11] }
 0x288   : > { %v1146_v22 = vrot.slane %v1145_v19, 2  ;;  %619 = vst.msk [vmem:[#allocation3 + $0x18] sm:$0x1] %vm618_vm5, %v5147_v0 }
 0x289   : > { %v1109_v25 = vrot.slane %v1108_v20, 2 }
 0x28a   : > { %v1147_v27 = vadd.f32 %v1146_v22, %v1145_v19 }
 0x28b   : > { %v1110_v28 = vadd.f32 %v1109_v25, %v1108_v20 }
 0x28c   : > { %v1148_v32 = vrot.slane %v1147_v27, 1 }
 0x28d   : > { %v1111_v33 = vrot.slane %v1110_v28, 1 }
 0x28e   : > { %v1149_v34 = vadd.f32 %v1148_v32, %v1147_v27 }
 0x28f   : > { %v1112_v35 = vadd.f32 %v1111_v33, %v1110_v28 }
 0x291   : > { %4516 = vpush %v1112_v35 }
 0x292   : > { %4518 = vpush %v1149_v34 }
 0x2c2   : > { %s4517_s3 = spop %4516 }
 0x2c3   : > { %v1114_v36 = vstv %s4517_s3  ;;  %s4519_s19 = spop %4518 }
 0x2c4   : > { %v1115_v37 = vmul.f32 0.00048828125, %v1114_v36  ;;  %v1151_v38 = vstv %s4519_s19  ;;  %s4055_s19 = sshll.u32 %s5383_s8, 3 }
 0x2c5   : > { %v1152_v39 = vmul.f32 0.00048828125, %v1151_v38 }
 0x2c6   : > { %v1153_v40 = vmul.f32 %v1115_v37, %v5452_v23 }
 0x2c7   : > { %v1154_v41 = vmul.f32 %v1152_v39, %v5462_v30 }
 0x2c9   : > { %v1155_v42 = vadd.f32 %v1154_v41, %v1153_v40 }
 0x2cb   : > { %v1160_v43 = vrot.slane %v1155_v42, %v5459_v29  ;;  %v1164_v44 = vrot.slane %v1155_v42, %v5465_v31 }
 0x2cd   : > { %v1170_v45 = vrot.slane %v1160_v43, %v5459_v29  ;;  %v1174_v46 = vrot.slane %v1164_v44, %v5459_v29 }
 0x2cf   : > { %v5506_v47 = vsub.f32 %v1076_v51, %v1170_v45  ;;  %v5508_v48 = vsub.f32 %v1077_v57, %v1174_v46  ;;  %v5510_v52 = vsub.f32 %v1078_v62, %v1170_v45  ;;  %v5512_v53 = vsub.f32 %v1079_v4, %v1174_v46 }
 0x2d1   : > { %v1179_v55 = vmul.f32 %v5506_v47, %v5506_v47  ;;  %v1180_v58 = vmul.f32 %v5508_v48, %v5508_v48  ;;  %v1181_v59 = vmul.f32 %v5510_v52, %v5510_v52  ;;  %v1182_v60 = vmul.f32 %v5512_v53, %v5512_v53 }
 0x2d3   : > { %v1201_v51 = vmul.f32 %v1179_v55, %v5481_v49  ;;  %v1202_v57 = vmul.f32 %v1180_v58, %v5484_v50  ;;  %v1183_v61 = vmul.f32 %v1179_v55, %v5490_v56  ;;  %v1184_v62 = vmul.f32 %v1180_v58, %v5487_v54 }
 0x2d4   : > { %v1203_v63 = vmul.f32 %v1181_v59, %v5481_v49  ;;  %v1185_v2 = vmul.f32 %v1181_v59, %v5490_v56  ;;  %v1204_v4 = vmul.f32 %v1182_v60, %v5484_v50  ;;  %v1186_v6 = vmul.f32 %v1182_v60, %v5487_v54  ;;  %v596_v50 = vld [vmem:[#allocation3] sm:$0x11]  ;;  %v601_v54 = vld [vmem:[#allocation3 + $0x8] sm:$0x1]  ;;  %v5668_v56 = vld [vmem:[%s6354_s9] sm:$0xf] }
 0x2d5   : > { %v1205_v1 = vadd.f32 %v1202_v57, %v1201_v51  ;;  %v1187_v3 = vadd.f32 %v1184_v62, %v1183_v61  ;;  %v602_v10 = vsel %vm600_vm10, 0, %v601_v54  ;;  %v597_v11 = vsel %vm595_vm6, 0, %v596_v50 }
 0x2d6   : > { %603 = vst [vmem:[#allocation3 + $0x8] sm:$0x1] %v602_v10  ;;  %vm625_vm10 = vcmask 258052   ;;  %598 = vst [vmem:[#allocation3] sm:$0x11] %v597_v11  ;;  %v5581_v51 = vsub.s32 1, %v5450_v21 }
 0x2d7   : > { %v1206_v5 = vadd.f32 %v1205_v1, %v1203_v63  ;;  %v1188_v7 = vadd.f32 %v1187_v3, %v1185_v2  ;;  %621 = vst.msk [vmem:[#allocation3 + $0x8] sm:$0xf] %vm620_vm1, %v5147_v0  ;;  %vm626_vm6 = vmand %vm625_vm10, %vm6375_vm9  ;;  %v1255_v57 = vsub.s32 5, %v5450_v21  ;;  %v5586_v63 = vsub.s32 2, %v5450_v21 }
 0x2d8   : > { %616 = vst.msk [vmem:[#allocation3] sm:$0xf] %vm615_vm15, %v5147_v0  ;;  %vm627_vm7 = vmor %vm626_vm6, %vm5534_vm12  ;;  %v1277_v1 = vsub.s32 6, %v5450_v21 }
 0x2d9   : > { %v1207_v8 = vadd.f32 %v1206_v5, %v1204_v4  ;;  %v1189_v9 = vadd.f32 %v1188_v7, %v1186_v6  ;;  %v629_v19 = vsel %vm627_vm7, 0, %v628_v14  ;;  %vm631_vm8 = vmand %vm625_vm10, %vm6374_vm14  ;;  %v641_v20 = vsel %vm627_vm7, 0, %v640_v15  ;;  %v612_v14 = vld [vmem:[#allocation3 + $0x20] sm:$0x1] }
 0x2da   : > { %630 = vst [vmem:[#allocation4] sm:$0x11] %v629_v19  ;;  %vm632_vm0 = vmor %vm631_vm8, %vm5554_vm3  ;;  %v1252_v4 = vrot.slane %v5452_v23, %v5581_v51  ;;  %v1256_v5 = vrot.slane %v5452_v23, %v1255_v57  ;;  %v1274_v6 = vrot.slane %v5452_v23, %v5586_v63  ;;  %v1278_v7 = vrot.slane %v5452_v23, %v1277_v1 }
 0x2db   : > { %1208 = vadd.xlane.f32.xlu1 %v1207_v8  ;;  %1190 = vadd.xlane.f32.xlu0 %v1189_v9  ;;  %642 = vst [vmem:[#allocation5] sm:$0x11] %v641_v20  ;;  %v634_v22 = vsel %vm632_vm0, 0, %v633_v17  ;;  %v644_v25 = vsel %vm632_vm0, 0, %v643_v18  ;;  %636 = vst.msk [vmem:[#allocation4] sm:$0xf] %vm615_vm15, %v5147_v0 }
 0x2dc   : > { %638 = vst.msk [vmem:[#allocation4 + $0x4] sm:$0xf] %vm620_vm1, %v5147_v0  ;;  %648 = vst.msk [vmem:[#allocation5 + $0x4] sm:$0xf] %vm620_vm1, %v5147_v0  ;;  %v1262_v49 = vrot.slane %v1252_v4, %v5581_v51  ;;  %v1266_v50 = vrot.slane %v1256_v5, %v5581_v51  ;;  %v1284_v54 = vrot.slane %v1274_v6, %v5586_v63  ;;  %v613_v19 = vsel %vm5606_vm4, 0, %v612_v14 }
 0x2dd   : > { %646 = vst.msk [vmem:[#allocation5] sm:$0xf] %vm615_vm15, %v5147_v0  ;;  %635 = vst [vmem:[#allocation4 + $0x8] sm:$0x11] %v634_v22  ;;  %v1288_v10 = vrot.slane %v1278_v7, %v5586_v63  ;;  %vm623_vm3 = vcmask 254080   ;;  %vm5151_vm7 = vmmov 0  }
 0x2de   : > { %645 = vst [vmem:[#allocation5 + $0x8] sm:$0x11] %v644_v25  ;;  %614 = vst [vmem:[#allocation3 + $0x20] sm:$0x1] %v613_v19  ;;  %vm1355_vm8 = vcmask 1043584   ;;  %vm1357_vm0 = vcmask 1047556  }
 0x2df   : > { %639 = vst.msk [vmem:[#allocation4 + $0xc] sm:$0x1] %vm623_vm3, %v5147_v0  ;;  %649 = vst.msk [vmem:[#allocation5 + $0xc] sm:$0x1] %vm623_vm3, %v5147_v0  ;;  %v1365_v26 = vld [vmem:[#allocation3 + $0x8] sm:$0xf] }
 0x2e0   : > { %624 = vst.msk [vmem:[#allocation3 + $0x20] sm:$0x1] %vm623_vm3, %v5147_v0  ;;  %vm5641_vm4 = vmand %vm1355_vm8, %vm575_vm2  ;;  %vm1345_vm3 = vcmask 130048   ;;  %v1360_v57 = vld [vmem:[#allocation3] sm:$0xff]  ;;  %v6072_v5 = vld [vmem:[%s6355_s10] sm:$0x3] }
 0x2e1   : > { %637 = vst.msk [vmem:[#allocation4 + $0x8] sm:$0x1] %vm618_vm5, %v5147_v0  ;;  %647 = vst.msk [vmem:[#allocation5 + $0x8] sm:$0x1] %vm618_vm5, %v5147_v0 }
 0x2e7   : > { %v1381_v7 = vld [vmem:[#allocation3 + $0x20] sm:$0x1] }
 0x364   : > { %v1209_v27 = vpop.xlane.xlu1 %1208  ;;  %v1191_v32 = vpop.xlane.xlu0 %1190 }
 0x365   : > { %v1210_v28 = vrot.slane %v1209_v27, 4  ;;  %v1192_v33 = vrot.slane %v1191_v32, 4 }
 0x367   : > { %v1211_v34 = vadd.f32 %v1210_v28, %v1209_v27  ;;  %v1193_v35 = vadd.f32 %v1192_v33, %v1191_v32 }
 0x369   : > { %v1212_v36 = vrot.slane %v1211_v34, 2  ;;  %v1194_v37 = vrot.slane %v1193_v35, 2 }
 0x36b   : > { %v1213_v38 = vadd.f32 %v1212_v36, %v1211_v34  ;;  %v1195_v39 = vadd.f32 %v1194_v37, %v1193_v35 }
 0x36d   : > { %v1214_v40 = vrot.slane %v1213_v38, 1  ;;  %v1196_v41 = vrot.slane %v1195_v39, 1 }
 0x36f   : > { %v1215_v42 = vadd.f32 %v1214_v40, %v1213_v38  ;;  %v1197_v43 = vadd.f32 %v1196_v41, %v1195_v39 }
 0x371   : > { %4520 = vpush %v1197_v43 }
 0x372   : > { %4522 = vpush %v1215_v42 }
 0x3a2   : > { %s4521_s21 = spop %4520 }
 0x3a3   : > { %v1199_v44 = vstv %s4521_s21  ;;  %s4523_s20 = spop %4522  ;;  %s5935_s21 = scalar_lea.vmem [#allocation16], %s4055_s19 }
 0x3a4   : > { %v1200_v45 = vmul.f32 0.00048828125, %v1199_v44  ;;  %v1217_v46 = vstv %s4523_s20 }
 0x3a5   : > { %v1218_v55 = vmul.f32 0.00048828125, %v1217_v46 }
 0x3a6   : > { %v1219_v58 = vadd.f32 1e-05, %v1200_v45 }
 0x3a7   : > { %v1222_v59 = vadd.f32 1e-05, %v1218_v55 }
 0x3a8   : > { %4830 = vrsqrt.f32 %v1219_v58  ;;  %v5150_v58 = vmov 0.0  }
 0x3a9   : > { %4832 = vrsqrt.f32 %v1222_v59  ;;  %4480 = vmatprep.subr.bf16.mxu0 %v5150_v58  ;;  %4482 = vmatprep.mubr.msk.bf16.mxu0 %vm5151_vm7, %v5150_v58 }
 0x3b5   : > { %v4831_v60 = vpop.eup %4830 }
 0x3b6   : > { %v4833_v61 = vpop.eup %4832  ;;  %v1221_v62 = vmul.f32 %v4831_v60, %v5452_v23 }
 0x3b7   : > { %v1224_v2 = vmul.f32 %v4833_v61, %v5462_v30 }
 0x3b9   : > { %v1225_v3 = vadd.f32 %v1224_v2, %v1221_v62 }
 0x3bb   : > { %v1230_v8 = vrot.slane %v1225_v3, %v5459_v29  ;;  %v1234_v9 = vrot.slane %v1225_v3, %v5465_v31 }
 0x3bd   : > { %v1240_v21 = vrot.slane %v1230_v8, %v5459_v29  ;;  %v1244_v30 = vrot.slane %v1234_v9, %v5459_v29  ;;  %v1376_v9 = vld [vmem:[#allocation3 + $0x18] sm:$0x11] }
 0x3bf   : > { %v1245_v31 = vmul.f32 %v1240_v21, %v5506_v47  ;;  %v1246_v11 = vmul.f32 %v1244_v30, %v5508_v48  ;;  %v1247_v12 = vmul.f32 %v1240_v21, %v5510_v52  ;;  %v1248_v13 = vmul.f32 %v1244_v30, %v5512_v53 }
 0x3c1   : > { %v1267_v15 = vmul.f32 %v1262_v49, %v1245_v31  ;;  %v1268_v16 = vmul.f32 %v1266_v50, %v1246_v11  ;;  %v1269_v17 = vmul.f32 %v1262_v49, %v1247_v12  ;;  %v1270_v18 = vmul.f32 %v1266_v50, %v1248_v13 }
 0x3c3   : > { %v1289_v20 = vadd.f32 %v1284_v54, %v1267_v15  ;;  %v1290_v22 = vadd.f32 %v1288_v10, %v1268_v16  ;;  %v1291_v25 = vadd.f32 %v1284_v54, %v1269_v17  ;;  %v1292_v47 = vadd.f32 %v1288_v10, %v1270_v18 }
 0x3c5   : > { %vm1293_vm12 = vcmp.gt.f32.partialorder %v1289_v20, 0.0  ;;  %vm1294_vm1 = vcmp.gt.f32.partialorder %v1290_v22, 0.0  ;;  %v1297_v48 = vmul.f32 0.2, %v1289_v20  ;;  %v1298_v52 = vmul.f32 0.2, %v1290_v22 }
 0x3c6   : > { %vm1295_vm10 = vcmp.gt.f32.partialorder %v1291_v25, 0.0  ;;  %vm1296_vm6 = vcmp.gt.f32.partialorder %v1292_v47, 0.0  ;;  %v1299_v53 = vmul.f32 0.2, %v1291_v25  ;;  %v1300_v27 = vmul.f32 0.2, %v1292_v47 }
 0x3c7   : > { %v1301_v28 = vsel %vm1293_vm12, %v1289_v20, %v1297_v48  ;;  %v1302_v32 = vsel %vm1294_vm1, %v1290_v22, %v1298_v52  ;;  %vm1364_vm12 = vmand %vm615_vm15, %vm575_vm2 }
 0x3c8   : > { %1306 = vst [vmem:[%s5626_s24 + $0x8] sm:$0xff] %v1302_v32  ;;  %v4388_v33 = vpack.c.bf16 %v1302_v32, %v1301_v28  ;;  %1305 = vst [vmem:[%s5626_s24] sm:$0xff] %v1301_v28  ;;  %v1303_v34 = vsel %vm1295_vm10, %v1291_v25, %v1299_v53  ;;  %v1304_v35 = vsel %vm1296_vm6, %v1292_v47, %v1300_v27  ;;  %vm1373_vm10 = vcmask 1040512  }
 0x3c9   : > { %1307 = vst [vmem:[%s5626_s24 + $0x10] sm:$0xff] %v1303_v34  ;;  %1308 = vst [vmem:[%s5626_s24 + $0x18] sm:$0xff] %v1304_v35  ;;  %v4389_v36 = vpack.c.bf16 %v1304_v35, %v1303_v34 }
 0x3ca   : > { %v1320_v37 = vshrl.u32 %v4388_v33, 16  ;;  %v1323_v40 = vshll.u32 %v4388_v33, 16  ;;  %vm1370_vm6 = vmor %vm1357_vm0, %vm1355_vm8 }
 0x3cb   : > { %v1328_v38 = vshrl.u32 %v4389_v36, 16  ;;  %v1331_v42 = vshll.u32 %v4389_v36, 16 }
 0x3cc   : > { %v1322_v39 = vrot.slane %v1320_v37, 7 }
 0x3cd   : > { %v1330_v41 = vrot.slane %v1328_v38, 7 }
 0x3ce   : > { %v1325_v43 = vor.u32 %v1323_v40, %v1322_v39  ;;  %v1326_v44 = vrot.slane %v1322_v39, 4 }
 0x3cf   : > { %v1333_v45 = vor.u32 %v1331_v42, %v1330_v41  ;;  %v1335_v55 = vrot.slane %v1330_v41, 4 }
 0x3d0   : > { %1336 = vrot.lane.b32.xlu0 %v1325_v43, %s6376_s23 }
 0x3d1   : > { %v1334_v46 = vsel %vm5427_vm11, %v1326_v44, %v1333_v45  ;;  %vm1358_vm11 = vmand %vm1357_vm0, %vm6374_vm14  ;;  %vm6423_vm14 = vsmask.f32 256 }
 0x3d2   : > { %1338 = vrot.lane.b32.xlu1 %v1334_v46, %s6376_s23  ;;  %vm1359_vm1 = vmor %vm1358_vm11, %vm5641_vm4 }
 0x3d3   : > { %vm5652_vm9 = vmand %vm1373_vm10, %vm6423_vm14  ;;  %vm2560_vm10 = vcmask 126980  }
 0x3d4   : > { %vm6426_vm2 = vmmov %vm6423_vm14  ;;  %vm6428_vm14 = vsmask.f32 7424 }
 0x3d5   : > { %vm1380_vm8 = vmand %vm618_vm5, %vm6426_vm2  ;;  %vm6434_vm2 = vsmask.f32 4352 }
 0x3d6   : > { %1340 = vrot.lane.b32.xlu1 %v1335_v55, %s6376_s23  ;;  %vm1375_vm0 = vmor %vm5540_vm13, %vm5652_vm9  ;;  %vm6427_vm13 = vcmask 1046528  }
 0x3d7   : > { %vm6430_vm5 = vmmov %vm6427_vm13 }
 0x3d8   : > { %vm6431_vm11 = vmmov %vm6428_vm14 }
 0x442   : > { %v1337_v60 = vpop.permute.xlu0 %1336 }
 0x443   : > { %v1342_v61 = vrot.slane %v1337_v60, 4 }
 0x444   : > { %v1339_v62 = vpop.permute.xlu1 %1338 }
 0x445   : > { %v1346_v1 = vsel %vm1345_vm3, %v1342_v61, %v1337_v60  ;;  %v1366_v2 = vsel %vm1364_vm12, %v1342_v61, %v1365_v26  ;;  %v1343_v3 = vrot.slane %v1339_v62, 4  ;;  %vm6433_vm12 = vmmov %vm6431_vm11 }
 0x446   : > { %v1361_v4 = vsel %vm1359_vm1, %v1346_v1, %v1360_v57  ;;  %1367 = vst [vmem:[#allocation3 + $0x8] sm:$0xf] %v1366_v2  ;;  %vm1824_vm1 = vcmask 261120  }
 0x447   : > { %1362 = vst [vmem:[#allocation3] sm:$0xff] %v1361_v4  ;;  %v1347_v6 = vsel %vm1345_vm3, %v1343_v3, %v1339_v62  ;;  %1372 = vst.msk [vmem:[#allocation3 + $0x14] sm:$0xf] %vm615_vm15, %v1343_v3  ;;  %v4709_v3 = vld [vmem:[%s6432_s2 + $0x108] sm:$0xff]  }
 0x448   : > { %1371 = vst.msk [vmem:[#allocation3 + $0xc] sm:$0xff] %vm1370_vm6, %v1347_v6  ;;  %v1341_v8 = vpop.permute.xlu1 %1340  ;;  %vm6429_vm15 = vmmov %vm6427_vm13  ;;  %v4710_v6 = vld [vmem:[%s6432_s2 + $0xc8] sm:$0xff]   ;;  %vm2554_vm6 = vcmask 130052  }
 0x449   : > { %v1344_v21 = vrot.slane %v1341_v8, 4 }
 0x44b   : > { %v1348_v30 = vsel %vm1345_vm3, %v1344_v21, %v1341_v8  ;;  %v1382_v49 = vsel %vm1380_vm8, %v1344_v21, %v1381_v7  ;;  %v4711_v7 = vld [vmem:[%s6432_s2 + $0x100] sm:$0xff]   ;;  %v4714_v21 = vld [vmem:[%s6432_s2 + $0xb8] sm:$0xff]   ;;  %vm5945_vm8 = vmand %vm2560_vm10, %vm6434_vm2 }
 0x44c   : > { %v1377_v50 = vsel %vm1375_vm0, %v1348_v30, %v1376_v9  ;;  %1383 = vst [vmem:[#allocation3 + $0x20] sm:$0x1] %v1382_v49  ;;  %v4712_v8 = vld [vmem:[%s6432_s2 + $0xc0] sm:$0xff]   ;;  %v4713_v9 = vld [vmem:[%s6432_s2 + $0xf8] sm:$0xff]   ;;  %v4715_v30 = vld [vmem:[%s6432_s2 + $0xf0] sm:$0xff]  }
 0x44d   : > { %1378 = vst [vmem:[#allocation3 + $0x18] sm:$0x11] %v1377_v50  ;;  %v1530_v54 = vld [vmem:[#allocation3 + $0x8] sm:$0xf]  ;;  %v4717_v50 = vld [vmem:[%s6432_s2 + $0x118] sm:$0xff]  }
 0x44e   : > { %v2100_v10 = vld [vmem:[#allocation3 + $0x8] sm:$0xe]  ;;  %v1532_v23 = vld [vmem:[#allocation3 + $0x14] sm:$0xf]  ;;  %v2099_v12 = vld [vmem:[#allocation3] sm:$0xee] }
 0x44f   : > { %v1387_v31 = vld [vmem:[#allocation3 + $0xc] sm:$0xff]  ;;  %v4108_v11 = vcombine.low %v1530_v54, %v1532_v23  ;;  %v4190_v15 = vcombine.low %v2100_v10, %v1532_v23  ;;  %v4704_v53 = vld [vmem:[#allocation3 + $0x8] ss:$12 sps:$4 sm:$0xff]   ;;  %v4718_v54 = vld [vmem:[%s6432_s2 + $0xe8] sm:$0xff]   ;;  %vm6437_vm0 = vsmask.f32 7954 }
 0x450   : > { %v4101_v13 = vcombine.low %v1361_v4, %v1387_v31  ;;  %v4102_v14 = vcombine.high %v1361_v4, %v1387_v31  ;;  %v4189_v18 = vcombine.high %v2099_v12, %v1387_v31  ;;  %v4188_v48 = vcombine.low %v2099_v12, %v1387_v31  ;;  %v4716_v49 = vld [vmem:[%s6432_s2 + $0xb0] sm:$0xff]   ;;  %v4719_v10 = vld [vmem:[%s6432_s2 + $0xa8] sm:$0xff]   ;;  %v4721_v31 = vld [vmem:[%s6432_s2 + $0xe0] sm:$0xff]  }
 0x451   : > { %v1583_v16 = vshll.u32 %v4108_v11, 16  ;;  %v1581_v22 = vshrl.u32 %v4108_v11, 16  ;;  %v2115_v52 = vrot.slane %v4190_v15, 1  ;;  %v4720_v23 = vld [vmem:[%s6432_s2 + $0x110] sm:$0xff]   ;;  %v4723_v11 = vld [vmem:[%s6432_s2 + $0x78] sm:$0xff]   ;;  %v4722_v12 = vld [vmem:[%s6432_s2 + $0xa0] sm:$0xff]  }
 0x452   : > { %1423 = vmatprep.subr.bf16.mxu1 %v4102_v14  ;;  %v1571_v17 = vshll.u32 %v4102_v14, 16  ;;  %v1559_v47 = vshll.u32 %v4101_v13, 16  ;;  %v1569_v35 = vshrl.u32 %v4102_v14, 16  ;;  %v2112_v36 = vrot.slane %v4189_v18, 1  ;;  %v4726_v14 = vld [vmem:[%s6432_s2 + $0x98] sm:$0xff]   ;;  %v4729_v15 = vld [vmem:[%s6432_s2 + $0xd0] sm:$0xff]  }
 0x453   : > { %1424 = vmatpush1.bf16.msra.mxu1 %v4101_v13  ;;  %v4706_v19 = vld [vmem:[#allocation3 + $0x20] ss:$0 sps:$4 sm:$0x11]   ;;  %v1585_v20 = vrot.slane %v1583_v16, 1  ;;  %v2109_v43 = vrot.slane %v4188_v48, 1  ;;  %v1557_v57 = vshrl.u32 %v4101_v13, 16 }
 0x454   : > { %4474 = vmatprep.subr.bf16.mxu1 %v5150_v58  ;;  %v1533_v25 = vld [vmem:[#allocation3 + $0x18] sm:$0x11]  ;;  %v1588_v27 = vshll.u32 %v4706_v19, 16  ;;  %v1573_v32 = vrot.slane %v1571_v17, 1  ;;  %v2116_v37 = vrot.slane %v4706_v19, 1  ;;  %v1561_v42 = vrot.slane %v1559_v47, 1 }
 0x455   : > { %v4110_v28 = vcombine.high %v1533_v25, %v1533_v25  ;;  %v4109_v33 = vcombine.low %v1533_v25, %v1533_v25  ;;  %v1586_v34 = vor.u32 %v1585_v20, %v1581_v22  ;;  %v4725_v13 = vld [vmem:[%s6432_s2 + $0xd8] sm:$0xff]   ;;  %v4730_v16 = vld [vmem:[%s6432_s2 + $0x90] sm:$0xff]  }
 0x456   : > { %4104 = vmatmul.mubr.msk.bf16.vlgmr.msra.gmra.mxu1 %vm1345_vm3, %v5668_v56  ;;  %v1590_v38 = vrot.slane %v1588_v27, 1  ;;  %v5676_v45 = vsel %vm6427_vm13, %v2115_v52, %v2116_v37  ;;  %v1574_v55 = vor.u32 %v1573_v32, %v1569_v35  ;;  %v1562_v2 = vor.u32 %v1561_v42, %v1557_v57  ;;  %v4724_v25 = vld [vmem:[%s6432_s2 + $0x38] sm:$0xff]   ;;  %v4727_v52 = vld [vmem:[%s6432_s2 + $0x70] sm:$0xff]   ;;  %v4731_v35 = vld [vmem:[%s6432_s2 + $0x68] sm:$0xff]  }
 0x457   : > { %4475 = vmatpush3.bf16.msra.mxu1 %v4704_v53  ;;  %v1576_v39 = vshll.u32 %v4110_v28, 16  ;;  %4476 = vmatprep.mubr.msk.bf16.mxu1 %vm5151_vm7, %v5150_v58  ;;  %v1564_v40 = vshll.u32 %v4109_v33, 16  ;;  %v2113_v41 = vrot.slane %v4110_v28, 1  ;;  %v2110_v44 = vrot.slane %v4109_v33, 1  ;;  %v4728_v33 = vld [vmem:[%s6432_s2 + $0x30] sm:$0xff]   ;;  %vm5950_vm13 = vmand %vm2554_vm6, %vm6437_vm0 }
 0x458   : > { %v1591_v46 = vsel %vm6428_vm14, %v1586_v34, %v1590_v38  ;;  %v4732_v38 = vld [vmem:[%s6432_s2 + $0x28] sm:$0xff]   ;;  %vm2562_vm14 = vmor %vm5945_vm8, %vm5652_vm9  ;;  %vm3108_vm9 = vcmask 64512  }
 0x459   : > { %v1578_v26 = vrot.slane %v1576_v39, 1  ;;  %v5680_v60 = vsel %vm6429_vm15, %v2112_v36, %v2113_v41  ;;  %4481 = vmatpush3.bf16.msra.mxu0 %v1591_v46  ;;  %v1566_v61 = vrot.slane %v1564_v40, 1  ;;  %v5683_v62 = vsel %vm6430_vm5, %v2109_v43, %v2110_v44  ;;  %v4733_v40 = vld [vmem:[%s6432_s2 + $0x60] sm:$0xff]   ;;  %v4734_v44 = vld [vmem:[%s6432_s2 + $0x88] sm:$0xff]   ;;  %vm2556_vm15 = vmor %vm5950_vm13, %vm5641_vm4 }
 0x45a   : > { %4486 = vmatprep.subr.bf16.mxu0 %v5150_v58  ;;  %v4735_v46 = vld [vmem:[%s6432_s2 + $0x20] sm:$0xff]  }
 0x45b   : > { %v1579_v1 = vsel %vm6431_vm11, %v1574_v55, %v1578_v26  ;;  %v1567_v4 = vsel %vm6433_vm12, %v1562_v2, %v1566_v61  ;;  %v4736_v26 = vld [vmem:[%s6432_s2 + $0x58] sm:$0xff]   ;;  %v4737_v61 = vld [vmem:[%s6432_s2 + $0x80] sm:$0xff]   ;;  %v4740_v2 = vld [vmem:[%s6432_s2 + $0x50] sm:$0xff]   ;;  %vm6440_vm11 = vcmask 1043456  }
 0x45c   : > { %1609 = vmatprep.subr.bf16.mxu1 %v1579_v1  ;;  %4483 = vmatmul.mubr.msk.bf16.vlgmr.msra.gmra.mxu0 %vm1345_vm3, %v5668_v56  ;;  %v4738_v1 = vld [vmem:[%s6432_s2 + $0x18] sm:$0xff]   ;;  %vm6441_vm12 = vmmov %vm6440_vm11 }
 0x45d   : > { %4490 = vmatprep.mubr.msk.bf16.mxu0 %vm5151_vm7, %v5150_v58  ;;  %4487 = vmatpush3.bf16.msra.mxu0 %v4717_v50  ;;  %v4754_v50 = vld [vmem:[%s6432_s2 + $0x180] sm:$0xff]   ;;  %vm6442_vm4 = vmmov %vm6440_vm11 }
 0x45e   : > { %4477 = vmatmul.mubr.msk.bf16.vlgmr.msra.gmra.mxu1 %vm1345_vm3, %v5668_v56  ;;  %4488 = vmatprep.subr.bf16.mxu0 %v5150_v58 }
 0x45f   : > { %1610 = vmatpush1.bf16.msra.mxu1 %v1567_v4  ;;  %1627 = vmatprep.mubr.bf16.mxu1 %v5147_v0 }
 0x460   : > { %4397 = vmatprep.subr.bf16.mxu1 %v4709_v3  ;;  %v4742_v3 = vld [vmem:[%s6432_s2 + $0x10] sm:$0xff]  }
 0x461   : > { %4489 = vmatpush3.bf16.msra.mxu0 %v4720_v23  ;;  %v4757_v23 = vld [vmem:[%s6432_s2 + $0x138] sm:$0xff]  }
 0x462   : > { %4422 = vmatprep.subr.bf16.mxu0 %v4723_v11  ;;  %v4759_v11 = vld [vmem:[%s6432_s2 + $0x130] sm:$0xff]  }
 0x466   : > { %4112 = vmatmul.mubr.msk.bf16.vlgmr.msra.gmra.mxu1 %vm1345_vm3, %v5668_v56 }
 0x467   : > { %4398 = vmatpush3.bf16.msra.mxu1 %v4710_v6  ;;  %v4743_v6 = vld [vmem:[%s6432_s2 + $0x48] sm:$0xff]  }
 0x468   : > { %4399 = vmatprep.subr.bf16.mxu1 %v4711_v7  ;;  %v4744_v7 = vld [vmem:[%s6432_s2 + $0x8] sm:$0xff]  }
 0x46b   : > { %4400 = vmatpush3.bf16.msra.mxu1 %v4712_v8  ;;  %v4746_v8 = vld [vmem:[%s6432_s2] sm:$0xff]  }
 0x46c   : > { %4401 = vmatprep.subr.bf16.mxu1 %v4713_v9  ;;  %v4748_v9 = vld [vmem:[%s6432_s2 + $0x198] sm:$0xff]  }
 0x46f   : > { %4402 = vmatpush3.bf16.msra.mxu1 %v4714_v21  ;;  %v4750_v21 = vld [vmem:[%s6432_s2 + $0x190] sm:$0xff]  }
 0x470   : > { %4403 = vmatprep.subr.bf16.mxu1 %v4715_v30  ;;  %v4752_v30 = vld [vmem:[%s6432_s2 + $0x188] sm:$0xff]  }
 0x473   : > { %4404 = vmatpush3.bf16.msra.mxu1 %v4716_v49  ;;  %v4753_v49 = vld [vmem:[%s6432_s2 + $0x148] sm:$0xff]  }
 0x474   : > { %4405 = vmatprep.subr.bf16.mxu1 %v4718_v54  ;;  %v4755_v54 = vld [vmem:[%s6432_s2 + $0x140] sm:$0xff]  }
 0x477   : > { %4406 = vmatpush3.bf16.msra.mxu1 %v4719_v10  ;;  %v4756_v10 = vld [vmem:[%s6432_s2 + $0x178] sm:$0xff]  }
 0x478   : > { %4407 = vmatprep.subr.bf16.mxu1 %v4721_v31  ;;  %v4758_v31 = vld [vmem:[%s6432_s2 + $0x170] sm:$0xff]  }
 0x47b   : > { %4408 = vmatpush3.bf16.msra.mxu1 %v4722_v12  ;;  %v4760_v12 = vld [vmem:[%s6432_s2 + $0x168] sm:$0xff]  }
 0x47c   : > { %4409 = vmatprep.subr.bf16.mxu1 %v4725_v13  ;;  %v4761_v13 = vld [vmem:[%s6432_s2 + $0x128] sm:$0xff]  }
 0x47f   : > { %4410 = vmatpush3.bf16.msra.mxu1 %v4726_v14  ;;  %v4762_v14 = vld [vmem:[%s6432_s2 + $0x160] sm:$0xff]  }
 0x480   : > { %4411 = vmatprep.subr.bf16.mxu1 %v4729_v15  ;;  %v4763_v15 = vld [vmem:[%s6432_s2 + $0x120] sm:$0xff]  }
 0x483   : > { %4412 = vmatpush3.bf16.msra.mxu1 %v4730_v16  ;;  %v4764_v16 = vld [vmem:[%s6432_s2 + $0x1a8] sm:$0xff]  }
 0x484   : > { %4494 = vmatprep.subr.bf16.mxu1 %v5150_v58 }
 0x516   : > { %v5756_v17 = vpop.f32.mrf.mxu1 }
 0x518   : > { %v1445_v18 = vpop.f32.mrf.mxu1 }
 0x519   : > { %v1491_v53 = vpack.c.bf16 %v1445_v18, %v1445_v18 }
 0x51a   : > { %v1447_v19 = vpop.f32.mrf.mxu1 }
 0x51c   : > { %v1448_v20 = vpop.f32.mrf.mxu1  ;;  %v1670_v22 = vpop.f32.mrf.mxu0 }
 0x51d   : > { %v1678_v48 = vpack.c.bf16 %v1670_v22, %v1670_v22 }
 0x51e   : > { %v1484_v47 = vpop.f32.mrf.mxu1  ;;  %v4484_v27 = vpop.f32.mrf.mxu0 }
 0x51f   : > { %4491 = vmatmul.mubr.msk.bf16.vlgmr.msra.gmra.mxu0 %vm1824_vm1, %v1678_v48  ;;  %v1492_v4 = vpack.c.bf16 %v1484_v47, %v1484_v47 }
 0x520   : > { %v4478_v28 = vpop.f32.mrf.mxu1  ;;  %4423 = vmatpush3.bf16.msra.mxu0 %v4724_v25  ;;  %v1673_v32 = vpop.f32.mrf.mxu0  ;;  %2051 = vmatprep.mubr.bf16.mxu0 %v1491_v53 }
 0x521   : > { %4424 = vmatprep.subr.bf16.mxu0 %v4727_v52 }
 0x522   : > { %v1487_v34 = vpop.f32.mrf.mxu1  ;;  %v4485_v36 = vpop.f32.mrf.mxu0 }
 0x524   : > { %v4479_v37 = vpop.f32.mrf.mxu1  ;;  %4425 = vmatpush3.bf16.msra.mxu0 %v4728_v33 }
 0x525   : > { %4426 = vmatprep.subr.bf16.mxu0 %v4731_v35 }
 0x526   : > { %v1629_v39 = vpop.f32.mrf.mxu1 }
 0x527   : > { %v1676_v41 = vpack.c.bf16 %v1629_v39, %v1629_v39 }
 0x528   : > { %v1631_v42 = vpop.f32.mrf.mxu1  ;;  %4427 = vmatpush3.bf16.msra.mxu0 %v4732_v38 }
 0x529   : > { %v1677_v43 = vpack.c.bf16 %v1631_v42, %v1631_v42  ;;  %4428 = vmatprep.subr.bf16.mxu0 %v4733_v40 }
 0x52a   : > { %v1633_v55 = vpop.f32.mrf.mxu1 }
 0x52b   : > { %1860 = vmatprep.mubr.bf16.mxu1 %v1677_v43 }
 0x52c   : > { %v1634_v57 = vpop.f32.mrf.mxu1  ;;  %1861 = vmatmul.mubr.bf16.vlgmr.msra.gmra.mxu1 %v1676_v41  ;;  %4429 = vmatpush3.bf16.msra.mxu0 %v4735_v46 }
 0x52d   : > { %4495 = vmatpush3.bf16.msra.mxu1 %v4734_v44  ;;  %4430 = vmatprep.subr.bf16.mxu0 %v4736_v26 }
 0x52e   : > { %4496 = vmatprep.subr.bf16.mxu1 %v5150_v58  ;;  %4498 = vmatprep.mubr.msk.bf16.mxu1 %vm5151_vm7, %v5150_v58 }
 0x530   : > { %4431 = vmatpush3.bf16.msra.mxu0 %v4738_v1 }
 0x531   : > { %4497 = vmatpush3.bf16.msra.mxu1 %v4737_v61  ;;  %4432 = vmatprep.subr.bf16.mxu0 %v4740_v2 }
 0x532   : > { %2135 = vmatprep.subr.bf16.mxu1 %v5680_v60  ;;  %v4745_v60 = vld [vmem:[%s6432_s2 + $0x40] sm:$0xff]  }
 0x534   : > { %4499 = vmatmul.mubr.msk.bf16.vlgmr.msra.gmra.mxu1 %vm1824_vm1, %v1492_v4  ;;  %4433 = vmatpush3.bf16.msra.mxu0 %v4742_v3 }
 0x535   : > { %2136 = vmatpush1.bf16.msra.mxu1 %v5683_v62  ;;  %4434 = vmatprep.subr.bf16.mxu0 %v4743_v6  ;;  %v1490_v62 = vpack.c.bf16 %v5756_v17, %v5756_v17  ;;  %v4765_v17 = vld [vmem:[%s6432_s2 + $0x1a0] sm:$0xff]  }
 0x536   : > { %2153 = vmatprep.mubr.bf16.mxu1 %v5147_v0  ;;  %4449 = vmatprep.subr.bf16.mxu1 %v4748_v9 }
 0x538   : > { %4435 = vmatpush3.bf16.msra.mxu0 %v4744_v7  ;;  %v5891_v7 = vld [vmem:[%s6351_s6] sm:$0xf] }
 0x539   : > { %4436 = vmatprep.subr.bf16.mxu0 %v4745_v60 }
 0x53c   : > { %4191 = vmatmul.mubr.msk.bf16.vlgmr.msra.gmra.mxu1 %vm1345_vm3, %v5668_v56  ;;  %4437 = vmatpush3.bf16.msra.mxu0 %v4746_v8 }
 0x53d   : > { %4502 = vmatprep.subr.bf16.mxu0 %v5150_v58 }
 0x53f   : > { %2052 = vmatmul.mubr.bf16.vlgmr.msra.gmra.mxu0 %v1490_v62  ;;  %v5894_v62 = vsub.f32 1.0, %v5891_v7 }
 0x540   : > { %4503 = vmatpush3.bf16.msra.mxu0 %v5676_v45  ;;  %4504 = vmatprep.mubr.msk.bf16.mxu0 %vm5151_vm7, %v5150_v58  ;;  %v4749_v45 = vld [vmem:[%s6432_s2 + $0x158] sm:$0xff]  }
 0x541   : > { %4508 = vmatprep.subr.bf16.mxu0 %v5150_v58  ;;  %4450 = vmatpush3.bf16.msra.mxu1 %v4749_v45 }
 0x542   : > { %4451 = vmatprep.subr.bf16.mxu1 %v4750_v21  ;;  %v2439_v21 = vrot.slane %v5891_v7, %v5455_v24 }
 0x547   : > { %4505 = vmatmul.mubr.msk.bf16.vlgmr.msra.gmra.mxu0 %vm1345_vm3, %v5668_v56  ;;  %v4751_v56 = vld [vmem:[%s6432_s2 + $0x150] sm:$0xff]  }
 0x548   : > { %4512 = vmatprep.mubr.msk.bf16.mxu0 %vm5151_vm7, %v5150_v58  ;;  %4452 = vmatpush3.bf16.msra.mxu1 %v4751_v56 }
 0x549   : > { %4453 = vmatprep.subr.bf16.mxu1 %v4752_v30  ;;  %4509 = vmatpush3.bf16.msra.mxu0 %v4764_v16 }
 0x54a   : > { %4510 = vmatprep.subr.bf16.mxu0 %v5150_v58 }
 0x54c   : > { %4454 = vmatpush3.bf16.msra.mxu1 %v4753_v49  ;;  %v2460_v49 = vrot.slane %v5894_v62, %v5459_v29 }
 0x54d   : > { %4455 = vmatprep.subr.bf16.mxu1 %v4754_v50  ;;  %4511 = vmatpush3.bf16.msra.mxu0 %v4765_v17  ;;  %v2444_v50 = vrot.slane %v5891_v7, %v5459_v29 }
 0x54e   : > { %2695 = vmatprep.subr.bf16.mxu0 %v5147_v0 }
 0x550   : > { %4456 = vmatpush3.bf16.msra.mxu1 %v4755_v54 }
 0x551   : > { %4457 = vmatprep.subr.bf16.mxu1 %v4756_v10 }
 0x554   : > { %4458 = vmatpush3.bf16.msra.mxu1 %v4757_v23 }
 0x555   : > { %4459 = vmatprep.subr.bf16.mxu1 %v4758_v31 }
 0x558   : > { %4460 = vmatpush3.bf16.msra.mxu1 %v4759_v11 }
 0x559   : > { %4461 = vmatprep.subr.bf16.mxu1 %v4760_v12 }
 0x55c   : > { %4462 = vmatpush3.bf16.msra.mxu1 %v4761_v13 }
 0x55d   : > { %4463 = vmatprep.subr.bf16.mxu1 %v4762_v14 }
 0x560   : > { %4464 = vmatpush3.bf16.msra.mxu1 %v4763_v15 }
 0x561   : > { %2801 = vmatprep.subr.bf16.mxu1 %v5147_v0 }
 0x5df   : > { %v1902_v18 = vpop.f32.mrf.mxu0 }
 0x5e1   : > { %v4492_v19 = vpop.f32.mrf.mxu0 }
 0x5e3   : > { %v1905_v20 = vpop.f32.mrf.mxu0 }
 0x5e5   : > { %v4493_v22 = vpop.f32.mrf.mxu0 }
 0x5ec   : > { %v4413_v25 = vpop.f32.mrf.mxu1 }
 0x5ee   : > { %v4414_v47 = vpop.f32.mrf.mxu1 }
 0x5ef   : > { %v4415_v48 = vadd.f32 %v4414_v47, %v4413_v25 }
 0x5f0   : > { %v4416_v52 = vpop.f32.mrf.mxu1 }
 0x5f1   : > { %v1903_v53 = vadd.f32 %v4415_v48, %v1902_v18 }
 0x5f2   : > { %v4417_v27 = vpop.f32.mrf.mxu1 }
 0x5f4   : > { %v2093_v28 = vpop.f32.mrf.mxu1 }
 0x5f6   : > { %v4500_v32 = vpop.f32.mrf.mxu1 }
 0x5f8   : > { %v2096_v58 = vpop.f32.mrf.mxu1 }
 0x5fa   : > { %v4501_v33 = vpop.f32.mrf.mxu1 }
 0x5fc   : > { %v2155_v34 = vpop.f32.mrf.mxu1 }
 0x5fd   : > { %v2202_v35 = vpack.c.bf16 %v2155_v34, %v2155_v34 }
 0x5fe   : > { %v2157_v36 = vpop.f32.mrf.mxu1 }
 0x5ff   : > { %v2203_v37 = vpack.c.bf16 %v2157_v36, %v2157_v36  ;;  %v4438_v38 = vpop.f32.mrf.mxu0 }
 0x600   : > { %v2159_v39 = vpop.f32.mrf.mxu1 }
 0x601   : > { %2385 = vmatprep.mubr.bf16.mxu1 %v2203_v37  ;;  %v4439_v40 = vpop.f32.mrf.mxu0 }
 0x602   : > { %v2160_v41 = vpop.f32.mrf.mxu1  ;;  %2386 = vmatmul.mubr.bf16.vlgmr.msra.gmra.mxu1 %v2202_v35  ;;  %v4440_v42 = vadd.f32 %v4439_v40, %v4438_v38  ;;  %v4766_v40 = vld [vmem:[#allocation11 + $0x38] sm:$0xff]  }
 0x603   : > { %v4441_v43 = vpop.f32.mrf.mxu0  ;;  %v4768_v41 = vld [vmem:[#allocation11 + $0x88] sm:$0xff]   ;;  %2802 = vmatpush1.bf16.msra.mxu1 %v4766_v40 }
 0x604   : > { %v2054_v44 = vadd.f32 %v4440_v42, %v1903_v53  ;;  %v4767_v42 = vld [vmem:[#allocation11 + $0x30] sm:$0xff]   ;;  %v4770_v43 = vld [vmem:[#allocation11 + $0x80] sm:$0xff]   ;;  %2803 = vmatprep.subr.bf16.mxu1 %v5147_v0 }
 0x605   : > { %v4442_v46 = vpop.f32.mrf.mxu0 }
 0x606   : > { %v2094_v55 = vadd.f32 %v2093_v28, %v2054_v44  ;;  %v4769_v44 = vld [vmem:[#allocation11 + $0x28] sm:$0xff]   ;;  %v4772_v46 = vld [vmem:[#allocation11 + $0x78] sm:$0xff]  }
 0x607   : > { %v2196_v26 = vpop.f32.mrf.mxu0  ;;  %2804 = vmatpush1.bf16.msra.mxu1 %v4767_v42 }
 0x608   : > { %v2204_v57 = vpack.c.bf16 %v2196_v26, %v2196_v26  ;;  %2805 = vmatprep.subr.bf16.mxu1 %v5147_v0  ;;  %v4774_v26 = vld [vmem:[#allocation11 + $0x70] sm:$0xff]  }
 0x609   : > { %v4506_v61 = vpop.f32.mrf.mxu0 }
 0x60a   : > { %4513 = vmatmul.mubr.msk.bf16.vlgmr.msra.gmra.mxu0 %vm1824_vm1, %v2204_v57  ;;  %v4773_v57 = vld [vmem:[#allocation11 + $0x18] sm:$0xff]   ;;  %v4776_v61 = vld [vmem:[#allocation11 + $0x68] sm:$0xff]  }
 0x60b   : > { %v2199_v1 = vpop.f32.mrf.mxu0  ;;  %2696 = vmatpush1.bf16.msra.mxu0 %v4768_v41  ;;  %2806 = vmatpush1.bf16.msra.mxu1 %v4769_v44  ;;  %v4785_v41 = vld [vmem:[#allocation11 + $0x90] sm:$0xff]  }
 0x60c   : > { %2697 = vmatprep.subr.bf16.mxu0 %v5147_v0  ;;  %2807 = vmatprep.subr.bf16.mxu1 %v5147_v0  ;;  %v4775_v1 = vld [vmem:[#allocation11 + $0x10] sm:$0xff]  }
 0x60d   : > { %v4507_v2 = vpop.f32.mrf.mxu0 }
 0x60f   : > { %2698 = vmatpush1.bf16.msra.mxu0 %v4770_v43 }
 0x610   : > { %2699 = vmatprep.subr.bf16.mxu0 %v5147_v0 }
 0x613   : > { %2700 = vmatpush1.bf16.msra.mxu0 %v4772_v46 }
 0x614   : > { %2701 = vmatprep.subr.bf16.mxu0 %v5147_v0 }
 0x617   : > { %2702 = vmatpush1.bf16.msra.mxu0 %v4774_v26 }
 0x618   : > { %2703 = vmatprep.subr.bf16.mxu0 %v5147_v0 }
 0x61b   : > { %2704 = vmatpush1.bf16.msra.mxu0 %v4776_v61 }
 0x61c   : > { %2705 = vmatprep.subr.bf16.mxu0 %v5147_v0 }
 0x6c2   : > { %v4465_v3 = vpop.f32.mrf.mxu1 }
 0x6c4   : > { %v4466_v4 = vpop.f32.mrf.mxu1 }
 0x6c5   : > { %v4467_v8 = vadd.f32 %v4466_v4, %v4465_v3 }
 0x6c6   : > { %v4468_v6 = vpop.f32.mrf.mxu1 }
 0x6c8   : > { %v4469_v60 = vpop.f32.mrf.mxu1 }
 0x6ca   : > { %v2427_v9 = vpop.f32.mrf.mxu0 }
 0x6cb   : > { %v2428_v45 = vadd.f32 %v4467_v8, %v2427_v9 }
 0x6cc   : > { %v4514_v56 = vpop.f32.mrf.mxu0 }
 0x6cd   : > { %v2433_v30 = vadd.f32 %v2428_v45, %v2094_v55  ;;  %v4771_v55 = vld [vmem:[#allocation11 + $0x20] sm:$0xff]  }
 0x6ce   : > { %v2430_v54 = vpop.f32.mrf.mxu0  ;;  %2808 = vmatpush1.bf16.msra.mxu1 %v4771_v55  ;;  %v2563_v55 = vld [vmem:[#allocation4 + $0x8] sm:$0x11] }
 0x6cf   : > { %v2440_v10 = vadd.f32 %v2439_v21, %v2433_v30  ;;  %2809 = vmatprep.subr.bf16.mxu1 %v5147_v0 }
 0x6d0   : > { %v4515_v23 = vpop.f32.mrf.mxu0 }
 0x6d1   : > { %v2461_v31 = vmul.f32 %v2460_v49, %v2440_v10  ;;  %v2445_v11 = vmul.f32 %v2444_v50, %v2440_v10 }
 0x6d2   : > { %2810 = vmatpush1.bf16.msra.mxu1 %v4773_v57  ;;  %v2557_v57 = vld [vmem:[#allocation4] sm:$0xff] }
 0x6d3   : > { %2462 = vadd.xlane.f32.xlu1 %v2461_v31  ;;  %2446 = vadd.xlane.f32.xlu0 %v2445_v11 }
 0x6d4   : > { %2811 = vmatprep.subr.bf16.mxu1 %v5147_v0 }
 0x6d6   : > { %2812 = vmatpush1.bf16.msra.mxu1 %v4775_v1 }
 0x6d7   : > { %2813 = vmatprep.subr.bf16.mxu1 %v5147_v0 }
 0x75c   : > { %v2463_v12 = vpop.xlane.xlu1 %2462  ;;  %v2447_v13 = vpop.xlane.xlu0 %2446 }
 0x75d   : > { %v2464_v14 = vrot.slane %v2463_v12, 4  ;;  %v2448_v15 = vrot.slane %v2447_v13, 4 }
 0x75f   : > { %v2465_v16 = vadd.f32 %v2464_v14, %v2463_v12  ;;  %v2449_v17 = vadd.f32 %v2448_v15, %v2447_v13 }
 0x761   : > { %v2466_v18 = vrot.slane %v2465_v16, 2  ;;  %v2450_v19 = vrot.slane %v2449_v17, 2 }
 0x763   : > { %v2451_v20 = vadd.f32 %v2450_v19, %v2449_v17  ;;  %v2467_v22 = vadd.f32 %v2466_v18, %v2465_v16  ;;  %v4777_v18 = vld [vmem:[#allocation11 + $0x8] sm:$0xff]  }
 0x764   : > { %2814 = vmatpush1.bf16.msra.mxu1 %v4777_v18  ;;  %v4792_v18 = vld [vmem:[#allocation11 + $0xb0] sm:$0xff]  }
 0x765   : > { %v2452_v25 = vrot.slane %v2451_v20, 1  ;;  %v2468_v47 = vrot.slane %v2467_v22, 1  ;;  %2815 = vmatprep.subr.bf16.mxu1 %v5147_v0 }
 0x767   : > { %v2453_v48 = vadd.f32 %v2452_v25, %v2451_v20  ;;  %v2469_v52 = vadd.f32 %v2468_v47, %v2467_v22  ;;  %v2521_v22 = vrot.slane %v5891_v7, %v5581_v51  ;;  %v4779_v25 = vld [vmem:[#allocation11] sm:$0xff]  }
 0x768   : > { %2816 = vmatpush1.bf16.msra.mxu1 %v4779_v25  ;;  %v4796_v25 = vld [vmem:[#allocation11 + $0xe0] sm:$0xff]  }
 0x769   : > { %4524 = vpush %v2453_v48  ;;  %v2526_v48 = vrot.slane %v5891_v7, %v5586_v63  ;;  %2829 = vmatprep.subr.bf16.mxu1 %v5147_v0 }
 0x76a   : > { %4526 = vpush %v2469_v52  ;;  %v4781_v52 = vld [vmem:[#allocation11 + $0x48] sm:$0xff]  }
 0x76c   : > { %2830 = vmatpush2.bf16.msra.mxu1 %v4781_v52 }
 0x76d   : > { %2831 = vmatprep.subr.bf16.mxu1 %v5147_v0 }
 0x79a   : > { %s4525_s14 = spop %4524 }
 0x79b   : > { %v2455_v53 = vstv %s4525_s14  ;;  %s4527_s18 = spop %4526  ;;  %s6014_s14 = scalar_lea.vmem [#allocation18], %s4055_s19 }
 0x79c   : > { %v2456_v27 = vmul.f32 0.001953125, %v2455_v53  ;;  %v2471_v28 = vstv %s4527_s18  ;;  %v4778_v53 = vld [vmem:[#allocation11 + $0x60] sm:$0xff]   ;;  %s3795_s19 = sshll.u32 %s5626_s24, 4  ;;  %s3811_s18 = sshll.u32 %s5935_s21, 4  ;;  %s6208_s19 = int_to_ptr.vmem [resolvable:$true] %s3795_s19  ;;  %s3812_s18 = int_to_ptr.vmem [resolvable:$true] %s3811_s18 }
 0x79d   : > { %v2472_v32 = vmul.f32 0.001953125, %v2471_v28  ;;  %2706 = vmatpush1.bf16.msra.mxu0 %v4778_v53  ;;  %s4978_s0 = scalar_lea.vmem %s3812_s18, 128  ;;  %s5152_s24 = smov [#allocation16]  }
 0x79e   : > { %v2473_v58 = vmul.f32 %v2456_v27, %v5891_v7  ;;  %2707 = vmatprep.subr.bf16.mxu0 %v5147_v0  ;;  %p4979_p12 = scmp.ne.s32.totalorder %s3812_s18, %s4978_s0  ;;  %s4982_s2 = sshll.u32 %s5152_s24, 4  ;;  %s4983_s2 = int_to_ptr.vmem [resolvable:$false] %s4982_s2 }
 0x79f   : > { %v2474_v33 = vmul.f32 %v2472_v32, %v5894_v62  ;;  %v4783_v32 = vld [vmem:[#allocation11 + $0x40] sm:$0xff]   ;;  %p4985_p1 = scmp.lt.s32.totalorder %s3812_s18, %s4983_s2 }
 0x7a0   : > { %2832 = vmatpush2.bf16.msra.mxu1 %v4783_v32  ;;  %p4980_p13 = pnand %p4979_p12, %p6446_p9 }
 0x7a1   : > { %v2475_v34 = vadd.f32 %v2474_v33, %v2473_v58  ;;  %v4780_v58 = vld [vmem:[#allocation11 + $0x58] sm:$0xff]  }
 0x7a2   : > { %2708 = vmatpush1.bf16.msra.mxu0 %v4780_v58  ;;  %p4981_p0 = pneg %p4980_p13 }
 0x7a3   : > { %v2479_v35 = vrot.slane %v2475_v34, %v5459_v29  ;;  %v4782_v34 = vld [vmem:[#allocation11 + $0x50] sm:$0xff]   ;;  %2709 = vmatprep.subr.bf16.mxu0 %v5147_v0 }
 0x7a5   : > { %v5905_v36 = vsub.f32 %v2440_v10, %v2479_v35 }
 0x7a6   : > { %2710 = vmatpush1.bf16.msra.mxu0 %v4782_v34 }
 0x7a7   : > { %v2481_v37 = vmul.f32 %v5905_v36, %v5905_v36  ;;  %2723 = vmatprep.subr.bf16.mxu0 %v5147_v0 }
 0x7a9   : > { %v2482_v38 = vmul.f32 %v2481_v37, %v2444_v50  ;;  %v2494_v39 = vmul.f32 %v2481_v37, %v2460_v49 }
 0x7ab   : > { %2483 = vadd.xlane.f32.xlu0 %v2482_v38  ;;  %v4784_v38 = vld [vmem:[#allocation11 + $0x98] sm:$0xff]  }
 0x7ac   : > { %2724 = vmatpush2.bf16.msra.mxu0 %v4784_v38 }
 0x7ad   : > { %2725 = vmatprep.subr.bf16.mxu0 %v5147_v0 }
 0x7af   : > { %2495 = vadd.xlane.f32.xlu0 %v2494_v39 }
 0x7b0   : > { %2726 = vmatpush2.bf16.msra.mxu0 %v4785_v41 }
 0x7b1   : > { %2934 = vmatprep.subr.bf16.mxu0 %v5147_v0 }
 0x834   : > { %v2484_v2 = vpop.xlane.xlu0 %2483 }
 0x835   : > { %v2485_v3 = vrot.slane %v2484_v2, 4 }
 0x837   : > { %v2486_v4 = vadd.f32 %v2485_v3, %v2484_v2 }
 0x838   : > { %v2496_v6 = vpop.xlane.xlu0 %2495 }
 0x839   : > { %v2487_v60 = vrot.slane %v2486_v4, 2  ;;  %v2497_v8 = vrot.slane %v2496_v6, 4 }
 0x83b   : > { %v2498_v9 = vadd.f32 %v2497_v8, %v2496_v6  ;;  %v2488_v45 = vadd.f32 %v2487_v60, %v2486_v4 }
 0x83d   : > { %v2499_v21 = vrot.slane %v2498_v9, 2  ;;  %v2489_v56 = vrot.slane %v2488_v45, 1 }
 0x83f   : > { %v2490_v30 = vadd.f32 %v2489_v56, %v2488_v45  ;;  %v2500_v49 = vadd.f32 %v2499_v21, %v2498_v9 }
 0x841   : > { %4528 = vpush %v2490_v30  ;;  %v2501_v50 = vrot.slane %v2500_v49, 1 }
 0x843   : > { %v2502_v54 = vadd.f32 %v2501_v50, %v2500_v49 }
 0x845   : > { %4530 = vpush %v2502_v54 }
 0x872   : > { %s4529_s1 = spop %4528 }
 0x873   : > { %v2492_v10 = vstv %s4529_s1 }
 0x874   : > { %v2493_v23 = vmul.f32 0.001953125, %v2492_v10 }
 0x876   : > { %v2506_v31 = vadd.f32 1e-05, %v2493_v23  ;;  %s4531_s3 = spop %4530 }
 0x877   : > { %v2504_v11 = vstv %s4531_s3 }
 0x878   : > { %v2505_v12 = vmul.f32 0.001953125, %v2504_v11  ;;  %4834 = vrsqrt.f32 %v2506_v31 }
 0x87a   : > { %v2509_v13 = vadd.f32 1e-05, %v2505_v12  ;;  %v4786_v12 = vld [vmem:[#allocation11 + $0xd8] sm:$0xff]  }
 0x87c   : > { %4836 = vrsqrt.f32 %v2509_v13 }
 0x885   : > { %v4835_v14 = vpop.eup %4834 }
 0x886   : > { %v2508_v16 = vmul.f32 %v4835_v14, %v5891_v7  ;;  %v4788_v14 = vld [vmem:[#allocation11 + $0xd0] sm:$0xff]  }
 0x889   : > { %v4837_v15 = vpop.eup %4836 }
 0x88a   : > { %v2511_v17 = vmul.f32 %v4837_v15, %v5894_v62  ;;  %v4789_v15 = vld [vmem:[#allocation11 + $0xc8] sm:$0xff]  }
 0x88c   : > { %v2512_v19 = vadd.f32 %v2511_v17, %v2508_v16  ;;  %v4790_v16 = vld [vmem:[#allocation11 + $0xc0] sm:$0xff]   ;;  %v4791_v17 = vld [vmem:[#allocation11 + $0xb8] sm:$0xff]  }
 0x88e   : > { %v2516_v20 = vrot.slane %v2512_v19, %v5459_v29  ;;  %v4793_v19 = vld [vmem:[#allocation11 + $0xa8] sm:$0xff]  }
 0x890   : > { %v2517_v47 = vmul.f32 %v2516_v20, %v5905_v36  ;;  %v4794_v20 = vld [vmem:[#allocation11 + $0xa0] sm:$0xff]  }
 0x892   : > { %v2522_v62 = vmul.f32 %v2521_v22, %v2517_v47  ;;  %v4795_v22 = vld [vmem:[#allocation11 + $0xe8] sm:$0xff]  }
 0x894   : > { %v2527_v27 = vadd.f32 %v2526_v48, %v2522_v62 }
 0x896   : > { %vm2528_vm7 = vcmp.gt.f32.partialorder %v2527_v27, 0.0  ;;  %v2529_v28 = vmul.f32 0.2, %v2527_v27 }
 0x898   : > { %v2530_v7 = vsel %vm2528_vm7, %v2527_v27, %v2529_v28 }
 0x899   : > { %v4390_v33 = vpack.c.bf16 %v2530_v7, %v2530_v7  ;;  %2531 = vst [vmem:[%s5935_s21] sm:$0xff] %v2530_v7 }
 0x89b   : > { %v2537_v35 = vshrl.u32 %v4390_v33, 16  ;;  %v2540_v37 = vshll.u32 %v4390_v33, 16  ;;  %v5991_v33 = vld [vmem:[%s6352_s7] sm:$0xf] }
 0x89c   : > { %v5994_v34 = vsub.f32 1.0, %v5991_v33 }
 0x89d   : > { %v2539_v36 = vrot.slane %v2537_v35, 7 }
 0x89f   : > { %v2543_v39 = vrot.slane %v2539_v36, 4  ;;  %v2542_v40 = vor.u32 %v2540_v37, %v2539_v36  ;;  %v2980_v36 = vrot.slane %v5991_v33, %v5455_v24 }
 0x8a1   : > { %2546 = vrot.lane.b32.xlu0 %v2543_v39, %s6376_s23  ;;  %2544 = vrot.lane.b32.xlu1 %v2542_v40, %s6376_s23  ;;  %v3001_v39 = vrot.slane %v5994_v34, %v5459_v29  ;;  %v2985_v40 = vrot.slane %v5991_v33, %v5459_v29 }
 0x913   : > { %v2547_v44 = vpop.permute.xlu0 %2546  ;;  %v2545_v46 = vpop.permute.xlu1 %2544 }
 0x914   : > { %v2549_v26 = vrot.slane %v2547_v44, 4  ;;  %v2548_v61 = vrot.slane %v2545_v46, 4 }
 0x916   : > { %v2551_v1 = vsel %vm1345_vm3, %v2549_v26, %v2547_v44  ;;  %v2550_v2 = vsel %vm1345_vm3, %v2548_v61, %v2545_v46 }
 0x917   : > { %v2564_v3 = vsel %vm2562_vm14, %v2551_v1, %v2563_v55  ;;  %v2558_v4 = vsel %vm2556_vm15, %v2550_v2, %v2557_v57 }
 0x918   : > { %2565 = vst [vmem:[#allocation4 + $0x8] sm:$0x11] %v2564_v3  ;;  %2559 = vst [vmem:[#allocation4] sm:$0xff] %v2558_v4  ;;  %v4263_v6 = vcombine.high %v2558_v4, %v2558_v4  ;;  %v4262_v60 = vcombine.low %v2558_v4, %v2558_v4 }
 0x91a   : > { %4274 = vmatprep.mubr.msk.bf16.mxu1 %vm1824_vm1, %v4263_v6 }
 0x91b   : > { %2834 = vmatmul.mubr.bf16.vlgmr.msra.gmra.mxu1 %v4262_v60 }
 0x91c   : > { %3150 = vmatprep.mubr.bf16.mxu1 %v5147_v0 }
 0x91f   : > { %v2587_v8 = vld [vmem:[#allocation4 + $0x8] sm:$0x11]  ;;  %v2841_v21 = vld [vmem:[#allocation4] sm:$0xee] }
 0x920   : > { %v4250_v9 = vcombine.high %v2558_v4, %v2587_v8  ;;  %v4249_v45 = vcombine.low %v2558_v4, %v2587_v8  ;;  %v4276_v49 = vcombine.high %v2841_v21, %v2587_v8  ;;  %v4275_v47 = vcombine.low %v2841_v21, %v2587_v8 }
 0x922   : > { %v2627_v56 = vshll.u32 %v4250_v9, 16  ;;  %v2620_v30 = vshll.u32 %v4249_v45, 16  ;;  %v2625_v50 = vshrl.u32 %v4250_v9, 16  ;;  %v2618_v10 = vshrl.u32 %v4249_v45, 16 }
 0x923   : > { %v2869_v13 = vrot.slane %v4276_v49, 1  ;;  %v2868_v48 = vrot.slane %v4275_v47, 1 }
 0x924   : > { %v2629_v54 = vrot.slane %v2627_v56, 1  ;;  %v2622_v23 = vrot.slane %v2620_v30, 1 }
 0x926   : > { %v2630_v31 = vor.u32 %v2629_v54, %v2625_v50  ;;  %v2623_v11 = vor.u32 %v2622_v23, %v2618_v10 }
 0x928   : > { %4261 = vmatprep.mubr.msk.bf16.mxu0 %vm1824_vm1, %v2630_v31 }
 0x929   : > { %2728 = vmatmul.mubr.bf16.vlgmr.msra.gmra.mxu0 %v2623_v11 }
 0x92a   : > { %2935 = vmatpush1.bf16.msra.mxu0 %v4786_v12  ;;  %4287 = vmatprep.mubr.msk.bf16.mxu0 %vm1824_vm1, %v2869_v13 }
 0x92b   : > { %2936 = vmatprep.subr.bf16.mxu0 %v5147_v0 }
 0x92e   : > { %2937 = vmatpush1.bf16.msra.mxu0 %v4788_v14 }
 0x92f   : > { %2938 = vmatprep.subr.bf16.mxu0 %v5147_v0 }
 0x932   : > { %2939 = vmatpush1.bf16.msra.mxu0 %v4789_v15 }
 0x933   : > { %2940 = vmatprep.subr.bf16.mxu0 %v5147_v0 }
 0x936   : > { %2941 = vmatpush1.bf16.msra.mxu0 %v4790_v16 }
 0x937   : > { %2942 = vmatprep.subr.bf16.mxu0 %v5147_v0 }
 0x93a   : > { %2943 = vmatpush1.bf16.msra.mxu0 %v4791_v17 }
 0x93b   : > { %2944 = vmatprep.subr.bf16.mxu0 %v5147_v0 }
 0x93e   : > { %2945 = vmatpush1.bf16.msra.mxu0 %v4792_v18 }
 0x93f   : > { %2946 = vmatprep.subr.bf16.mxu0 %v5147_v0 }
 0x942   : > { %2947 = vmatpush1.bf16.msra.mxu0 %v4793_v19 }
 0x943   : > { %2948 = vmatprep.subr.bf16.mxu0 %v5147_v0 }
 0x946   : > { %2949 = vmatpush1.bf16.msra.mxu0 %v4794_v20 }
 0x947   : > { %2962 = vmatprep.subr.bf16.mxu0 %v5147_v0 }
 0x94a   : > { %2963 = vmatpush2.bf16.msra.mxu0 %v4795_v22 }
 0x94b   : > { %2964 = vmatprep.subr.bf16.mxu0 %v5147_v0 }
 0x94e   : > { %2965 = vmatpush2.bf16.msra.mxu0 %v4796_v25 }
 0x94f   : > { %3441 = vmatprep.subr.bf16.mxu0 %v5147_v0 }
 0x951   : > { %2967 = vmatmul.mubr.bf16.vlgmr.msra.gmra.mxu0 %v2868_v48 }
 0x9db   : > { %v2835_v62 = vpop.f32.mrf.mxu1 }
 0x9dd   : > { %v2837_v52 = vpop.f32.mrf.mxu1 }
 0x9df   : > { %v2838_v53 = vpop.f32.mrf.mxu1 }
 0x9e1   : > { %v2839_v27 = vpop.f32.mrf.mxu1 }
 0x9e9   : > { %v2729_v28 = vpop.f32.mrf.mxu0 }
 0x9ea   : > { %v2836_v35 = vadd.f32 %v2835_v62, %v2729_v28 }
 0x9eb   : > { %v2731_v32 = vpop.f32.mrf.mxu0 }
 0x9ed   : > { %v2732_v58 = vpop.f32.mrf.mxu0 }
 0x9ef   : > { %v2733_v7 = vpop.f32.mrf.mxu0 }
 0xa11   : > { %v2968_v37 = vpop.f32.mrf.mxu0 }
 0xa12   : > { %v2974_v38 = vadd.f32 %v2968_v37, %v2836_v35 }
 0xa13   : > { %v2970_v41 = vpop.f32.mrf.mxu0 }
 0xa14   : > { %v2981_v44 = vadd.f32 %v2980_v36, %v2974_v38 }
 0xa15   : > { %v2971_v46 = vpop.f32.mrf.mxu0 }
 0xa16   : > { %v3002_v55 = vmul.f32 %v3001_v39, %v2981_v44  ;;  %v2986_v26 = vmul.f32 %v2985_v40, %v2981_v44 }
 0xa17   : > { %v2972_v57 = vpop.f32.mrf.mxu0 }
 0xa18   : > { %3003 = vadd.xlane.f32.xlu0 %v3002_v55  ;;  %2987 = vadd.xlane.f32.xlu1 %v2986_v26  ;;  %v3062_v57 = vrot.slane %v5991_v33, %v5581_v51 }
 0xaa1   : > { %v3004_v61 = vpop.xlane.xlu0 %3003  ;;  %v2988_v1 = vpop.xlane.xlu1 %2987 }
 0xaa2   : > { %v3005_v2 = vrot.slane %v3004_v61, 4  ;;  %v2989_v3 = vrot.slane %v2988_v1, 4 }
 0xaa4   : > { %v3006_v4 = vadd.f32 %v3005_v2, %v3004_v61  ;;  %v2990_v6 = vadd.f32 %v2989_v3, %v2988_v1  ;;  %v3067_v1 = vrot.slane %v5991_v33, %v5586_v63 }
 0xaa6   : > { %v3007_v60 = vrot.slane %v3006_v4, 2  ;;  %v2991_v8 = vrot.slane %v2990_v6, 2 }
 0xaa8   : > { %v2992_v9 = vadd.f32 %v2991_v8, %v2990_v6  ;;  %v3008_v45 = vadd.f32 %v3007_v60, %v3006_v4 }
 0xaaa   : > { %v2993_v21 = vrot.slane %v2992_v9, 1  ;;  %v3009_v56 = vrot.slane %v3008_v45, 1 }
 0xaac   : > { %v2994_v30 = vadd.f32 %v2993_v21, %v2992_v9  ;;  %v3010_v49 = vadd.f32 %v3009_v56, %v3008_v45  ;;  %v4810_v56 = vld [vmem:[%s6349_s4 + $0x30] sm:$0xff]  }
 0xaae   : > { %4532 = vpush %v2994_v30  ;;  %v4811_v30 = vld [vmem:[%s6349_s4 + $0x28] sm:$0xff]  }
 0xaaf   : > { %4534 = vpush %v3010_v49  ;;  %v4812_v49 = vld [vmem:[%s6349_s4 + $0x20] sm:$0xff]  }
 0xadf   : > { %s4533_s27 = spop %4532 }
 0xae0   : > { %v2996_v50 = vstv %s4533_s27  ;;  %s4535_s5 = spop %4534  ;;  %s4380_s27 = sshll.u32 %s5253_s17, 7 }
 0xae1   : > { %v2997_v54 = vmul.f32 0.001953125, %v2996_v50  ;;  %v3012_v10 = vstv %s4535_s5  ;;  %v4813_v50 = vld [vmem:[%s6349_s4 + $0x18] sm:$0xff]   ;;  %s4984_s5 = scalar_lea.vmem %s4983_s2, 256 }
 0xae2   : > { %v3013_v23 = vmul.f32 0.001953125, %v3012_v10  ;;  %v4815_v10 = vld [vmem:[%s6349_s4 + $0x8] sm:$0xff]   ;;  %p4986_p2 = scmp.lt.s32.totalorder %s4984_s5, %s4978_s0 }
 0xae3   : > { %v3014_v31 = vmul.f32 %v2997_v54, %v5991_v33  ;;  %v4814_v54 = vld [vmem:[%s6349_s4 + $0x10] sm:$0xff]  }
 0xae4   : > { %v3015_v11 = vmul.f32 %v3013_v23, %v5994_v34  ;;  %v4816_v23 = vld [vmem:[%s6349_s4] sm:$0xff]   ;;  %p4987_p6 = por %p4986_p2, %p4985_p1 }
 0xae6   : > { %v3016_v12 = vadd.f32 %v3015_v11, %v3014_v31  ;;  %v4817_v31 = vld [vmem:[%s6349_s4 + $0x48] sm:$0xff]   ;;  %p4988_p5 = pnand %p4987_p6, %p4981_p0 }
 0xae8   : > { %v3020_v13 = vrot.slane %v3016_v12, %v5459_v29 }
 0xaea   : > { %v3021_v14 = vsub.f32 %v2981_v44, %v3020_v13  ;;  %v3098_v13 = vld [vmem:[#allocation5 + $0x8] sm:$0x11] }
 0xaec   : > { %v3022_v15 = vmul.f32 %v3021_v14, %v3021_v14 }
 0xaee   : > { %v3035_v16 = vmul.f32 %v3022_v15, %v3001_v39  ;;  %v3023_v17 = vmul.f32 %v3022_v15, %v2985_v40  ;;  %v3095_v15 = vld [vmem:[#allocation5] sm:$0xff] }
 0xaf0   : > { %3036 = vadd.xlane.f32.xlu0 %v3035_v16  ;;  %3024 = vadd.xlane.f32.xlu1 %v3023_v17 }
 0xb79   : > { %v3037_v18 = vpop.xlane.xlu0 %3036  ;;  %v3025_v19 = vpop.xlane.xlu1 %3024 }
 0xb7a   : > { %v3038_v20 = vrot.slane %v3037_v18, 4  ;;  %v3026_v22 = vrot.slane %v3025_v19, 4 }
 0xb7c   : > { %v3039_v25 = vadd.f32 %v3038_v20, %v3037_v18  ;;  %v3027_v47 = vadd.f32 %v3026_v22, %v3025_v19 }
 0xb7e   : > { %v3040_v48 = vrot.slane %v3039_v25, 2  ;;  %v3028_v62 = vrot.slane %v3027_v47, 2 }
 0xb80   : > { %v3029_v52 = vadd.f32 %v3028_v62, %v3027_v47  ;;  %v3041_v53 = vadd.f32 %v3040_v48, %v3039_v25 }
 0xb82   : > { %v3030_v27 = vrot.slane %v3029_v52, 1  ;;  %v3042_v28 = vrot.slane %v3041_v53, 1 }
 0xb84   : > { %v3031_v32 = vadd.f32 %v3030_v27, %v3029_v52  ;;  %v3043_v58 = vadd.f32 %v3042_v28, %v3041_v53 }
 0xb86   : > { %4536 = vpush %v3031_v32 }
 0xb87   : > { %4538 = vpush %v3043_v58 }
 0xbb7   : > { %s4537_s26 = spop %4536 }
 0xbb8   : > { %v3033_v7 = vstv %s4537_s26  ;;  %s4539_s29 = spop %4538 }
 0xbb9   : > { %v3034_v35 = vmul.f32 0.001953125, %v3033_v7  ;;  %v3045_v36 = vstv %s4539_s29  ;;  %s6215_s29 = scalar_lea.hbm %s6357_s12, %s4380_s27 }
 0xbba   : > { %v3046_v37 = vmul.f32 0.001953125, %v3045_v36 }
 0xbbb   : > { %v3047_v38 = vadd.f32 1e-05, %v3034_v35 }
 0xbbc   : > { %v3050_v39 = vadd.f32 1e-05, %v3046_v37  ;;  %v4798_v37 = vld [vmem:[%s6349_s4 + $0x88] sm:$0xff]  }
 0xbbd   : > { %4838 = vrsqrt.f32 %v3047_v38  ;;  %v4799_v38 = vld [vmem:[%s6349_s4 + $0x80] sm:$0xff]  }
 0xbbe   : > { %4840 = vrsqrt.f32 %v3050_v39  ;;  %v4800_v39 = vld [vmem:[%s6349_s4 + $0x78] sm:$0xff]  }
 0xbca   : > { %v4839_v40 = vpop.eup %4838 }
 0xbcb   : > { %v4841_v41 = vpop.eup %4840  ;;  %v3049_v44 = vmul.f32 %v4839_v40, %v5991_v33  ;;  %v4809_v33 = vld [vmem:[%s6349_s4 + $0x38] sm:$0xff]   ;;  %v4801_v40 = vld [vmem:[%s6349_s4 + $0x70] sm:$0xff]  }
 0xbcc   : > { %v3052_v46 = vmul.f32 %v4841_v41, %v5994_v34  ;;  %3442 = vmatpush1.bf16.msra.mxu0 %v4809_v33  ;;  %v4802_v41 = vld [vmem:[%s6349_s4 + $0x68] sm:$0xff]  }
 0xbcd   : > { %3443 = vmatprep.subr.bf16.mxu0 %v5147_v0 }
 0xbce   : > { %v3053_v55 = vadd.f32 %v3052_v46, %v3049_v44  ;;  %v4803_v44 = vld [vmem:[%s6349_s4 + $0x60] sm:$0xff]   ;;  %v4804_v46 = vld [vmem:[%s6349_s4 + $0x58] sm:$0xff]  }
 0xbd0   : > { %v3057_v26 = vrot.slane %v3053_v55, %v5459_v29  ;;  %3444 = vmatpush1.bf16.msra.mxu0 %v4810_v56  ;;  %v4805_v55 = vld [vmem:[%s6349_s4 + $0x50] sm:$0xff]   ;;  %v4823_v56 = vld [vmem:[%s6349_s4 + $0xc0] sm:$0xff]  }
 0xbd1   : > { %3445 = vmatprep.subr.bf16.mxu0 %v5147_v0 }
 0xbd2   : > { %v3058_v61 = vmul.f32 %v3057_v26, %v3021_v14  ;;  %v4806_v26 = vld [vmem:[%s6349_s4 + $0x98] sm:$0xff]  }
 0xbd4   : > { %v3063_v2 = vmul.f32 %v3062_v57, %v3058_v61  ;;  %3446 = vmatpush1.bf16.msra.mxu0 %v4811_v30  ;;  %v4807_v61 = vld [vmem:[%s6349_s4 + $0x90] sm:$0xff]  }
 0xbd5   : > { %3447 = vmatprep.subr.bf16.mxu0 %v5147_v0 }
 0xbd6   : > { %v3068_v3 = vadd.f32 %v3067_v1, %v3063_v2  ;;  %v4818_v2 = vld [vmem:[%s6349_s4 + $0x40] sm:$0xff]  }
 0xbd8   : > { %vm3069_vm5 = vcmp.gt.f32.partialorder %v3068_v3, 0.0  ;;  %v3070_v4 = vmul.f32 0.2, %v3068_v3  ;;  %3448 = vmatpush1.bf16.msra.mxu0 %v4812_v49 }
 0xbd9   : > { %3449 = vmatprep.subr.bf16.mxu0 %v5147_v0 }
 0xbda   : > { %v3071_v6 = vsel %vm3069_vm5, %v3068_v3, %v3070_v4 }
 0xbdb   : > { %v4391_v60 = vpack.c.bf16 %v3071_v6, %v3071_v6  ;;  %3072 = vst [vmem:[%s6014_s14] sm:$0xff] %v3071_v6 }
 0xbdc   : > { %3450 = vmatpush1.bf16.msra.mxu0 %v4813_v50 }
 0xbdd   : > { %v3078_v34 = vshrl.u32 %v4391_v60, 16  ;;  %v3081_v9 = vshll.u32 %v4391_v60, 16  ;;  %3451 = vmatprep.subr.bf16.mxu0 %v5147_v0 }
 0xbdf   : > { %v3080_v8 = vrot.slane %v3078_v34, 7  ;;  %v4820_v34 = vld [vmem:[%s6349_s4 + $0xd8] sm:$0xff]  }
 0xbe0   : > { %3452 = vmatpush1.bf16.msra.mxu0 %v4814_v54 }
 0xbe1   : > { %v3084_v45 = vrot.slane %v3080_v8, 4  ;;  %v3083_v21 = vor.u32 %v3081_v9, %v3080_v8  ;;  %3453 = vmatprep.subr.bf16.mxu0 %v5147_v0 }
 0xbe3   : > { %3087 = vrot.lane.b32.xlu0 %v3084_v45, %s6376_s23  ;;  %3085 = vrot.lane.b32.xlu1 %v3083_v21, %s6376_s23  ;;  %v4821_v45 = vld [vmem:[%s6349_s4 + $0xd0] sm:$0xff]   ;;  %v4822_v21 = vld [vmem:[%s6349_s4 + $0xc8] sm:$0xff]   ;;  %s6223_s23 = scalar_lea.sflag [#allocation17], %s3771_s22 }
 0xbe4   : > { %3454 = vmatpush1.bf16.msra.mxu0 %v4815_v10 }
 0xbe5   : > { %3455 = vmatprep.subr.bf16.mxu0 %v5147_v0 }
 0xbe8   : > { %3456 = vmatpush1.bf16.msra.mxu0 %v4816_v23  ;;  %v4824_v23 = vld [vmem:[%s6349_s4 + $0xb8] sm:$0xff]  }
 0xbe9   : > { %3469 = vmatprep.subr.bf16.mxu0 %v5147_v0 }
 0xbec   : > { %3470 = vmatpush2.bf16.msra.mxu0 %v4817_v31 }
 0xbed   : > { %3471 = vmatprep.subr.bf16.mxu0 %v5147_v0 }
 0xbf0   : > { %3472 = vmatpush2.bf16.msra.mxu0 %v4818_v2 }
 0xbf1   : > { %3622 = vmatprep.subr.bf16.mxu0 %v5147_v0 }
 0xc55   : > { %v3088_v11 = vpop.permute.xlu0 %3087  ;;  %v3086_v12 = vpop.permute.xlu1 %3085 }
 0xc56   : > { %v3090_v14 = vrot.slane %v3088_v11, 4  ;;  %v3089_v16 = vrot.slane %v3086_v12, 4 }
 0xc58   : > { %v3092_v17 = vsel %vm1345_vm3, %v3090_v14, %v3088_v11  ;;  %v3091_v18 = vsel %vm1345_vm3, %v3089_v16, %v3086_v12  ;;  %vm6443_vm3 = vmmov %vm6442_vm4  ;;  %v4825_v12 = vld [vmem:[%s6349_s4 + $0xb0] sm:$0xff]   ;;  %v4827_v14 = vld [vmem:[%s6349_s4 + $0xa0] sm:$0xff]  }
 0xc59   : > { %v3099_v19 = vsel %vm2562_vm14, %v3092_v17, %v3098_v13  ;;  %v3096_v20 = vsel %vm2556_vm15, %v3091_v18, %v3095_v15  ;;  %vm6444_vm7 = vmmov %vm6443_vm3  ;;  %v4826_v13 = vld [vmem:[%s6349_s4 + $0xa8] sm:$0xff]   ;;  %v4829_v16 = vld [vmem:[%s6349_s4 + $0xe0] sm:$0xff]  }
 0xc5a   : > { %3100 = vst [vmem:[#allocation5 + $0x8] sm:$0x11] %v3099_v19  ;;  %3097 = vst [vmem:[#allocation5] sm:$0xff] %v3096_v20  ;;  %v4290_v22 = vcombine.high %v3096_v20, %v3096_v20  ;;  %v4289_v25 = vcombine.low %v3096_v20, %v3096_v20  ;;  %v4828_v15 = vld [vmem:[%s6349_s4 + $0xe8] sm:$0xff]  }
 0xc5b   : > { %vm6445_vm10 = vmmov %vm6443_vm3 }
 0xc5c   : > { %4291 = vmatprep.subr.msk.bf16.mxu1 %vm6440_vm11, %v4290_v22  ;;  %v3113_v47 = vsel %vm6441_vm12, %v4289_v25, 0 }
 0xc5d   : > { %3133 = vmatpush1.bf16.msra.mxu1 %v3113_v47 }
 0xc60   : > { %4292 = vmatmul.mubr.msk.bf16.vlgmr.msra.gmra.mxu1 %vm3108_vm9, %v6072_v5 }
 0xc61   : > { %v6076_v59 = vld [vmem:[#allocation5 + $0x8] sm:$0x11]  ;;  %3243 = vmatprep.mubr.bf16.mxu1 %v5147_v0  ;;  %v6079_v42 = vld [vmem:[#allocation5] sm:$0xee] }
 0xc62   : > { %v4294_v43 = vcombine.high %v3096_v20, %v6076_v59  ;;  %v4293_v48 = vcombine.low %v3096_v20, %v6076_v59  ;;  %v4339_v62 = vcombine.low %v6079_v42, %v6076_v59  ;;  %v4340_v57 = vcombine.high %v6079_v42, %v6076_v59 }
 0xc64   : > { %v3201_v52 = vshll.u32 %v4294_v43, 16  ;;  %v3194_v53 = vshll.u32 %v4293_v48, 16  ;;  %v3199_v27 = vshrl.u32 %v4294_v43, 16  ;;  %v3192_v32 = vshrl.u32 %v4293_v48, 16 }
 0xc65   : > { %v3488_v1 = vrot.slane %v4340_v57, 1  ;;  %v3487_v49 = vrot.slane %v4339_v62, 1 }
 0xc66   : > { %v3203_v28 = vrot.slane %v3201_v52, 1  ;;  %v3196_v58 = vrot.slane %v3194_v53, 1  ;;  %v6185_v53 = vld [vmem:[#allocation14] sm:$0xf] }
 0xc67   : > { %v3490_v11 = vsel %vm6445_vm10, %v3487_v49, 0 }
 0xc68   : > { %v3204_v7 = vor.u32 %v3203_v28, %v3199_v27  ;;  %v3197_v35 = vor.u32 %v3196_v58, %v3192_v32  ;;  %v6188_v27 = vsub.f32 1.0, %v6185_v53  ;;  %v3668_v28 = vrot.slane %v6185_v53, %v5455_v24 }
 0xc6a   : > { %4295 = vmatprep.subr.msk.bf16.mxu1 %vm6442_vm4, %v3204_v7  ;;  %v3206_v36 = vsel %vm6443_vm3, %v3197_v35, 0  ;;  %v3691_v7 = vrot.slane %v6188_v27, %v5459_v29  ;;  %v3673_v35 = vrot.slane %v6185_v53, %v5459_v29 }
 0xc6b   : > { %3226 = vmatpush1.bf16.msra.mxu1 %v3206_v36 }
 0xc6c   : > { %3338 = vmatprep.subr.bf16.mxu1 %v5147_v0 }
 0xc6e   : > { %4296 = vmatmul.mubr.msk.bf16.vlgmr.msra.gmra.mxu1 %vm3108_vm9, %v6072_v5 }
 0xc6f   : > { %3339 = vmatpush1.bf16.msra.mxu1 %v4798_v37 }
 0xc70   : > { %3340 = vmatprep.subr.bf16.mxu1 %v5147_v0 }
 0xc73   : > { %3341 = vmatpush1.bf16.msra.mxu1 %v4799_v38 }
 0xc74   : > { %3342 = vmatprep.subr.bf16.mxu1 %v5147_v0 }
 0xc77   : > { %3343 = vmatpush1.bf16.msra.mxu1 %v4800_v39 }
 0xc78   : > { %3344 = vmatprep.subr.bf16.mxu1 %v5147_v0 }
 0xc7b   : > { %3345 = vmatpush1.bf16.msra.mxu1 %v4801_v40 }
 0xc7c   : > { %3346 = vmatprep.subr.bf16.mxu1 %v5147_v0 }
 0xc7f   : > { %3347 = vmatpush1.bf16.msra.mxu1 %v4802_v41 }
 0xc80   : > { %3348 = vmatprep.subr.bf16.mxu1 %v5147_v0 }
 0xc83   : > { %3349 = vmatpush1.bf16.msra.mxu1 %v4803_v44 }
 0xc84   : > { %3350 = vmatprep.subr.bf16.mxu1 %v5147_v0 }
 0xc87   : > { %3351 = vmatpush1.bf16.msra.mxu1 %v4804_v46 }
 0xc88   : > { %3352 = vmatprep.subr.bf16.mxu1 %v5147_v0 }
 0xc8b   : > { %3353 = vmatpush1.bf16.msra.mxu1 %v4805_v55 }
 0xc8c   : > { %3366 = vmatprep.subr.bf16.mxu1 %v5147_v0 }
 0xc8f   : > { %3367 = vmatpush2.bf16.msra.mxu1 %v4806_v26 }
 0xc90   : > { %3368 = vmatprep.subr.bf16.mxu1 %v5147_v0 }
 0xc93   : > { %3369 = vmatpush2.bf16.msra.mxu1 %v4807_v61 }
 0xc94   : > { %4341 = vmatprep.subr.msk.bf16.mxu1 %vm6444_vm7, %v3488_v1 }
 0xd20   : > { %v3152_v3 = vpop.f32.mrf.mxu1 }
 0xd21   : > { %v3159_v4 = vpack.c.bf16 %v3152_v3, %v3152_v3 }
 0xd22   : > { %v3154_v6 = vpop.f32.mrf.mxu1 }
 0xd23   : > { %v3160_v60 = vpack.c.bf16 %v3154_v6, %v3154_v6 }
 0xd24   : > { %v3156_v8 = vpop.f32.mrf.mxu1 }
 0xd25   : > { %4338 = vmatprep.mubr.msk.bf16.mxu0 %vm1824_vm1, %v3160_v60 }
 0xd26   : > { %v3157_v9 = vpop.f32.mrf.mxu1  ;;  %3474 = vmatmul.mubr.bf16.vlgmr.msra.gmra.mxu0 %v3159_v4 }
 0xd27   : > { %3623 = vmatpush1.bf16.msra.mxu0 %v4820_v34 }
 0xd28   : > { %3624 = vmatprep.subr.bf16.mxu0 %v5147_v0 }
 0xd2b   : > { %3625 = vmatpush1.bf16.msra.mxu0 %v4821_v45 }
 0xd2c   : > { %3626 = vmatprep.subr.bf16.mxu0 %v5147_v0 }
 0xd2e   : > { %v3245_v33 = vpop.f32.mrf.mxu1 }
 0xd2f   : > { %3627 = vmatpush1.bf16.msra.mxu0 %v4822_v21  ;;  %v3252_v54 = vpack.c.bf16 %v3245_v33, %v3245_v33 }
 0xd30   : > { %v3247_v30 = vpop.f32.mrf.mxu1  ;;  %3628 = vmatprep.subr.bf16.mxu0 %v5147_v0 }
 0xd31   : > { %v3253_v50 = vpack.c.bf16 %v3247_v30, %v3247_v30 }
 0xd32   : > { %v3249_v10 = vpop.f32.mrf.mxu1 }
 0xd33   : > { %4327 = vmatprep.mubr.msk.bf16.mxu1 %vm1824_vm1, %v3253_v50  ;;  %3629 = vmatpush1.bf16.msra.mxu0 %v4823_v56 }
 0xd34   : > { %v3250_v31 = vpop.f32.mrf.mxu1  ;;  %3371 = vmatmul.mubr.bf16.vlgmr.msra.gmra.mxu1 %v3252_v54  ;;  %3630 = vmatprep.subr.bf16.mxu0 %v5147_v0 }
 0xd35   : > { %3510 = vmatpush1.bf16.msra.mxu1 %v3490_v11  ;;  %3527 = vmatprep.mubr.bf16.mxu1 %v5147_v0 }
 0xd37   : > { %3631 = vmatpush1.bf16.msra.mxu0 %v4824_v23 }
 0xd38   : > { %3632 = vmatprep.subr.bf16.mxu0 %v5147_v0 }
 0xd3b   : > { %3633 = vmatpush1.bf16.msra.mxu0 %v4825_v12 }
 0xd3c   : > { %4342 = vmatmul.mubr.msk.bf16.vlgmr.msra.gmra.mxu1 %vm3108_vm9, %v6072_v5  ;;  %3634 = vmatprep.subr.bf16.mxu0 %v5147_v0 }
 0xd3f   : > { %3635 = vmatpush1.bf16.msra.mxu0 %v4826_v13 }
 0xd40   : > { %3636 = vmatprep.subr.bf16.mxu0 %v5147_v0 }
 0xd43   : > { %3637 = vmatpush1.bf16.msra.mxu0 %v4827_v14 }
 0xd44   : > { %3650 = vmatprep.subr.bf16.mxu0 %v5147_v0 }
 0xd47   : > { %3651 = vmatpush2.bf16.msra.mxu0 %v4828_v15 }
 0xd48   : > { %3652 = vmatprep.subr.bf16.mxu0 %v5147_v0 }
 0xd4b   : > { %3653 = vmatpush2.bf16.msra.mxu0 %v4829_v16 }
 0xde6   : > { %v3475_v17 = vpop.f32.mrf.mxu0 }
 0xde8   : > { %v3477_v18 = vpop.f32.mrf.mxu0 }
 0xdea   : > { %v3478_v19 = vpop.f32.mrf.mxu0 }
 0xdec   : > { %v3479_v20 = vpop.f32.mrf.mxu0 }
 0xdf4   : > { %v3372_v22 = vpop.f32.mrf.mxu1 }
 0xdf5   : > { %v3476_v25 = vadd.f32 %v3475_v17, %v3372_v22 }
 0xdf6   : > { %v3374_v47 = vpop.f32.mrf.mxu1 }
 0xdf8   : > { %v3375_v5 = vpop.f32.mrf.mxu1 }
 0xdfa   : > { %v3376_v59 = vpop.f32.mrf.mxu1 }
 0xdfc   : > { %v3529_v42 = vpop.f32.mrf.mxu1 }
 0xdfd   : > { %v3536_v62 = vpack.c.bf16 %v3529_v42, %v3529_v42 }
 0xdfe   : > { %v3531_v43 = vpop.f32.mrf.mxu1 }
 0xdff   : > { %v3537_v48 = vpack.c.bf16 %v3531_v43, %v3531_v43 }
 0xe00   : > { %v3533_v52 = vpop.f32.mrf.mxu1 }
 0xe01   : > { %4373 = vmatprep.mubr.msk.bf16.mxu0 %vm1824_vm1, %v3537_v48  ;;  %vm3675_vm1 = vcmask 519168  }
 0xe02   : > { %v3534_v0 = vpop.f32.mrf.mxu1  ;;  %3655 = vmatmul.mubr.bf16.vlgmr.msra.gmra.mxu0 %v3536_v62 }
 0xec2   : > { %v3656_v32 = vpop.f32.mrf.mxu0 }
 0xec3   : > { %v3662_v58 = vadd.f32 %v3656_v32, %v3476_v25 }
 0xec4   : > { %v3658_v36 = vpop.f32.mrf.mxu0 }
 0xec5   : > { %v3669_v37 = vadd.f32 %v3668_v28, %v3662_v58 }
 0xec6   : > { %v3659_v38 = vpop.f32.mrf.mxu0 }
 0xec7   : > { %v3692_v39 = vmul.f32 %v3691_v7, %v3669_v37  ;;  %v3674_v40 = vmul.f32 %v3673_v35, %v3669_v37 }
 0xec8   : > { %v3660_v41 = vpop.f32.mrf.mxu0 }
 0xec9   : > { %v3693_v44 = vsel %vm3675_vm1, %v3692_v39, 0.0  ;;  %v3676_v46 = vsel %vm3675_vm1, %v3674_v40, 0.0 }
 0xeca   : > { %3694 = vadd.xlane.f32.xlu0 %v3693_v44  ;;  %3677 = vadd.xlane.f32.xlu1 %v3676_v46 }
 0xf53   : > { %v3695_v24 = vpop.xlane.xlu0 %3694  ;;  %v3678_v55 = vpop.xlane.xlu1 %3677 }
 0xf54   : > { %v3696_v26 = vrot.slane %v3695_v24, 4  ;;  %v3679_v57 = vrot.slane %v3678_v55, 4 }
 0xf56   : > { %v3697_v61 = vadd.f32 %v3696_v26, %v3695_v24  ;;  %v3680_v1 = vadd.f32 %v3679_v57, %v3678_v55 }
 0xf58   : > { %v3698_v2 = vrot.slane %v3697_v61, 2  ;;  %v3681_v3 = vrot.slane %v3680_v1, 2 }
 0xf5a   : > { %v3682_v4 = vadd.f32 %v3681_v3, %v3680_v1  ;;  %v3699_v6 = vadd.f32 %v3698_v2, %v3697_v61 }
 0xf5c   : > { %v3683_v60 = vrot.slane %v3682_v4, 1  ;;  %v3700_v34 = vrot.slane %v3699_v6, 1 }
 0xf5e   : > { %v3684_v8 = vadd.f32 %v3683_v60, %v3682_v4  ;;  %v3701_v9 = vadd.f32 %v3700_v34, %v3699_v6 }
 0xf60   : > { %4540 = vpush %v3684_v8 }
 0xf61   : > { %4542 = vpush %v3701_v9 }
 0xf91   : > { %s4541_s3 = spop %4540 }
 0xf92   : > { %v3686_v45 = vstv %s4541_s3  ;;  %s4543_s20 = spop %4542 }
 0xf93   : > { %v3687_v21 = vmul.f32 0.0078125, %v3686_v45  ;;  %v3703_v33 = vstv %s4543_s20  ;;  %s6221_s20 = scalar_lea.hbm %s6358_s13, %s4380_s27 }
 0xf94   : > { %v3704_v56 = vmul.f32 0.0078125, %v3703_v33 }
 0xf95   : > { %v3705_v30 = vmul.f32 %v3687_v21, %v6185_v53 }
 0xf96   : > { %v3706_v49 = vmul.f32 %v3704_v56, %v6188_v27 }
 0xf98   : > { %v3707_v50 = vadd.f32 %v3706_v49, %v3705_v30 }
 0xf9a   : > { %v3711_v54 = vrot.slane %v3707_v50, %v5459_v29 }
 0xf9c   : > { %v6201_v10 = vsub.f32 %v3669_v37, %v3711_v54 }
 0xf9e   : > { %v3713_v23 = vmul.f32 %v6201_v10, %v6201_v10 }
 0xfa0   : > { %v3727_v31 = vmul.f32 %v3713_v23, %v3691_v7  ;;  %v3714_v11 = vmul.f32 %v3713_v23, %v3673_v35 }
 0xfa2   : > { %v3728_v12 = vsel %vm3675_vm1, %v3727_v31, 0.0  ;;  %v3715_v13 = vsel %vm3675_vm1, %v3714_v11, 0.0 }
 0xfa3   : > { %3729 = vadd.xlane.f32.xlu0 %v3728_v12  ;;  %3716 = vadd.xlane.f32.xlu1 %v3715_v13 }
 0xfa4   : > { %4991 = shalt.err (!%p4988_p5)
}
 0xfa5   : > { %s4992_s21 = scalar_lea.hbm %s6215_s29, 128  ;;  %s4996_s26 = scalar_lea.hbm %s6357_s12, 256 }
 0xfa6   : > { %p4993_p4 = scmp.ne.s32.totalorder %s6215_s29, %s4992_s21  ;;  %p4997_p11 = scmp.lt.s32.totalorder %s6215_s29, %s6357_s12 }
 0xfa7   : > { %p4998_p10 = scmp.lt.s32.totalorder %s4996_s26, %s4992_s21 }
 0xfa8   : > { %p4994_p8 = pnand %p4993_p4, %p6446_p9 }
 0xfa9   : > { %p4999_p7 = por %p4998_p10, %p4997_p11 }
 0xfaa   : > { %p4995_p3 = pneg %p4994_p8 }
 0xfac   : > { %p5000_p12 = pnand %p4999_p7, %p4995_p3 }
 0xfae   : > { %5003 = shalt.err (!%p5000_p12)
}
 0xfaf   : > { %4567 = dma.vmem_to_hbm [thread:$0]  (%p6446_p9), %s3812_s18, 128, %s6215_s29, %s6223_s23  }
 0xfb0   : > { %s4392_s0 = sshll.u32 %s5253_s17, 9  ;;  %s3824_s21 = sshll.u32 %s6014_s14, 4  ;;  %s3825_s21 = int_to_ptr.vmem [resolvable:$true] %s3824_s21 }
 0xfb1   : > { %s6246_s5 = scalar_lea.hbm %s6356_s11, %s4392_s0  ;;  %s3767_s22 = scalar_lea.sflag [#allocation8], %s5383_s8 }
 0xfb2   : > { %s5004_s27 = scalar_lea.vmem %s6208_s19, 512  ;;  %s5153_s26 = smov [#allocation15]  }
 0xfb3   : > { %p5005_p13 = scmp.ne.s32.totalorder %s6208_s19, %s5004_s27  ;;  %s5008_s1 = sshll.u32 %s5153_s26, 4  ;;  %s5009_s1 = int_to_ptr.vmem [resolvable:$false] %s5008_s1 }
 0xfb4   : > { %s5010_s3 = scalar_lea.vmem %s5009_s1, 1024  ;;  %p5011_p2 = scmp.lt.s32.totalorder %s6208_s19, %s5009_s1 }
 0xfb5   : > { %p5006_p0 = pnand %p5005_p13, %p6446_p9  ;;  %p5012_p6 = scmp.lt.s32.totalorder %s5010_s3, %s5004_s27 }
 0xfb7   : > { %p5007_p1 = pneg %p5006_p0  ;;  %p5013_p5 = por %p5012_p6, %p5011_p2 }
 0xfb9   : > { %p5014_p4 = pnand %p5013_p5, %p5007_p1 }
 0xfbb   : > { %5017 = shalt.err (!%p5014_p4)
}
 0xfbc   : > { %s5018_s29 = scalar_lea.hbm %s6246_s5, 512  ;;  %s5022_s2 = scalar_lea.hbm %s6356_s11, 1024 }
 0xfbd   : > { %p5019_p8 = scmp.ne.s32.totalorder %s6246_s5, %s5018_s29  ;;  %p5023_p10 = scmp.lt.s32.totalorder %s6246_s5, %s6356_s11 }
 0xfbe   : > { %p5024_p7 = scmp.lt.s32.totalorder %s5022_s2, %s5018_s29 }
 0xfbf   : > { %p5020_p3 = pnand %p5019_p8, %p6446_p9 }
 0xfc0   : > { %p5025_p12 = por %p5024_p7, %p5023_p10 }
 0xfc1   : > { %p5021_p11 = pneg %p5020_p3 }
 0xfc3   : > { %p5026_p13 = pnand %p5025_p12, %p5021_p11 }
 0xfc5   : > { %5029 = shalt.err (!%p5026_p13)
}
 0xfc6   : > { %s5154_s27 = smov 256   ;;  %s6447_s1 = smov 16  }
 0xfc7   : > { %4566 = dma.vmem_to_hbm [thread:$0]  (%p6446_p9), %s6208_s19, 512, %s6246_s5, %s3767_s22, %s5154_s27, %s5154_s27, %s6447_s1  }
 0xfc8   : > { %s5030_s3 = scalar_lea.vmem %s3825_s21, 128  ;;  %s5155_s29 = smov [#allocation18]  }
 0xfc9   : > { %p5031_p0 = scmp.ne.s32.totalorder %s3825_s21, %s5030_s3  ;;  %s5034_s18 = sshll.u32 %s5155_s29, 4  ;;  %s5035_s18 = int_to_ptr.vmem [resolvable:$false] %s5034_s18 }
 0xfca   : > { %s5036_s0 = scalar_lea.vmem %s5035_s18, 256  ;;  %p5037_p6 = scmp.lt.s32.totalorder %s3825_s21, %s5035_s18 }
 0xfcb   : > { %p5032_p1 = pnand %p5031_p0, %p6446_p9  ;;  %p5038_p5 = scmp.lt.s32.totalorder %s5036_s0, %s5030_s3 }
 0xfcd   : > { %p5033_p2 = pneg %p5032_p1  ;;  %p5039_p4 = por %p5038_p5, %p5037_p6 }
 0xfcf   : > { %p5040_p8 = pnand %p5039_p4, %p5033_p2 }
 0xfd1   : > { %5043 = shalt.err (!%p5040_p8)
}
 0xfd2   : > { %s5044_s14 = scalar_lea.hbm %s6221_s20, 128  ;;  %s5048_s22 = scalar_lea.hbm %s6358_s13, 256 }
 0xfd3   : > { %p5045_p3 = scmp.ne.s32.totalorder %s6221_s20, %s5044_s14  ;;  %p5049_p7 = scmp.lt.s32.totalorder %s6221_s20, %s6358_s13 }
 0xfd4   : > { %p5050_p12 = scmp.lt.s32.totalorder %s5048_s22, %s5044_s14 }
 0xfd5   : > { %p5046_p11 = pnand %p5045_p3, %p6446_p9 }
 0xfd6   : > { %p5051_p13 = por %p5050_p12, %p5049_p7 }
 0xfd7   : > { %p5047_p10 = pneg %p5046_p11 }
 0xfd9   : > { %p5052_p0 = pnand %p5051_p13, %p5047_p10 }
 0xfdb   : > { %5055 = shalt.err (!%p5052_p0)
}
 0xfdc   : > { %4568 = dma.vmem_to_hbm [thread:$0]  (%p6446_p9), %s3825_s21, 128, %s6221_s20, %s6223_s23   ;;  %v3755_v39 = vrot.slane %v6185_v53, %v5581_v51  ;;  %v3760_v41 = vrot.slane %v6185_v53, %v5586_v63 }
 0xfdd   : > { %s4057_s20 = sshll.u32 %s5383_s8, 2  ;;  %s4382_s21 = sshll.u32 %s5253_s17, 6 }
 0xfde   : > { %s567_s27 = scalar_lea.vmem [#allocation19], %s4057_s20  ;;  %s6448_s18 = sld [smem:[#allocation36_spill]] }
 0xfdf   : > { %s3837_s1 = sshll.u32 %s567_s27, 4  ;;  %s3782_s14 = scalar_lea.sflag [#allocation20], %s5383_s8  ;;  %s3838_s1 = int_to_ptr.vmem [resolvable:$true] %s3837_s1 }
 0xfe0   : > { %s5056_s19 = scalar_lea.vmem %s3838_s1, 64  ;;  %s5156_s17 = smov [#allocation19]  }
 0xfe1   : > { %p5057_p1 = scmp.ne.s32.totalorder %s3838_s1, %s5056_s19  ;;  %s5060_s5 = sshll.u32 %s5156_s17, 4  ;;  %s5061_s5 = int_to_ptr.vmem [resolvable:$false] %s5060_s5 }
 0xfe2   : > { %s5062_s22 = scalar_lea.vmem %s5061_s5, 128  ;;  %p5063_p5 = scmp.lt.s32.totalorder %s3838_s1, %s5061_s5 }
 0xfe3   : > { %p5058_p2 = pnand %p5057_p1, %p6446_p9  ;;  %p5064_p4 = scmp.lt.s32.totalorder %s5062_s22, %s5056_s19 }
 0xfe4   : > { %s6305_s0 = scalar_lea.hbm %s6448_s18, %s4382_s21 }
 0xfe5   : > { %p5059_p6 = pneg %p5058_p2  ;;  %p5065_p8 = por %p5064_p4, %p5063_p5 }
 0xfe7   : > { %p5066_p3 = pnand %p5065_p8, %p5059_p6 }
0x102c   : > { %v3730_v14 = vpop.xlane.xlu0 %3729  ;;  %v3717_v15 = vpop.xlane.xlu1 %3716 }
0x102d   : > { %v3731_v16 = vrot.slane %v3730_v14, 4  ;;  %v3718_v17 = vrot.slane %v3717_v15, 4 }
0x102f   : > { %v3732_v18 = vadd.f32 %v3731_v16, %v3730_v14  ;;  %v3719_v19 = vadd.f32 %v3718_v17, %v3717_v15 }
0x1031   : > { %v3733_v20 = vrot.slane %v3732_v18, 2  ;;  %v3720_v22 = vrot.slane %v3719_v19, 2 }
0x1033   : > { %v3734_v25 = vadd.f32 %v3733_v20, %v3732_v18  ;;  %v3721_v47 = vadd.f32 %v3720_v22, %v3719_v19 }
0x1035   : > { %v3722_v5 = vrot.slane %v3721_v47, 1  ;;  %v3735_v59 = vrot.slane %v3734_v25, 1 }
0x1037   : > { %v3723_v42 = vadd.f32 %v3722_v5, %v3721_v47  ;;  %v3736_v43 = vadd.f32 %v3735_v59, %v3734_v25 }
0x1039   : > { %4544 = vpush %v3723_v42 }
0x103a   : > { %4546 = vpush %v3736_v43 }
0x106a   : > { %s4545_s26 = spop %4544 }
0x106b   : > { %v3725_v48 = vstv %s4545_s26  ;;  %s4547_s23 = spop %4546 }
0x106c   : > { %v3726_v62 = vmul.f32 0.0078125, %v3725_v48  ;;  %v3738_v52 = vstv %s4547_s23 }
0x106d   : > { %v3739_v0 = vmul.f32 0.0078125, %v3738_v52 }
0x106e   : > { %v3740_v28 = vadd.f32 1e-05, %v3726_v62 }
0x106f   : > { %v3743_v32 = vadd.f32 1e-05, %v3739_v0 }
0x1070   : > { %4842 = vrsqrt.f32 %v3740_v28 }
0x1071   : > { %4844 = vrsqrt.f32 %v3743_v32 }
0x107d   : > { %v4843_v58 = vpop.eup %4842 }
0x107e   : > { %v4845_v7 = vpop.eup %4844  ;;  %v3742_v35 = vmul.f32 %v4843_v58, %v6185_v53 }
0x107f   : > { %v3745_v36 = vmul.f32 %v4845_v7, %v6188_v27 }
0x1081   : > { %v3746_v37 = vadd.f32 %v3745_v36, %v3742_v35 }
0x1083   : > { %v3750_v38 = vrot.slane %v3746_v37, %v5459_v29 }
0x1085   : > { %v3751_v40 = vmul.f32 %v3750_v38, %v6201_v10 }
0x1087   : > { %v3756_v44 = vmul.f32 %v3755_v39, %v3751_v40 }
0x1089   : > { %v3761_v46 = vadd.f32 %v3760_v41, %v3756_v44 }
0x108b   : > { %vm3762_vm6 = vcmp.gt.f32.partialorder %v3761_v46, 0.0  ;;  %v3763_v27 = vmul.f32 0.2, %v3761_v46 }
0x108d   : > { %v3764_v29 = vsel %vm3762_vm6, %v3761_v46, %v3763_v27 }
0x108e   : > { %3765 = vst.msk [vmem:[%s567_s27] sm:$0xf] %vm3675_vm1, %v3764_v29 }
0x108f   : > { %5069 = shalt.err (!%p5066_p3)
}
0x1090   : > { %s5070_s2 = scalar_lea.hbm %s6305_s0, 64  ;;  %s5074_s26 = scalar_lea.hbm %s6448_s18, 128 }
0x1091   : > { %p5071_p11 = scmp.ne.s32.totalorder %s6305_s0, %s5070_s2  ;;  %p5075_p12 = scmp.lt.s32.totalorder %s6305_s0, %s6448_s18 }
0x1092   : > { %p5076_p13 = scmp.lt.s32.totalorder %s5074_s26, %s5070_s2 }
0x1093   : > { %p5072_p10 = pnand %p5071_p11, %p6446_p9 }
0x1094   : > { %p5077_p0 = por %p5076_p13, %p5075_p12 }
0x1095   : > { %p5073_p7 = pneg %p5072_p10 }
0x1097   : > { %p5078_p1 = pnand %p5077_p0, %p5073_p7 }
0x1099   : > { %5081 = shalt.err (!%p5078_p1)
}
0x109a   : > { %4569 = dma.vmem_to_hbm [thread:$0]  (%p6446_p9), %s3838_s1, 64, %s6305_s0, %s3782_s14  }
0x109b PF: > { %s6449_s21 = sld [smem:[#allocation27_spill]]  ;;  %p6452_p6 = scmp.ge.s32.totalorder %s5136_s16, 2 }
0x109c   : > { %s6450_s27 = sld [smem:[#allocation28_spill]] }
0x10a1   : > { %s3849_s3 = sand.u32 1, %s6449_s21  }
0x10a2   : > { %p6451_p2 = scmp.ne.s32.totalorder %s6450_s27, 0  ;;  %s3850_s29 = scalar_lea.sflag [#allocation8], %s3849_s3 }
0x10a4   : > { %p4592_p5 = pnand %p6452_p6, %p6451_p2 }
0x10a6   : > { %p4593_p4 = pneg %p4592_p5 }
0x10a8   : > { %5111 = dma.done.wait (%p4593_p4), %s3850_s29, 512  }
0x10a9   : > { %5113 = vsyncadd (%p4593_p4), %s3850_s29, 4294966784  ;;  %s6453_s19 = sadd.s32 4294967294, %s5136_s16  }
0x10aa   : > { %s3858_s17 = sand.u32 1, %s6453_s19  }
0x10ab   : > { %s3859_s5 = scalar_lea.sflag [#allocation17], %s3858_s17 }
0x10ac   : > { %5115 = dma.done.wait (%p4593_p4), %s3859_s5, 256  }
0x10ad   : > { %5117 = vsyncadd (%p4593_p4), %s3859_s5, 4294967040  ;;  %s3877_s25 = scalar_lea.sflag [#allocation20], %s3849_s3 }
0x10ae   : > { %5119 = dma.done.wait (%p4593_p4), %s3877_s25, 64  }
0x10af   : > { %5121 = vsyncadd (%p4593_p4), %s3877_s25, 4294967232  ;;  %s6454_s1 = sld [smem:[#allocation29_spill]]  ;;  %p36_p9 = scmp.ge.s32.totalorder %s5325_s28, 4  }
0x10b0   : > { %s6455_s29 = smov %s5128_s30  ;;  %s6456_s30 = smov %s5132_s15 }
0x10b1   : > { %s6458_s16 = smov %s5325_s28  ;;  %38 = sbr.rel (!%p36_p9) target bundleno = 19 (0x13), region = 182 }
0x10b5   : > { %s6457_s15 = smov %s6454_s1 }
0x10b6   :  { %3882 = vsyncpa [#allocation7], 1 }
0x10b7   :  { %3884 = vsyncpa [#allocation7 + $0x1], 1 }
0x10b8   :  { %3885 = vsyncpa [#allocation10], 1 }
0x10b9   :  { %3886 = vsyncpa [#allocation13], 1 }
0x10ba   :  { %3887 = vsyncpa [#allocation8], 1 }
0x10bb   :  { %3889 = vsyncpa [#allocation8 + $0x1], 1 }
0x10bc   :  { %3890 = vsyncpa [#allocation17], 1 }
0x10bd   :  { %3892 = vsyncpa [#allocation17 + $0x1], 1 }
0x10be   :  { %3893 = vsyncpa [#allocation20], 1 }
0x10bf   :  { %3895 = vsyncpa [#allocation20 + $0x1], 1 }

</bundles_post_ra>
